<compile_context>
chip_gen: v7x
topology: tpu7x:2x2x1
jax: 0.10.0
libtpu: 0.0.40
codegen_flags: <defaults>
</compile_context>

<pallas_src>
import functools

import jax
import jax.numpy as jnp
from jax.experimental import pallas as pl
from jax.experimental.pallas import tpu as pltpu

BN_EPS = 1e-5
KSIZE = 10     # Conv2d kernel_size=(10, 1)
POOL = 3       # MaxPool2d kernel_size=(3, 1), stride=(3, 1)
PAD_L = 4      # torch padding='same', even kernel: 4 left / 5 right
PAD_R = 5


def _elu(x):
    # clamp keeps the unselected exp branch finite (no inf fed to the where)
    return jnp.where(x > 0, x, jnp.exp(jnp.minimum(x, 0.0)) - 1.0)


# ---------------------------------------------------------------------------
# fused kernel
# ---------------------------------------------------------------------------
def _conv_block_body(x, w_ref, p_ref, pad_ref):
    """conv(10,'same') -> ELU -> maxpool(3) -> BN(eval) for one sample.

    x       : [Hin, Cin] f32 value
    w_ref   : [KSIZE, Cin, Cout]
    p_ref   : [3, Cout]   rows = (conv bias, bn scale, bn shift)
    pad_ref : VMEM scratch [Hin + KSIZE - 1, Cin]
    returns : [Hin // POOL, Cout]
    """
    hin, cin = x.shape
    cout = w_ref.shape[2]
    hout = hin // POOL

    # zero-padded copy of the input ('same' padding), kept in VMEM scratch
    pad_ref[...] = jnp.zeros_like(pad_ref)
    pad_ref[pl.ds(PAD_L, hin), :] = x

    # full-resolution conv: one [Hin, Cin] @ [Cin, Cout] dot per tap
    acc = jnp.zeros((hin, cout), jnp.float32)
    for r in range(KSIZE):
        acc = acc + jnp.dot(pad_ref[pl.ds(r, hin), :], w_ref[r],
                            preferred_element_type=jnp.float32)

    # maxpool(3,1): gather the three phases with one-hot selection matmuls and
    # take the elementwise max (exact: each selection row copies one acc row).
    row3 = POOL * jax.lax.broadcasted_iota(jnp.int32, (hout, hin), 0)
    col = jax.lax.broadcasted_iota(jnp.int32, (hout, hin), 1)
    pooled = None
    for j in range(POOL):
        sel = (col == row3 + j).astype(jnp.float32)
        phase = jnp.dot(sel, acc, preferred_element_type=jnp.float32)
        pooled = phase if pooled is None else jnp.maximum(pooled, phase)

    # bias + ELU (monotone, so pooling first is exact), then eval-BN affine
    z = _elu(pooled + p_ref[0:1, :])
    return z * p_ref[1:2, :] + p_ref[2:3, :]


def _cnn_kernel(nconv, *refs):
    x_ref = refs[0]
    conv_refs = refs[1:1 + 2 * nconv]
    (fw1_ref, fb1_ref, fw2_ref, fb2_ref,
     fw3_ref, fb3_ref) = refs[1 + 2 * nconv:7 + 2 * nconv]
    o_ref = refs[7 + 2 * nconv]
    pad_refs = refs[8 + 2 * nconv:]

    a = x_ref[0].astype(jnp.float32)                    # [H0, C0]
    for layer in range(nconv):
        a = _conv_block_body(a, conv_refs[2 * layer], conv_refs[2 * layer + 1],
                             pad_refs[layer])

    # FC head (BN1d already folded into fw1/fb1 and fw2/fb2 at trace time).
    # fw1 is pre-packed as [Hf, Cf, 144] so the [Hf, Cf] activation is consumed
    # without any in-kernel flatten/transpose.
    hf = fw1_ref.shape[0]
    h = jnp.zeros((1, fw1_ref.shape[2]), jnp.float32)
    for r in range(hf):
        h = h + jnp.dot(a[r:r + 1, :], fw1_ref[r],
                        preferred_element_type=jnp.float32)
    h = _elu(h + fb1_ref[...])
    h = _elu(jnp.dot(h, fw2_ref[...], preferred_element_type=jnp.float32)
             + fb2_ref[...])
    out = (jnp.dot(h, fw3_ref[...], preferred_element_type=jnp.float32)
           + fb3_ref[...])
    o_ref[0] = out.astype(o_ref.dtype)


# ---------------------------------------------------------------------------
# wrapper
# ---------------------------------------------------------------------------
def cnn_forward(x_nchw, params):
    """x_nchw: [N, 22, H, 1] (PyTorch NCHW)  ->  logits [N, 4]."""
    n = x_nchw.shape[0]
    x = jnp.transpose(x_nchw[..., 0], (0, 2, 1))        # [N, H, C]

    # ---- trace-time parameter prep (tiny XLA ops on weights only) ----------
    conv_in = []
    pad_scratch = []
    h = x.shape[1]
    for (w, b, gamma, beta, mu, var) in params["convs"]:
        scale = gamma * jax.lax.rsqrt(var + BN_EPS)
        shift = beta - mu * scale
        conv_in += [w, jnp.concatenate([b, scale, shift], axis=0)]   # [3,Cout]
        pad_scratch.append(
            pltpu.VMEM((h + KSIZE - 1, w.shape[1]), jnp.float32))
        h //= POOL

    (w1, b1, g1, be1, m1, v1,
     w2, b2, g2, be2, m2, v2, w3, b3) = params["fc"]
    s1 = g1 * jax.lax.rsqrt(v1 + BN_EPS)
    s2 = g2 * jax.lax.rsqrt(v2 + BN_EPS)
    w1f, b1f = w1 * s1, (b1 - m1) * s1 + be1            # Linear + BN1d folded
    w2f, b2f = w2 * s2, (b2 - m2) * s2 + be2
    # torch flattens [N, C, Hf, 1] channel-major; re-pack w1 as [Hf, Cf, 144]
    cf = params["convs"][-1][0].shape[2]
    hf = w1f.shape[0] // cf
    w1r = jnp.transpose(w1f.reshape(cf, hf, w1f.shape[1]), (1, 0, 2))

    inputs = (x, *conv_in, w1r, b1f, w2f, b2f, w3, b3)

    def _const_spec(a):
        return pl.BlockSpec(a.shape, lambda i, _nd=a.ndim: (0,) * _nd)

    in_specs = ([pl.BlockSpec((1,) + x.shape[1:], lambda i: (i, 0, 0))]
                + [_const_spec(a) for a in inputs[1:]])

    out_dim = w3.shape[1]
    nconv = len(params["convs"])

    out3 = pl.pallas_call(
        functools.partial(_cnn_kernel, nconv),
        out_shape=jax.ShapeDtypeStruct((n, 1, out_dim), jnp.float32),
        grid=(n,),
        in_specs=in_specs,
        out_specs=pl.BlockSpec((1, 1, out_dim), lambda i: (i, 0, 0)),
        scratch_shapes=pad_scratch,
        compiler_params=pltpu.CompilerParams(
            dimension_semantics=("parallel",)),
    )(*inputs)
    return out3[:, 0, :]


# ---------------------------------------------------------------------------
# parameter init (matches the PyTorch module structure, eval-mode BN stats)
# ---------------------------------------------------------------------------
def init_params(key, h0):
    conv_dims = [(22, 25), (25, 50), (50, 100), (100, 200)]
    keys = iter(jax.random.split(key, 32))
    convs = []
    h = h0
    for cin, cout in conv_dims:
        w = (jax.random.normal(next(keys), (KSIZE, cin, cout), jnp.float32)
             / jnp.sqrt(float(cin * KSIZE)))
        b = jax.random.normal(next(keys), (1, cout), jnp.float32) * 0.01
        gamma = jnp.ones((1, cout), jnp.float32)
        beta = jnp.zeros((1, cout), jnp.float32)
        mu = jnp.zeros((1, cout), jnp.float32)
        var = jnp.ones((1, cout), jnp.float32)
        convs.append((w, b, gamma, beta, mu, var))
        h //= POOL
    flat = conv_dims[-1][1] * h                 # = out_shape in the torch ctor

    fc = []
    for fin, fout, with_bn in [(flat, 144, True), (144, 44, True), (44, 4, False)]:
        w = (jax.random.normal(next(keys), (fin, fout), jnp.float32)
             / jnp.sqrt(float(fin)))
        b = jax.random.normal(next(keys), (1, fout), jnp.float32) * 0.01
        fc.extend([w, b])
        if with_bn:
            fc.extend([jnp.ones((1, fout), jnp.float32),
                       jnp.zeros((1, fout), jnp.float32),
                       jnp.zeros((1, fout), jnp.float32),
                       jnp.ones((1, fout), jnp.float32)])
    return {"convs": convs, "fc": tuple(fc)}


# ---------------------------------------------------------------------------
# pure-JAX reference (for correctness check)
# ---------------------------------------------------------------------------
def _ref_conv_block(x, params):
    w, b, gamma, beta, mu, var = params
    n, h, _ = x.shape
    xp = jnp.pad(x, ((0, 0), (PAD_L, PAD_R), (0, 0)))
    out = jnp.zeros((n, h, w.shape[-1]), jnp.float32)
    for r in range(KSIZE):
        out = out + jnp.einsum("nhc,cd->nhd", xp[:, r:r + h, :], w[r])
    out = _elu(out + b)                         # conv -> ELU
    hout = h // POOL
    out = out[:, :hout * POOL].reshape(n, hout, POOL, -1).max(axis=2)  # pool
    return (out - mu) * (gamma * jax.lax.rsqrt(var + BN_EPS)) + beta   # BN


def _ref_forward(x_nchw, params):
    x = jnp.transpose(x_nchw[..., 0], (0, 2, 1))
    for cp in params["convs"]:
        x = _ref_conv_block(x, cp)
    n = x.shape[0]
    x = jnp.transpose(x, (0, 2, 1)).reshape(n, -1)      # torch flatten order
    (w1, b1, g1, be1, m1, v1,
     w2, b2, g2, be2, m2, v2, w3, b3) = params["fc"]

    def bn(h, g, be, m, v):
        return (h - m) * (g * jax.lax.rsqrt(v + BN_EPS)) + be

    h = _elu(bn(x @ w1 + b1, g1, be1, m1, v1))
    h = _elu(bn(h @ w2 + b2, g2, be2, m2, v2))
    return h @ w3 + b3


if __name__ == "__main__":
    key = jax.random.PRNGKey(0)
    kx, kp = jax.random.split(key)

    N, C, H, W = 2, 22, 81, 1                   # input_dim = (22, 81, 1)
    x_nchw = jax.random.normal(kx, (N, C, H, W), jnp.float32)
    params = init_params(kp, H)

    out = jax.jit(cnn_forward)(x_nchw, params)
    out = jax.block_until_ready(out)

    ref = _ref_forward(x_nchw, params)
    assert out.shape == (N, 4), out.shape
    assert bool(jnp.all(jnp.isfinite(out)))
    assert bool(jnp.allclose(out, ref, rtol=2e-3, atol=2e-3)), (out, ref)
    print("KERNEL_OK")
</pallas_src>

<mosaic_0001>
module attributes {stable_mosaic.version = 11 : i64} {
  func.func @_cnn_kernel(%arg0: i32, %arg1: memref<1x81x22xf32, #tpu.memory_space<vmem>>, %arg2: memref<10x22x25xf32, #tpu.memory_space<vmem>>, %arg3: memref<3x25xf32, #tpu.memory_space<vmem>>, %arg4: memref<10x25x50xf32, #tpu.memory_space<vmem>>, %arg5: memref<3x50xf32, #tpu.memory_space<vmem>>, %arg6: memref<10x50x100xf32, #tpu.memory_space<vmem>>, %arg7: memref<3x100xf32, #tpu.memory_space<vmem>>, %arg8: memref<10x100x200xf32, #tpu.memory_space<vmem>>, %arg9: memref<3x200xf32, #tpu.memory_space<vmem>>, %arg10: memref<1x200x144xf32, #tpu.memory_space<vmem>>, %arg11: memref<1x144xf32, #tpu.memory_space<vmem>>, %arg12: memref<144x44xf32, #tpu.memory_space<vmem>>, %arg13: memref<1x44xf32, #tpu.memory_space<vmem>>, %arg14: memref<44x4xf32, #tpu.memory_space<vmem>>, %arg15: memref<1x4xf32, #tpu.memory_space<vmem>>, %arg16: memref<1x1x4xf32, #tpu.memory_space<vmem>>, %arg17: memref<90x22xf32, #tpu.memory_space<vmem>>, %arg18: memref<36x25xf32, #tpu.memory_space<vmem>>, %arg19: memref<18x50xf32, #tpu.memory_space<vmem>>, %arg20: memref<12x100xf32, #tpu.memory_space<vmem>>) attributes {dimension_semantics = [#tpu.dimension_semantics<parallel>], iteration_bounds = array<i64: 2>, scalar_prefetch = 0 : i64, scratch_operands = 4 : i64, tpu.core_type = #tpu.core_type<tc>, window_params = [{transform_indices = @transform_0, window_bounds = array<i64: 1, 81, 22>}, {pipeline_mode = #tpu.pipeline_mode<synchronous>, transform_indices = @transform_1, window_bounds = array<i64: 10, 22, 25>}, {pipeline_mode = #tpu.pipeline_mode<synchronous>, transform_indices = @transform_2, window_bounds = array<i64: 3, 25>}, {pipeline_mode = #tpu.pipeline_mode<synchronous>, transform_indices = @transform_3, window_bounds = array<i64: 10, 25, 50>}, {pipeline_mode = #tpu.pipeline_mode<synchronous>, transform_indices = @transform_4, window_bounds = array<i64: 3, 50>}, {pipeline_mode = #tpu.pipeline_mode<synchronous>, transform_indices = @transform_5, window_bounds = array<i64: 10, 50, 100>}, {pipeline_mode = #tpu.pipeline_mode<synchronous>, transform_indices = @transform_6, window_bounds = array<i64: 3, 100>}, {pipeline_mode = #tpu.pipeline_mode<synchronous>, transform_indices = @transform_7, window_bounds = array<i64: 10, 100, 200>}, {pipeline_mode = #tpu.pipeline_mode<synchronous>, transform_indices = @transform_8, window_bounds = array<i64: 3, 200>}, {pipeline_mode = #tpu.pipeline_mode<synchronous>, transform_indices = @transform_9, window_bounds = array<i64: 1, 200, 144>}, {pipeline_mode = #tpu.pipeline_mode<synchronous>, transform_indices = @transform_10, window_bounds = array<i64: 1, 144>}, {pipeline_mode = #tpu.pipeline_mode<synchronous>, transform_indices = @transform_11, window_bounds = array<i64: 144, 44>}, {pipeline_mode = #tpu.pipeline_mode<synchronous>, transform_indices = @transform_12, window_bounds = array<i64: 1, 44>}, {pipeline_mode = #tpu.pipeline_mode<synchronous>, transform_indices = @transform_13, window_bounds = array<i64: 44, 4>}, {pipeline_mode = #tpu.pipeline_mode<synchronous>, transform_indices = @transform_14, window_bounds = array<i64: 1, 4>}, {transform_indices = @transform_15, window_bounds = array<i64: 1, 1, 4>}]} {
    %c0 = arith.constant 0 : index
    %c0_0 = arith.constant 0 : index
    %c0_1 = arith.constant 0 : index
    %0 = vector.load %arg1[%c0, %c0_0, %c0_1] : memref<1x81x22xf32, #tpu.memory_space<vmem>>, vector<1x81x22xf32>
    %1 = vector.shape_cast %0 : vector<1x81x22xf32> to vector<81x22xf32>
    %cst = arith.constant 0.000000e+00 : f32
    %2 = vector.broadcast %cst : f32 to vector<90x22xf32>
    %c0_2 = arith.constant 0 : index
    %c0_3 = arith.constant 0 : index
    %3 = vector.load %arg17[%c0_2, %c0_3] : memref<90x22xf32, #tpu.memory_space<vmem>>, vector<90x22xf32>
    tpu.vector_store %arg17[%c0_2, %c0_3], %2 {strides = array<i32>} : memref<90x22xf32, #tpu.memory_space<vmem>>, vector<90x22xf32>,
    %c4 = arith.constant 4 : index
    %c0_4 = arith.constant 0 : index
    %4 = vector.load %arg17[%c4, %c0_4] : memref<90x22xf32, #tpu.memory_space<vmem>>, vector<81x22xf32>
    tpu.vector_store %arg17[%c4, %c0_4], %1 {strides = array<i32>} : memref<90x22xf32, #tpu.memory_space<vmem>>, vector<81x22xf32>,
    %cst_5 = arith.constant 0.000000e+00 : f32
    %5 = vector.broadcast %cst_5 : f32 to vector<81x25xf32>
    %c0_6 = arith.constant 0 : index
    %c0_7 = arith.constant 0 : index
    %6 = vector.load %arg17[%c0_6, %c0_7] : memref<90x22xf32, #tpu.memory_space<vmem>>, vector<81x22xf32>
    %c0_8 = arith.constant 0 : index
    %c0_9 = arith.constant 0 : index
    %c0_10 = arith.constant 0 : index
    %7 = vector.load %arg2[%c0_8, %c0_9, %c0_10] : memref<10x22x25xf32, #tpu.memory_space<vmem>>, vector<1x22x25xf32>
    %8 = vector.shape_cast %7 : vector<1x22x25xf32> to vector<22x25xf32>
    %cst_11 = arith.constant dense<0.000000e+00> : vector<81x25xf32>
    %9 = tpu.matmul %6, %8, %cst_11 {dimension_numbers = #tpu.dot_dimension_numbers<[1], [0], [0], [1], [0, 0, 1, 1], [], []>} : vector<81x22xf32>, vector<22x25xf32>, vector<81x25xf32> -> vector<81x25xf32>
    %10 = arith.addf %5, %9 : vector<81x25xf32>
    %c1 = arith.constant 1 : index
    %c0_12 = arith.constant 0 : index
    %11 = vector.load %arg17[%c1, %c0_12] : memref<90x22xf32, #tpu.memory_space<vmem>>, vector<81x22xf32>
    %c1_13 = arith.constant 1 : index
    %c0_14 = arith.constant 0 : index
    %c0_15 = arith.constant 0 : index
    %12 = vector.load %arg2[%c1_13, %c0_14, %c0_15] : memref<10x22x25xf32, #tpu.memory_space<vmem>>, vector<1x22x25xf32>
    %13 = vector.shape_cast %12 : vector<1x22x25xf32> to vector<22x25xf32>
    %cst_16 = arith.constant dense<0.000000e+00> : vector<81x25xf32>
    %14 = tpu.matmul %11, %13, %cst_16 {dimension_numbers = #tpu.dot_dimension_numbers<[1], [0], [0], [1], [0, 0, 1, 1], [], []>} : vector<81x22xf32>, vector<22x25xf32>, vector<81x25xf32> -> vector<81x25xf32>
    %15 = arith.addf %10, %14 : vector<81x25xf32>
    %c2 = arith.constant 2 : index
    %c0_17 = arith.constant 0 : index
    %16 = vector.load %arg17[%c2, %c0_17] : memref<90x22xf32, #tpu.memory_space<vmem>>, vector<81x22xf32>
    %c2_18 = arith.constant 2 : index
    %c0_19 = arith.constant 0 : index
    %c0_20 = arith.constant 0 : index
    %17 = vector.load %arg2[%c2_18, %c0_19, %c0_20] : memref<10x22x25xf32, #tpu.memory_space<vmem>>, vector<1x22x25xf32>
    %18 = vector.shape_cast %17 : vector<1x22x25xf32> to vector<22x25xf32>
    %cst_21 = arith.constant dense<0.000000e+00> : vector<81x25xf32>
    %19 = tpu.matmul %16, %18, %cst_21 {dimension_numbers = #tpu.dot_dimension_numbers<[1], [0], [0], [1], [0, 0, 1, 1], [], []>} : vector<81x22xf32>, vector<22x25xf32>, vector<81x25xf32> -> vector<81x25xf32>
    %20 = arith.addf %15, %19 : vector<81x25xf32>
    %c3 = arith.constant 3 : index
    %c0_22 = arith.constant 0 : index
    %21 = vector.load %arg17[%c3, %c0_22] : memref<90x22xf32, #tpu.memory_space<vmem>>, vector<81x22xf32>
    %c3_23 = arith.constant 3 : index
    %c0_24 = arith.constant 0 : index
    %c0_25 = arith.constant 0 : index
    %22 = vector.load %arg2[%c3_23, %c0_24, %c0_25] : memref<10x22x25xf32, #tpu.memory_space<vmem>>, vector<1x22x25xf32>
    %23 = vector.shape_cast %22 : vector<1x22x25xf32> to vector<22x25xf32>
    %cst_26 = arith.constant dense<0.000000e+00> : vector<81x25xf32>
    %24 = tpu.matmul %21, %23, %cst_26 {dimension_numbers = #tpu.dot_dimension_numbers<[1], [0], [0], [1], [0, 0, 1, 1], [], []>} : vector<81x22xf32>, vector<22x25xf32>, vector<81x25xf32> -> vector<81x25xf32>
    %25 = arith.addf %20, %24 : vector<81x25xf32>
    %c4_27 = arith.constant 4 : index
    %c0_28 = arith.constant 0 : index
    %26 = vector.load %arg17[%c4_27, %c0_28] : memref<90x22xf32, #tpu.memory_space<vmem>>, vector<81x22xf32>
    %c4_29 = arith.constant 4 : index
    %c0_30 = arith.constant 0 : index
    %c0_31 = arith.constant 0 : index
    %27 = vector.load %arg2[%c4_29, %c0_30, %c0_31] : memref<10x22x25xf32, #tpu.memory_space<vmem>>, vector<1x22x25xf32>
    %28 = vector.shape_cast %27 : vector<1x22x25xf32> to vector<22x25xf32>
    %cst_32 = arith.constant dense<0.000000e+00> : vector<81x25xf32>
    %29 = tpu.matmul %26, %28, %cst_32 {dimension_numbers = #tpu.dot_dimension_numbers<[1], [0], [0], [1], [0, 0, 1, 1], [], []>} : vector<81x22xf32>, vector<22x25xf32>, vector<81x25xf32> -> vector<81x25xf32>
    %30 = arith.addf %25, %29 : vector<81x25xf32>
    %c5 = arith.constant 5 : index
    %c0_33 = arith.constant 0 : index
    %31 = vector.load %arg17[%c5, %c0_33] : memref<90x22xf32, #tpu.memory_space<vmem>>, vector<81x22xf32>
    %c5_34 = arith.constant 5 : index
    %c0_35 = arith.constant 0 : index
    %c0_36 = arith.constant 0 : index
    %32 = vector.load %arg2[%c5_34, %c0_35, %c0_36] : memref<10x22x25xf32, #tpu.memory_space<vmem>>, vector<1x22x25xf32>
    %33 = vector.shape_cast %32 : vector<1x22x25xf32> to vector<22x25xf32>
    %cst_37 = arith.constant dense<0.000000e+00> : vector<81x25xf32>
    %34 = tpu.matmul %31, %33, %cst_37 {dimension_numbers = #tpu.dot_dimension_numbers<[1], [0], [0], [1], [0, 0, 1, 1], [], []>} : vector<81x22xf32>, vector<22x25xf32>, vector<81x25xf32> -> vector<81x25xf32>
    %35 = arith.addf %30, %34 : vector<81x25xf32>
    %c6 = arith.constant 6 : index
    %c0_38 = arith.constant 0 : index
    %36 = vector.load %arg17[%c6, %c0_38] : memref<90x22xf32, #tpu.memory_space<vmem>>, vector<81x22xf32>
    %c6_39 = arith.constant 6 : index
    %c0_40 = arith.constant 0 : index
    %c0_41 = arith.constant 0 : index
    %37 = vector.load %arg2[%c6_39, %c0_40, %c0_41] : memref<10x22x25xf32, #tpu.memory_space<vmem>>, vector<1x22x25xf32>
    %38 = vector.shape_cast %37 : vector<1x22x25xf32> to vector<22x25xf32>
    %cst_42 = arith.constant dense<0.000000e+00> : vector<81x25xf32>
    %39 = tpu.matmul %36, %38, %cst_42 {dimension_numbers = #tpu.dot_dimension_numbers<[1], [0], [0], [1], [0, 0, 1, 1], [], []>} : vector<81x22xf32>, vector<22x25xf32>, vector<81x25xf32> -> vector<81x25xf32>
    %40 = arith.addf %35, %39 : vector<81x25xf32>
    %c7 = arith.constant 7 : index
    %c0_43 = arith.constant 0 : index
    %41 = vector.load %arg17[%c7, %c0_43] : memref<90x22xf32, #tpu.memory_space<vmem>>, vector<81x22xf32>
    %c7_44 = arith.constant 7 : index
    %c0_45 = arith.constant 0 : index
    %c0_46 = arith.constant 0 : index
    %42 = vector.load %arg2[%c7_44, %c0_45, %c0_46] : memref<10x22x25xf32, #tpu.memory_space<vmem>>, vector<1x22x25xf32>
    %43 = vector.shape_cast %42 : vector<1x22x25xf32> to vector<22x25xf32>
    %cst_47 = arith.constant dense<0.000000e+00> : vector<81x25xf32>
    %44 = tpu.matmul %41, %43, %cst_47 {dimension_numbers = #tpu.dot_dimension_numbers<[1], [0], [0], [1], [0, 0, 1, 1], [], []>} : vector<81x22xf32>, vector<22x25xf32>, vector<81x25xf32> -> vector<81x25xf32>
    %45 = arith.addf %40, %44 : vector<81x25xf32>
    %c8 = arith.constant 8 : index
    %c0_48 = arith.constant 0 : index
    %46 = vector.load %arg17[%c8, %c0_48] : memref<90x22xf32, #tpu.memory_space<vmem>>, vector<81x22xf32>
    %c8_49 = arith.constant 8 : index
    %c0_50 = arith.constant 0 : index
    %c0_51 = arith.constant 0 : index
    %47 = vector.load %arg2[%c8_49, %c0_50, %c0_51] : memref<10x22x25xf32, #tpu.memory_space<vmem>>, vector<1x22x25xf32>
    %48 = vector.shape_cast %47 : vector<1x22x25xf32> to vector<22x25xf32>
    %cst_52 = arith.constant dense<0.000000e+00> : vector<81x25xf32>
    %49 = tpu.matmul %46, %48, %cst_52 {dimension_numbers = #tpu.dot_dimension_numbers<[1], [0], [0], [1], [0, 0, 1, 1], [], []>} : vector<81x22xf32>, vector<22x25xf32>, vector<81x25xf32> -> vector<81x25xf32>
    %50 = arith.addf %45, %49 : vector<81x25xf32>
    %c9 = arith.constant 9 : index
    %c0_53 = arith.constant 0 : index
    %51 = vector.load %arg17[%c9, %c0_53] : memref<90x22xf32, #tpu.memory_space<vmem>>, vector<81x22xf32>
    %c9_54 = arith.constant 9 : index
    %c0_55 = arith.constant 0 : index
    %c0_56 = arith.constant 0 : index
    %52 = vector.load %arg2[%c9_54, %c0_55, %c0_56] : memref<10x22x25xf32, #tpu.memory_space<vmem>>, vector<1x22x25xf32>
    %53 = vector.shape_cast %52 : vector<1x22x25xf32> to vector<22x25xf32>
    %cst_57 = arith.constant dense<0.000000e+00> : vector<81x25xf32>
    %54 = tpu.matmul %51, %53, %cst_57 {dimension_numbers = #tpu.dot_dimension_numbers<[1], [0], [0], [1], [0, 0, 1, 1], [], []>} : vector<81x22xf32>, vector<22x25xf32>, vector<81x25xf32> -> vector<81x25xf32>
    %55 = arith.addf %50, %54 : vector<81x25xf32>
    %56 = tpu.iota {dimensions = array<i32: 0>} : vector<27x81xi32>
    %c3_i32 = arith.constant 3 : i32
    %57 = vector.broadcast %c3_i32 : i32 to vector<27x81xi32>
    %58 = arith.muli %57, %56 : vector<27x81xi32>
    %59 = tpu.iota {dimensions = array<i32: 1>} : vector<27x81xi32>
    %c0_i32 = arith.constant 0 : i32
    %60 = vector.broadcast %c0_i32 : i32 to vector<27x81xi32>
    %61 = arith.addi %58, %60 : vector<27x81xi32>
    %62 = arith.cmpi eq, %59, %61 : vector<27x81xi32>
    %63 = arith.extui %62 : vector<27x81xi1> to vector<27x81xi32>
    %64 = arith.sitofp %63 : vector<27x81xi32> to vector<27x81xf32>
    %cst_58 = arith.constant dense<0.000000e+00> : vector<27x25xf32>
    %65 = tpu.matmul %64, %55, %cst_58 {dimension_numbers = #tpu.dot_dimension_numbers<[1], [0], [0], [1], [0, 0, 1, 1], [], []>} : vector<27x81xf32>, vector<81x25xf32>, vector<27x25xf32> -> vector<27x25xf32>
    %c1_i32 = arith.constant 1 : i32
    %66 = vector.broadcast %c1_i32 : i32 to vector<27x81xi32>
    %67 = arith.addi %58, %66 : vector<27x81xi32>
    %68 = arith.cmpi eq, %59, %67 : vector<27x81xi32>
    %69 = arith.extui %68 : vector<27x81xi1> to vector<27x81xi32>
    %70 = arith.sitofp %69 : vector<27x81xi32> to vector<27x81xf32>
    %cst_59 = arith.constant dense<0.000000e+00> : vector<27x25xf32>
    %71 = tpu.matmul %70, %55, %cst_59 {dimension_numbers = #tpu.dot_dimension_numbers<[1], [0], [0], [1], [0, 0, 1, 1], [], []>} : vector<27x81xf32>, vector<81x25xf32>, vector<27x25xf32> -> vector<27x25xf32>
    %72 = arith.maximumf %65, %71 : vector<27x25xf32>
    %c2_i32 = arith.constant 2 : i32
    %73 = vector.broadcast %c2_i32 : i32 to vector<27x81xi32>
    %74 = arith.addi %58, %73 : vector<27x81xi32>
    %75 = arith.cmpi eq, %59, %74 : vector<27x81xi32>
    %76 = arith.extui %75 : vector<27x81xi1> to vector<27x81xi32>
    %77 = arith.sitofp %76 : vector<27x81xi32> to vector<27x81xf32>
    %cst_60 = arith.constant dense<0.000000e+00> : vector<27x25xf32>
    %78 = tpu.matmul %77, %55, %cst_60 {dimension_numbers = #tpu.dot_dimension_numbers<[1], [0], [0], [1], [0, 0, 1, 1], [], []>} : vector<27x81xf32>, vector<81x25xf32>, vector<27x25xf32> -> vector<27x25xf32>
    %79 = arith.maximumf %72, %78 : vector<27x25xf32>
    %c0_61 = arith.constant 0 : index
    %c0_62 = arith.constant 0 : index
    %80 = vector.load %arg3[%c0_61, %c0_62] : memref<3x25xf32, #tpu.memory_space<vmem>>, vector<1x25xf32>
    %81 = vector.broadcast %80 : vector<1x25xf32> to vector<27x25xf32>
    %82 = arith.addf %79, %81 : vector<27x25xf32>
    %cst_63 = arith.constant 0.000000e+00 : f32
    %83 = vector.broadcast %cst_63 : f32 to vector<27x25xf32>
    %84 = arith.cmpf ogt, %82, %83 : vector<27x25xf32>
    %cst_64 = arith.constant 0.000000e+00 : f32
    %85 = vector.broadcast %cst_64 : f32 to vector<27x25xf32>
    %86 = arith.minimumf %82, %85 : vector<27x25xf32>
    %87 = math.exp %86 : vector<27x25xf32>
    %cst_65 = arith.constant 1.000000e+00 : f32
    %88 = vector.broadcast %cst_65 : f32 to vector<27x25xf32>
    %89 = arith.subf %87, %88 : vector<27x25xf32>
    %90 = arith.select %84, %82, %89 : vector<27x25xi1>, vector<27x25xf32>
    %c1_66 = arith.constant 1 : index
    %c0_67 = arith.constant 0 : index
    %91 = vector.load %arg3[%c1_66, %c0_67] : memref<3x25xf32, #tpu.memory_space<vmem>>, vector<1x25xf32>
    %92 = vector.broadcast %91 : vector<1x25xf32> to vector<27x25xf32>
    %93 = arith.mulf %90, %92 : vector<27x25xf32>
    %c2_68 = arith.constant 2 : index
    %c0_69 = arith.constant 0 : index
    %94 = vector.load %arg3[%c2_68, %c0_69] : memref<3x25xf32, #tpu.memory_space<vmem>>, vector<1x25xf32>
    %95 = vector.broadcast %94 : vector<1x25xf32> to vector<27x25xf32>
    %96 = arith.addf %93, %95 : vector<27x25xf32>
    %cst_70 = arith.constant 0.000000e+00 : f32
    %97 = vector.broadcast %cst_70 : f32 to vector<36x25xf32>
    %c0_71 = arith.constant 0 : index
    %c0_72 = arith.constant 0 : index
    %98 = vector.load %arg18[%c0_71, %c0_72] : memref<36x25xf32, #tpu.memory_space<vmem>>, vector<36x25xf32>
    tpu.vector_store %arg18[%c0_71, %c0_72], %97 {strides = array<i32>} : memref<36x25xf32, #tpu.memory_space<vmem>>, vector<36x25xf32>,
    %c4_73 = arith.constant 4 : index
    %c0_74 = arith.constant 0 : index
    %99 = vector.load %arg18[%c4_73, %c0_74] : memref<36x25xf32, #tpu.memory_space<vmem>>, vector<27x25xf32>
    tpu.vector_store %arg18[%c4_73, %c0_74], %96 {strides = array<i32>} : memref<36x25xf32, #tpu.memory_space<vmem>>, vector<27x25xf32>,
    %cst_75 = arith.constant 0.000000e+00 : f32
    %100 = vector.broadcast %cst_75 : f32 to vector<27x50xf32>
    %c0_76 = arith.constant 0 : index
    %c0_77 = arith.constant 0 : index
    %101 = vector.load %arg18[%c0_76, %c0_77] : memref<36x25xf32, #tpu.memory_space<vmem>>, vector<27x25xf32>
    %c0_78 = arith.constant 0 : index
    %c0_79 = arith.constant 0 : index
    %c0_80 = arith.constant 0 : index
    %102 = vector.load %arg4[%c0_78, %c0_79, %c0_80] : memref<10x25x50xf32, #tpu.memory_space<vmem>>, vector<1x25x50xf32>
    %103 = vector.shape_cast %102 : vector<1x25x50xf32> to vector<25x50xf32>
    %cst_81 = arith.constant dense<0.000000e+00> : vector<27x50xf32>
    %104 = tpu.matmul %101, %103, %cst_81 {dimension_numbers = #tpu.dot_dimension_numbers<[1], [0], [0], [1], [0, 0, 1, 1], [], []>} : vector<27x25xf32>, vector<25x50xf32>, vector<27x50xf32> -> vector<27x50xf32>
    %105 = arith.addf %100, %104 : vector<27x50xf32>
    %c1_82 = arith.constant 1 : index
    %c0_83 = arith.constant 0 : index
    %106 = vector.load %arg18[%c1_82, %c0_83] : memref<36x25xf32, #tpu.memory_space<vmem>>, vector<27x25xf32>
    %c1_84 = arith.constant 1 : index
    %c0_85 = arith.constant 0 : index
    %c0_86 = arith.constant 0 : index
    %107 = vector.load %arg4[%c1_84, %c0_85, %c0_86] : memref<10x25x50xf32, #tpu.memory_space<vmem>>, vector<1x25x50xf32>
    %108 = vector.shape_cast %107 : vector<1x25x50xf32> to vector<25x50xf32>
    %cst_87 = arith.constant dense<0.000000e+00> : vector<27x50xf32>
    %109 = tpu.matmul %106, %108, %cst_87 {dimension_numbers = #tpu.dot_dimension_numbers<[1], [0], [0], [1], [0, 0, 1, 1], [], []>} : vector<27x25xf32>, vector<25x50xf32>, vector<27x50xf32> -> vector<27x50xf32>
    %110 = arith.addf %105, %109 : vector<27x50xf32>
    %c2_88 = arith.constant 2 : index
    %c0_89 = arith.constant 0 : index
    %111 = vector.load %arg18[%c2_88, %c0_89] : memref<36x25xf32, #tpu.memory_space<vmem>>, vector<27x25xf32>
    %c2_90 = arith.constant 2 : index
    %c0_91 = arith.constant 0 : index
    %c0_92 = arith.constant 0 : index
    %112 = vector.load %arg4[%c2_90, %c0_91, %c0_92] : memref<10x25x50xf32, #tpu.memory_space<vmem>>, vector<1x25x50xf32>
    %113 = vector.shape_cast %112 : vector<1x25x50xf32> to vector<25x50xf32>
    %cst_93 = arith.constant dense<0.000000e+00> : vector<27x50xf32>
    %114 = tpu.matmul %111, %113, %cst_93 {dimension_numbers = #tpu.dot_dimension_numbers<[1], [0], [0], [1], [0, 0, 1, 1], [], []>} : vector<27x25xf32>, vector<25x50xf32>, vector<27x50xf32> -> vector<27x50xf32>
    %115 = arith.addf %110, %114 : vector<27x50xf32>
    %c3_94 = arith.constant 3 : index
    %c0_95 = arith.constant 0 : index
    %116 = vector.load %arg18[%c3_94, %c0_95] : memref<36x25xf32, #tpu.memory_space<vmem>>, vector<27x25xf32>
    %c3_96 = arith.constant 3 : index
    %c0_97 = arith.constant 0 : index
    %c0_98 = arith.constant 0 : index
    %117 = vector.load %arg4[%c3_96, %c0_97, %c0_98] : memref<10x25x50xf32, #tpu.memory_space<vmem>>, vector<1x25x50xf32>
    %118 = vector.shape_cast %117 : vector<1x25x50xf32> to vector<25x50xf32>
    %cst_99 = arith.constant dense<0.000000e+00> : vector<27x50xf32>
    %119 = tpu.matmul %116, %118, %cst_99 {dimension_numbers = #tpu.dot_dimension_numbers<[1], [0], [0], [1], [0, 0, 1, 1], [], []>} : vector<27x25xf32>, vector<25x50xf32>, vector<27x50xf32> -> vector<27x50xf32>
    %120 = arith.addf %115, %119 : vector<27x50xf32>
    %c4_100 = arith.constant 4 : index
    %c0_101 = arith.constant 0 : index
    %121 = vector.load %arg18[%c4_100, %c0_101] : memref<36x25xf32, #tpu.memory_space<vmem>>, vector<27x25xf32>
    %c4_102 = arith.constant 4 : index
    %c0_103 = arith.constant 0 : index
    %c0_104 = arith.constant 0 : index
    %122 = vector.load %arg4[%c4_102, %c0_103, %c0_104] : memref<10x25x50xf32, #tpu.memory_space<vmem>>, vector<1x25x50xf32>
    %123 = vector.shape_cast %122 : vector<1x25x50xf32> to vector<25x50xf32>
    %cst_105 = arith.constant dense<0.000000e+00> : vector<27x50xf32>
    %124 = tpu.matmul %121, %123, %cst_105 {dimension_numbers = #tpu.dot_dimension_numbers<[1], [0], [0], [1], [0, 0, 1, 1], [], []>} : vector<27x25xf32>, vector<25x50xf32>, vector<27x50xf32> -> vector<27x50xf32>
    %125 = arith.addf %120, %124 : vector<27x50xf32>
    %c5_106 = arith.constant 5 : index
    %c0_107 = arith.constant 0 : index
    %126 = vector.load %arg18[%c5_106, %c0_107] : memref<36x25xf32, #tpu.memory_space<vmem>>, vector<27x25xf32>
    %c5_108 = arith.constant 5 : index
    %c0_109 = arith.constant 0 : index
    %c0_110 = arith.constant 0 : index
    %127 = vector.load %arg4[%c5_108, %c0_109, %c0_110] : memref<10x25x50xf32, #tpu.memory_space<vmem>>, vector<1x25x50xf32>
    %128 = vector.shape_cast %127 : vector<1x25x50xf32> to vector<25x50xf32>
    %cst_111 = arith.constant dense<0.000000e+00> : vector<27x50xf32>
    %129 = tpu.matmul %126, %128, %cst_111 {dimension_numbers = #tpu.dot_dimension_numbers<[1], [0], [0], [1], [0, 0, 1, 1], [], []>} : vector<27x25xf32>, vector<25x50xf32>, vector<27x50xf32> -> vector<27x50xf32>
    %130 = arith.addf %125, %129 : vector<27x50xf32>
    %c6_112 = arith.constant 6 : index
    %c0_113 = arith.constant 0 : index
    %131 = vector.load %arg18[%c6_112, %c0_113] : memref<36x25xf32, #tpu.memory_space<vmem>>, vector<27x25xf32>
    %c6_114 = arith.constant 6 : index
    %c0_115 = arith.constant 0 : index
    %c0_116 = arith.constant 0 : index
    %132 = vector.load %arg4[%c6_114, %c0_115, %c0_116] : memref<10x25x50xf32, #tpu.memory_space<vmem>>, vector<1x25x50xf32>
    %133 = vector.shape_cast %132 : vector<1x25x50xf32> to vector<25x50xf32>
    %cst_117 = arith.constant dense<0.000000e+00> : vector<27x50xf32>
    %134 = tpu.matmul %131, %133, %cst_117 {dimension_numbers = #tpu.dot_dimension_numbers<[1], [0], [0], [1], [0, 0, 1, 1], [], []>} : vector<27x25xf32>, vector<25x50xf32>, vector<27x50xf32> -> vector<27x50xf32>
    %135 = arith.addf %130, %134 : vector<27x50xf32>
    %c7_118 = arith.constant 7 : index
    %c0_119 = arith.constant 0 : index
    %136 = vector.load %arg18[%c7_118, %c0_119] : memref<36x25xf32, #tpu.memory_space<vmem>>, vector<27x25xf32>
    %c7_120 = arith.constant 7 : index
    %c0_121 = arith.constant 0 : index
    %c0_122 = arith.constant 0 : index
    %137 = vector.load %arg4[%c7_120, %c0_121, %c0_122] : memref<10x25x50xf32, #tpu.memory_space<vmem>>, vector<1x25x50xf32>
    %138 = vector.shape_cast %137 : vector<1x25x50xf32> to vector<25x50xf32>
    %cst_123 = arith.constant dense<0.000000e+00> : vector<27x50xf32>
    %139 = tpu.matmul %136, %138, %cst_123 {dimension_numbers = #tpu.dot_dimension_numbers<[1], [0], [0], [1], [0, 0, 1, 1], [], []>} : vector<27x25xf32>, vector<25x50xf32>, vector<27x50xf32> -> vector<27x50xf32>
    %140 = arith.addf %135, %139 : vector<27x50xf32>
    %c8_124 = arith.constant 8 : index
    %c0_125 = arith.constant 0 : index
    %141 = vector.load %arg18[%c8_124, %c0_125] : memref<36x25xf32, #tpu.memory_space<vmem>>, vector<27x25xf32>
    %c8_126 = arith.constant 8 : index
    %c0_127 = arith.constant 0 : index
    %c0_128 = arith.constant 0 : index
    %142 = vector.load %arg4[%c8_126, %c0_127, %c0_128] : memref<10x25x50xf32, #tpu.memory_space<vmem>>, vector<1x25x50xf32>
    %143 = vector.shape_cast %142 : vector<1x25x50xf32> to vector<25x50xf32>
    %cst_129 = arith.constant dense<0.000000e+00> : vector<27x50xf32>
    %144 = tpu.matmul %141, %143, %cst_129 {dimension_numbers = #tpu.dot_dimension_numbers<[1], [0], [0], [1], [0, 0, 1, 1], [], []>} : vector<27x25xf32>, vector<25x50xf32>, vector<27x50xf32> -> vector<27x50xf32>
    %145 = arith.addf %140, %144 : vector<27x50xf32>
    %c9_130 = arith.constant 9 : index
    %c0_131 = arith.constant 0 : index
    %146 = vector.load %arg18[%c9_130, %c0_131] : memref<36x25xf32, #tpu.memory_space<vmem>>, vector<27x25xf32>
    %c9_132 = arith.constant 9 : index
    %c0_133 = arith.constant 0 : index
    %c0_134 = arith.constant 0 : index
    %147 = vector.load %arg4[%c9_132, %c0_133, %c0_134] : memref<10x25x50xf32, #tpu.memory_space<vmem>>, vector<1x25x50xf32>
    %148 = vector.shape_cast %147 : vector<1x25x50xf32> to vector<25x50xf32>
    %cst_135 = arith.constant dense<0.000000e+00> : vector<27x50xf32>
    %149 = tpu.matmul %146, %148, %cst_135 {dimension_numbers = #tpu.dot_dimension_numbers<[1], [0], [0], [1], [0, 0, 1, 1], [], []>} : vector<27x25xf32>, vector<25x50xf32>, vector<27x50xf32> -> vector<27x50xf32>
    %150 = arith.addf %145, %149 : vector<27x50xf32>
    %151 = tpu.iota {dimensions = array<i32: 0>} : vector<9x27xi32>
    %c3_i32_136 = arith.constant 3 : i32
    %152 = vector.broadcast %c3_i32_136 : i32 to vector<9x27xi32>
    %153 = arith.muli %152, %151 : vector<9x27xi32>
    %154 = tpu.iota {dimensions = array<i32: 1>} : vector<9x27xi32>
    %c0_i32_137 = arith.constant 0 : i32
    %155 = vector.broadcast %c0_i32_137 : i32 to vector<9x27xi32>
    %156 = arith.addi %153, %155 : vector<9x27xi32>
    %157 = arith.cmpi eq, %154, %156 : vector<9x27xi32>
    %158 = arith.extui %157 : vector<9x27xi1> to vector<9x27xi32>
    %159 = arith.sitofp %158 : vector<9x27xi32> to vector<9x27xf32>
    %cst_138 = arith.constant dense<0.000000e+00> : vector<9x50xf32>
    %160 = tpu.matmul %159, %150, %cst_138 {dimension_numbers = #tpu.dot_dimension_numbers<[1], [0], [0], [1], [0, 0, 1, 1], [], []>} : vector<9x27xf32>, vector<27x50xf32>, vector<9x50xf32> -> vector<9x50xf32>
    %c1_i32_139 = arith.constant 1 : i32
    %161 = vector.broadcast %c1_i32_139 : i32 to vector<9x27xi32>
    %162 = arith.addi %153, %161 : vector<9x27xi32>
    %163 = arith.cmpi eq, %154, %162 : vector<9x27xi32>
    %164 = arith.extui %163 : vector<9x27xi1> to vector<9x27xi32>
    %165 = arith.sitofp %164 : vector<9x27xi32> to vector<9x27xf32>
    %cst_140 = arith.constant dense<0.000000e+00> : vector<9x50xf32>
    %166 = tpu.matmul %165, %150, %cst_140 {dimension_numbers = #tpu.dot_dimension_numbers<[1], [0], [0], [1], [0, 0, 1, 1], [], []>} : vector<9x27xf32>, vector<27x50xf32>, vector<9x50xf32> -> vector<9x50xf32>
    %167 = arith.maximumf %160, %166 : vector<9x50xf32>
    %c2_i32_141 = arith.constant 2 : i32
    %168 = vector.broadcast %c2_i32_141 : i32 to vector<9x27xi32>
    %169 = arith.addi %153, %168 : vector<9x27xi32>
    %170 = arith.cmpi eq, %154, %169 : vector<9x27xi32>
    %171 = arith.extui %170 : vector<9x27xi1> to vector<9x27xi32>
    %172 = arith.sitofp %171 : vector<9x27xi32> to vector<9x27xf32>
    %cst_142 = arith.constant dense<0.000000e+00> : vector<9x50xf32>
    %173 = tpu.matmul %172, %150, %cst_142 {dimension_numbers = #tpu.dot_dimension_numbers<[1], [0], [0], [1], [0, 0, 1, 1], [], []>} : vector<9x27xf32>, vector<27x50xf32>, vector<9x50xf32> -> vector<9x50xf32>
    %174 = arith.maximumf %167, %173 : vector<9x50xf32>
    %c0_143 = arith.constant 0 : index
    %c0_144 = arith.constant 0 : index
    %175 = vector.load %arg5[%c0_143, %c0_144] : memref<3x50xf32, #tpu.memory_space<vmem>>, vector<1x50xf32>
    %176 = vector.broadcast %175 : vector<1x50xf32> to vector<9x50xf32>
    %177 = arith.addf %174, %176 : vector<9x50xf32>
    %cst_145 = arith.constant 0.000000e+00 : f32
    %178 = vector.broadcast %cst_145 : f32 to vector<9x50xf32>
    %179 = arith.cmpf ogt, %177, %178 : vector<9x50xf32>
    %cst_146 = arith.constant 0.000000e+00 : f32
    %180 = vector.broadcast %cst_146 : f32 to vector<9x50xf32>
    %181 = arith.minimumf %177, %180 : vector<9x50xf32>
    %182 = math.exp %181 : vector<9x50xf32>
    %cst_147 = arith.constant 1.000000e+00 : f32
    %183 = vector.broadcast %cst_147 : f32 to vector<9x50xf32>
    %184 = arith.subf %182, %183 : vector<9x50xf32>
    %185 = arith.select %179, %177, %184 : vector<9x50xi1>, vector<9x50xf32>
    %c1_148 = arith.constant 1 : index
    %c0_149 = arith.constant 0 : index
    %186 = vector.load %arg5[%c1_148, %c0_149] : memref<3x50xf32, #tpu.memory_space<vmem>>, vector<1x50xf32>
    %187 = vector.broadcast %186 : vector<1x50xf32> to vector<9x50xf32>
    %188 = arith.mulf %185, %187 : vector<9x50xf32>
    %c2_150 = arith.constant 2 : index
    %c0_151 = arith.constant 0 : index
    %189 = vector.load %arg5[%c2_150, %c0_151] : memref<3x50xf32, #tpu.memory_space<vmem>>, vector<1x50xf32>
    %190 = vector.broadcast %189 : vector<1x50xf32> to vector<9x50xf32>
    %191 = arith.addf %188, %190 : vector<9x50xf32>
    %cst_152 = arith.constant 0.000000e+00 : f32
    %192 = vector.broadcast %cst_152 : f32 to vector<18x50xf32>
    %c0_153 = arith.constant 0 : index
    %c0_154 = arith.constant 0 : index
    %193 = vector.load %arg19[%c0_153, %c0_154] : memref<18x50xf32, #tpu.memory_space<vmem>>, vector<18x50xf32>
    tpu.vector_store %arg19[%c0_153, %c0_154], %192 {strides = array<i32>} : memref<18x50xf32, #tpu.memory_space<vmem>>, vector<18x50xf32>,
    %c4_155 = arith.constant 4 : index
    %c0_156 = arith.constant 0 : index
    %194 = vector.load %arg19[%c4_155, %c0_156] : memref<18x50xf32, #tpu.memory_space<vmem>>, vector<9x50xf32>
    tpu.vector_store %arg19[%c4_155, %c0_156], %191 {strides = array<i32>} : memref<18x50xf32, #tpu.memory_space<vmem>>, vector<9x50xf32>,
    %cst_157 = arith.constant 0.000000e+00 : f32
    %195 = vector.broadcast %cst_157 : f32 to vector<9x100xf32>
    %c0_158 = arith.constant 0 : index
    %c0_159 = arith.constant 0 : index
    %196 = vector.load %arg19[%c0_158, %c0_159] : memref<18x50xf32, #tpu.memory_space<vmem>>, vector<9x50xf32>
    %c0_160 = arith.constant 0 : index
    %c0_161 = arith.constant 0 : index
    %c0_162 = arith.constant 0 : index
    %197 = vector.load %arg6[%c0_160, %c0_161, %c0_162] : memref<10x50x100xf32, #tpu.memory_space<vmem>>, vector<1x50x100xf32>
    %198 = vector.shape_cast %197 : vector<1x50x100xf32> to vector<50x100xf32>
    %cst_163 = arith.constant dense<0.000000e+00> : vector<9x100xf32>
    %199 = tpu.matmul %196, %198, %cst_163 {dimension_numbers = #tpu.dot_dimension_numbers<[1], [0], [0], [1], [0, 0, 1, 1], [], []>} : vector<9x50xf32>, vector<50x100xf32>, vector<9x100xf32> -> vector<9x100xf32>
    %200 = arith.addf %195, %199 : vector<9x100xf32>
    %c1_164 = arith.constant 1 : index
    %c0_165 = arith.constant 0 : index
    %201 = vector.load %arg19[%c1_164, %c0_165] : memref<18x50xf32, #tpu.memory_space<vmem>>, vector<9x50xf32>
    %c1_166 = arith.constant 1 : index
    %c0_167 = arith.constant 0 : index
    %c0_168 = arith.constant 0 : index
    %202 = vector.load %arg6[%c1_166, %c0_167, %c0_168] : memref<10x50x100xf32, #tpu.memory_space<vmem>>, vector<1x50x100xf32>
    %203 = vector.shape_cast %202 : vector<1x50x100xf32> to vector<50x100xf32>
    %cst_169 = arith.constant dense<0.000000e+00> : vector<9x100xf32>
    %204 = tpu.matmul %201, %203, %cst_169 {dimension_numbers = #tpu.dot_dimension_numbers<[1], [0], [0], [1], [0, 0, 1, 1], [], []>} : vector<9x50xf32>, vector<50x100xf32>, vector<9x100xf32> -> vector<9x100xf32>
    %205 = arith.addf %200, %204 : vector<9x100xf32>
    %c2_170 = arith.constant 2 : index
    %c0_171 = arith.constant 0 : index
    %206 = vector.load %arg19[%c2_170, %c0_171] : memref<18x50xf32, #tpu.memory_space<vmem>>, vector<9x50xf32>
    %c2_172 = arith.constant 2 : index
    %c0_173 = arith.constant 0 : index
    %c0_174 = arith.constant 0 : index
    %207 = vector.load %arg6[%c2_172, %c0_173, %c0_174] : memref<10x50x100xf32, #tpu.memory_space<vmem>>, vector<1x50x100xf32>
    %208 = vector.shape_cast %207 : vector<1x50x100xf32> to vector<50x100xf32>
    %cst_175 = arith.constant dense<0.000000e+00> : vector<9x100xf32>
    %209 = tpu.matmul %206, %208, %cst_175 {dimension_numbers = #tpu.dot_dimension_numbers<[1], [0], [0], [1], [0, 0, 1, 1], [], []>} : vector<9x50xf32>, vector<50x100xf32>, vector<9x100xf32> -> vector<9x100xf32>
    %210 = arith.addf %205, %209 : vector<9x100xf32>
    %c3_176 = arith.constant 3 : index
    %c0_177 = arith.constant 0 : index
    %211 = vector.load %arg19[%c3_176, %c0_177] : memref<18x50xf32, #tpu.memory_space<vmem>>, vector<9x50xf32>
    %c3_178 = arith.constant 3 : index
    %c0_179 = arith.constant 0 : index
    %c0_180 = arith.constant 0 : index
    %212 = vector.load %arg6[%c3_178, %c0_179, %c0_180] : memref<10x50x100xf32, #tpu.memory_space<vmem>>, vector<1x50x100xf32>
    %213 = vector.shape_cast %212 : vector<1x50x100xf32> to vector<50x100xf32>
    %cst_181 = arith.constant dense<0.000000e+00> : vector<9x100xf32>
    %214 = tpu.matmul %211, %213, %cst_181 {dimension_numbers = #tpu.dot_dimension_numbers<[1], [0], [0], [1], [0, 0, 1, 1], [], []>} : vector<9x50xf32>, vector<50x100xf32>, vector<9x100xf32> -> vector<9x100xf32>
    %215 = arith.addf %210, %214 : vector<9x100xf32>
    %c4_182 = arith.constant 4 : index
    %c0_183 = arith.constant 0 : index
    %216 = vector.load %arg19[%c4_182, %c0_183] : memref<18x50xf32, #tpu.memory_space<vmem>>, vector<9x50xf32>
    %c4_184 = arith.constant 4 : index
    %c0_185 = arith.constant 0 : index
    %c0_186 = arith.constant 0 : index
    %217 = vector.load %arg6[%c4_184, %c0_185, %c0_186] : memref<10x50x100xf32, #tpu.memory_space<vmem>>, vector<1x50x100xf32>
    %218 = vector.shape_cast %217 : vector<1x50x100xf32> to vector<50x100xf32>
    %cst_187 = arith.constant dense<0.000000e+00> : vector<9x100xf32>
    %219 = tpu.matmul %216, %218, %cst_187 {dimension_numbers = #tpu.dot_dimension_numbers<[1], [0], [0], [1], [0, 0, 1, 1], [], []>} : vector<9x50xf32>, vector<50x100xf32>, vector<9x100xf32> -> vector<9x100xf32>
    %220 = arith.addf %215, %219 : vector<9x100xf32>
    %c5_188 = arith.constant 5 : index
    %c0_189 = arith.constant 0 : index
    %221 = vector.load %arg19[%c5_188, %c0_189] : memref<18x50xf32, #tpu.memory_space<vmem>>, vector<9x50xf32>
    %c5_190 = arith.constant 5 : index
    %c0_191 = arith.constant 0 : index
    %c0_192 = arith.constant 0 : index
    %222 = vector.load %arg6[%c5_190, %c0_191, %c0_192] : memref<10x50x100xf32, #tpu.memory_space<vmem>>, vector<1x50x100xf32>
    %223 = vector.shape_cast %222 : vector<1x50x100xf32> to vector<50x100xf32>
    %cst_193 = arith.constant dense<0.000000e+00> : vector<9x100xf32>
    %224 = tpu.matmul %221, %223, %cst_193 {dimension_numbers = #tpu.dot_dimension_numbers<[1], [0], [0], [1], [0, 0, 1, 1], [], []>} : vector<9x50xf32>, vector<50x100xf32>, vector<9x100xf32> -> vector<9x100xf32>
    %225 = arith.addf %220, %224 : vector<9x100xf32>
    %c6_194 = arith.constant 6 : index
    %c0_195 = arith.constant 0 : index
    %226 = vector.load %arg19[%c6_194, %c0_195] : memref<18x50xf32, #tpu.memory_space<vmem>>, vector<9x50xf32>
    %c6_196 = arith.constant 6 : index
    %c0_197 = arith.constant 0 : index
    %c0_198 = arith.constant 0 : index
    %227 = vector.load %arg6[%c6_196, %c0_197, %c0_198] : memref<10x50x100xf32, #tpu.memory_space<vmem>>, vector<1x50x100xf32>
    %228 = vector.shape_cast %227 : vector<1x50x100xf32> to vector<50x100xf32>
    %cst_199 = arith.constant dense<0.000000e+00> : vector<9x100xf32>
    %229 = tpu.matmul %226, %228, %cst_199 {dimension_numbers = #tpu.dot_dimension_numbers<[1], [0], [0], [1], [0, 0, 1, 1], [], []>} : vector<9x50xf32>, vector<50x100xf32>, vector<9x100xf32> -> vector<9x100xf32>
    %230 = arith.addf %225, %229 : vector<9x100xf32>
    %c7_200 = arith.constant 7 : index
    %c0_201 = arith.constant 0 : index
    %231 = vector.load %arg19[%c7_200, %c0_201] : memref<18x50xf32, #tpu.memory_space<vmem>>, vector<9x50xf32>
    %c7_202 = arith.constant 7 : index
    %c0_203 = arith.constant 0 : index
    %c0_204 = arith.constant 0 : index
    %232 = vector.load %arg6[%c7_202, %c0_203, %c0_204] : memref<10x50x100xf32, #tpu.memory_space<vmem>>, vector<1x50x100xf32>
    %233 = vector.shape_cast %232 : vector<1x50x100xf32> to vector<50x100xf32>
    %cst_205 = arith.constant dense<0.000000e+00> : vector<9x100xf32>
    %234 = tpu.matmul %231, %233, %cst_205 {dimension_numbers = #tpu.dot_dimension_numbers<[1], [0], [0], [1], [0, 0, 1, 1], [], []>} : vector<9x50xf32>, vector<50x100xf32>, vector<9x100xf32> -> vector<9x100xf32>
    %235 = arith.addf %230, %234 : vector<9x100xf32>
    %c8_206 = arith.constant 8 : index
    %c0_207 = arith.constant 0 : index
    %236 = vector.load %arg19[%c8_206, %c0_207] : memref<18x50xf32, #tpu.memory_space<vmem>>, vector<9x50xf32>
    %c8_208 = arith.constant 8 : index
    %c0_209 = arith.constant 0 : index
    %c0_210 = arith.constant 0 : index
    %237 = vector.load %arg6[%c8_208, %c0_209, %c0_210] : memref<10x50x100xf32, #tpu.memory_space<vmem>>, vector<1x50x100xf32>
    %238 = vector.shape_cast %237 : vector<1x50x100xf32> to vector<50x100xf32>
    %cst_211 = arith.constant dense<0.000000e+00> : vector<9x100xf32>
    %239 = tpu.matmul %236, %238, %cst_211 {dimension_numbers = #tpu.dot_dimension_numbers<[1], [0], [0], [1], [0, 0, 1, 1], [], []>} : vector<9x50xf32>, vector<50x100xf32>, vector<9x100xf32> -> vector<9x100xf32>
    %240 = arith.addf %235, %239 : vector<9x100xf32>
    %c9_212 = arith.constant 9 : index
    %c0_213 = arith.constant 0 : index
    %241 = vector.load %arg19[%c9_212, %c0_213] : memref<18x50xf32, #tpu.memory_space<vmem>>, vector<9x50xf32>
    %c9_214 = arith.constant 9 : index
    %c0_215 = arith.constant 0 : index
    %c0_216 = arith.constant 0 : index
    %242 = vector.load %arg6[%c9_214, %c0_215, %c0_216] : memref<10x50x100xf32, #tpu.memory_space<vmem>>, vector<1x50x100xf32>
    %243 = vector.shape_cast %242 : vector<1x50x100xf32> to vector<50x100xf32>
    %cst_217 = arith.constant dense<0.000000e+00> : vector<9x100xf32>
    %244 = tpu.matmul %241, %243, %cst_217 {dimension_numbers = #tpu.dot_dimension_numbers<[1], [0], [0], [1], [0, 0, 1, 1], [], []>} : vector<9x50xf32>, vector<50x100xf32>, vector<9x100xf32> -> vector<9x100xf32>
    %245 = arith.addf %240, %244 : vector<9x100xf32>
    %246 = tpu.iota {dimensions = array<i32: 0>} : vector<3x9xi32>
    %c3_i32_218 = arith.constant 3 : i32
    %247 = vector.broadcast %c3_i32_218 : i32 to vector<3x9xi32>
    %248 = arith.muli %247, %246 : vector<3x9xi32>
    %249 = tpu.iota {dimensions = array<i32: 1>} : vector<3x9xi32>
    %c0_i32_219 = arith.constant 0 : i32
    %250 = vector.broadcast %c0_i32_219 : i32 to vector<3x9xi32>
    %251 = arith.addi %248, %250 : vector<3x9xi32>
    %252 = arith.cmpi eq, %249, %251 : vector<3x9xi32>
    %253 = arith.extui %252 : vector<3x9xi1> to vector<3x9xi32>
    %254 = arith.sitofp %253 : vector<3x9xi32> to vector<3x9xf32>
    %cst_220 = arith.constant dense<0.000000e+00> : vector<3x100xf32>
    %255 = tpu.matmul %254, %245, %cst_220 {dimension_numbers = #tpu.dot_dimension_numbers<[1], [0], [0], [1], [0, 0, 1, 1], [], []>} : vector<3x9xf32>, vector<9x100xf32>, vector<3x100xf32> -> vector<3x100xf32>
    %c1_i32_221 = arith.constant 1 : i32
    %256 = vector.broadcast %c1_i32_221 : i32 to vector<3x9xi32>
    %257 = arith.addi %248, %256 : vector<3x9xi32>
    %258 = arith.cmpi eq, %249, %257 : vector<3x9xi32>
    %259 = arith.extui %258 : vector<3x9xi1> to vector<3x9xi32>
    %260 = arith.sitofp %259 : vector<3x9xi32> to vector<3x9xf32>
    %cst_222 = arith.constant dense<0.000000e+00> : vector<3x100xf32>
    %261 = tpu.matmul %260, %245, %cst_222 {dimension_numbers = #tpu.dot_dimension_numbers<[1], [0], [0], [1], [0, 0, 1, 1], [], []>} : vector<3x9xf32>, vector<9x100xf32>, vector<3x100xf32> -> vector<3x100xf32>
    %262 = arith.maximumf %255, %261 : vector<3x100xf32>
    %c2_i32_223 = arith.constant 2 : i32
    %263 = vector.broadcast %c2_i32_223 : i32 to vector<3x9xi32>
    %264 = arith.addi %248, %263 : vector<3x9xi32>
    %265 = arith.cmpi eq, %249, %264 : vector<3x9xi32>
    %266 = arith.extui %265 : vector<3x9xi1> to vector<3x9xi32>
    %267 = arith.sitofp %266 : vector<3x9xi32> to vector<3x9xf32>
    %cst_224 = arith.constant dense<0.000000e+00> : vector<3x100xf32>
    %268 = tpu.matmul %267, %245, %cst_224 {dimension_numbers = #tpu.dot_dimension_numbers<[1], [0], [0], [1], [0, 0, 1, 1], [], []>} : vector<3x9xf32>, vector<9x100xf32>, vector<3x100xf32> -> vector<3x100xf32>
    %269 = arith.maximumf %262, %268 : vector<3x100xf32>
    %c0_225 = arith.constant 0 : index
    %c0_226 = arith.constant 0 : index
    %270 = vector.load %arg7[%c0_225, %c0_226] : memref<3x100xf32, #tpu.memory_space<vmem>>, vector<1x100xf32>
    %271 = vector.broadcast %270 : vector<1x100xf32> to vector<3x100xf32>
    %272 = arith.addf %269, %271 : vector<3x100xf32>
    %cst_227 = arith.constant 0.000000e+00 : f32
    %273 = vector.broadcast %cst_227 : f32 to vector<3x100xf32>
    %274 = arith.cmpf ogt, %272, %273 : vector<3x100xf32>
    %cst_228 = arith.constant 0.000000e+00 : f32
    %275 = vector.broadcast %cst_228 : f32 to vector<3x100xf32>
    %276 = arith.minimumf %272, %275 : vector<3x100xf32>
    %277 = math.exp %276 : vector<3x100xf32>
    %cst_229 = arith.constant 1.000000e+00 : f32
    %278 = vector.broadcast %cst_229 : f32 to vector<3x100xf32>
    %279 = arith.subf %277, %278 : vector<3x100xf32>
    %280 = arith.select %274, %272, %279 : vector<3x100xi1>, vector<3x100xf32>
    %c1_230 = arith.constant 1 : index
    %c0_231 = arith.constant 0 : index
    %281 = vector.load %arg7[%c1_230, %c0_231] : memref<3x100xf32, #tpu.memory_space<vmem>>, vector<1x100xf32>
    %282 = vector.broadcast %281 : vector<1x100xf32> to vector<3x100xf32>
    %283 = arith.mulf %280, %282 : vector<3x100xf32>
    %c2_232 = arith.constant 2 : index
    %c0_233 = arith.constant 0 : index
    %284 = vector.load %arg7[%c2_232, %c0_233] : memref<3x100xf32, #tpu.memory_space<vmem>>, vector<1x100xf32>
    %285 = vector.broadcast %284 : vector<1x100xf32> to vector<3x100xf32>
    %286 = arith.addf %283, %285 : vector<3x100xf32>
    %cst_234 = arith.constant 0.000000e+00 : f32
    %287 = vector.broadcast %cst_234 : f32 to vector<12x100xf32>
    %c0_235 = arith.constant 0 : index
    %c0_236 = arith.constant 0 : index
    %288 = vector.load %arg20[%c0_235, %c0_236] : memref<12x100xf32, #tpu.memory_space<vmem>>, vector<12x100xf32>
    tpu.vector_store %arg20[%c0_235, %c0_236], %287 {strides = array<i32>} : memref<12x100xf32, #tpu.memory_space<vmem>>, vector<12x100xf32>,
    %c4_237 = arith.constant 4 : index
    %c0_238 = arith.constant 0 : index
    %289 = vector.load %arg20[%c4_237, %c0_238] : memref<12x100xf32, #tpu.memory_space<vmem>>, vector<3x100xf32>
    tpu.vector_store %arg20[%c4_237, %c0_238], %286 {strides = array<i32>} : memref<12x100xf32, #tpu.memory_space<vmem>>, vector<3x100xf32>,
    %cst_239 = arith.constant 0.000000e+00 : f32
    %290 = vector.broadcast %cst_239 : f32 to vector<3x200xf32>
    %c0_240 = arith.constant 0 : index
    %c0_241 = arith.constant 0 : index
    %291 = vector.load %arg20[%c0_240, %c0_241] : memref<12x100xf32, #tpu.memory_space<vmem>>, vector<3x100xf32>
    %c0_242 = arith.constant 0 : index
    %c0_243 = arith.constant 0 : index
    %c0_244 = arith.constant 0 : index
    %292 = vector.load %arg8[%c0_242, %c0_243, %c0_244] : memref<10x100x200xf32, #tpu.memory_space<vmem>>, vector<1x100x200xf32>
    %293 = vector.shape_cast %292 : vector<1x100x200xf32> to vector<100x200xf32>
    %cst_245 = arith.constant dense<0.000000e+00> : vector<3x200xf32>
    %294 = tpu.matmul %291, %293, %cst_245 {dimension_numbers = #tpu.dot_dimension_numbers<[1], [0], [0], [1], [0, 0, 1, 1], [], []>} : vector<3x100xf32>, vector<100x200xf32>, vector<3x200xf32> -> vector<3x200xf32>
    %295 = arith.addf %290, %294 : vector<3x200xf32>
    %c1_246 = arith.constant 1 : index
    %c0_247 = arith.constant 0 : index
    %296 = vector.load %arg20[%c1_246, %c0_247] : memref<12x100xf32, #tpu.memory_space<vmem>>, vector<3x100xf32>
    %c1_248 = arith.constant 1 : index
    %c0_249 = arith.constant 0 : index
    %c0_250 = arith.constant 0 : index
    %297 = vector.load %arg8[%c1_248, %c0_249, %c0_250] : memref<10x100x200xf32, #tpu.memory_space<vmem>>, vector<1x100x200xf32>
    %298 = vector.shape_cast %297 : vector<1x100x200xf32> to vector<100x200xf32>
    %cst_251 = arith.constant dense<0.000000e+00> : vector<3x200xf32>
    %299 = tpu.matmul %296, %298, %cst_251 {dimension_numbers = #tpu.dot_dimension_numbers<[1], [0], [0], [1], [0, 0, 1, 1], [], []>} : vector<3x100xf32>, vector<100x200xf32>, vector<3x200xf32> -> vector<3x200xf32>
    %300 = arith.addf %295, %299 : vector<3x200xf32>
    %c2_252 = arith.constant 2 : index
    %c0_253 = arith.constant 0 : index
    %301 = vector.load %arg20[%c2_252, %c0_253] : memref<12x100xf32, #tpu.memory_space<vmem>>, vector<3x100xf32>
    %c2_254 = arith.constant 2 : index
    %c0_255 = arith.constant 0 : index
    %c0_256 = arith.constant 0 : index
    %302 = vector.load %arg8[%c2_254, %c0_255, %c0_256] : memref<10x100x200xf32, #tpu.memory_space<vmem>>, vector<1x100x200xf32>
    %303 = vector.shape_cast %302 : vector<1x100x200xf32> to vector<100x200xf32>
    %cst_257 = arith.constant dense<0.000000e+00> : vector<3x200xf32>
    %304 = tpu.matmul %301, %303, %cst_257 {dimension_numbers = #tpu.dot_dimension_numbers<[1], [0], [0], [1], [0, 0, 1, 1], [], []>} : vector<3x100xf32>, vector<100x200xf32>, vector<3x200xf32> -> vector<3x200xf32>
    %305 = arith.addf %300, %304 : vector<3x200xf32>
    %c3_258 = arith.constant 3 : index
    %c0_259 = arith.constant 0 : index
    %306 = vector.load %arg20[%c3_258, %c0_259] : memref<12x100xf32, #tpu.memory_space<vmem>>, vector<3x100xf32>
    %c3_260 = arith.constant 3 : index
    %c0_261 = arith.constant 0 : index
    %c0_262 = arith.constant 0 : index
    %307 = vector.load %arg8[%c3_260, %c0_261, %c0_262] : memref<10x100x200xf32, #tpu.memory_space<vmem>>, vector<1x100x200xf32>
    %308 = vector.shape_cast %307 : vector<1x100x200xf32> to vector<100x200xf32>
    %cst_263 = arith.constant dense<0.000000e+00> : vector<3x200xf32>
    %309 = tpu.matmul %306, %308, %cst_263 {dimension_numbers = #tpu.dot_dimension_numbers<[1], [0], [0], [1], [0, 0, 1, 1], [], []>} : vector<3x100xf32>, vector<100x200xf32>, vector<3x200xf32> -> vector<3x200xf32>
    %310 = arith.addf %305, %309 : vector<3x200xf32>
    %c4_264 = arith.constant 4 : index
    %c0_265 = arith.constant 0 : index
    %311 = vector.load %arg20[%c4_264, %c0_265] : memref<12x100xf32, #tpu.memory_space<vmem>>, vector<3x100xf32>
    %c4_266 = arith.constant 4 : index
    %c0_267 = arith.constant 0 : index
    %c0_268 = arith.constant 0 : index
    %312 = vector.load %arg8[%c4_266, %c0_267, %c0_268] : memref<10x100x200xf32, #tpu.memory_space<vmem>>, vector<1x100x200xf32>
    %313 = vector.shape_cast %312 : vector<1x100x200xf32> to vector<100x200xf32>
    %cst_269 = arith.constant dense<0.000000e+00> : vector<3x200xf32>
    %314 = tpu.matmul %311, %313, %cst_269 {dimension_numbers = #tpu.dot_dimension_numbers<[1], [0], [0], [1], [0, 0, 1, 1], [], []>} : vector<3x100xf32>, vector<100x200xf32>, vector<3x200xf32> -> vector<3x200xf32>
    %315 = arith.addf %310, %314 : vector<3x200xf32>
    %c5_270 = arith.constant 5 : index
    %c0_271 = arith.constant 0 : index
    %316 = vector.load %arg20[%c5_270, %c0_271] : memref<12x100xf32, #tpu.memory_space<vmem>>, vector<3x100xf32>
    %c5_272 = arith.constant 5 : index
    %c0_273 = arith.constant 0 : index
    %c0_274 = arith.constant 0 : index
    %317 = vector.load %arg8[%c5_272, %c0_273, %c0_274] : memref<10x100x200xf32, #tpu.memory_space<vmem>>, vector<1x100x200xf32>
    %318 = vector.shape_cast %317 : vector<1x100x200xf32> to vector<100x200xf32>
    %cst_275 = arith.constant dense<0.000000e+00> : vector<3x200xf32>
    %319 = tpu.matmul %316, %318, %cst_275 {dimension_numbers = #tpu.dot_dimension_numbers<[1], [0], [0], [1], [0, 0, 1, 1], [], []>} : vector<3x100xf32>, vector<100x200xf32>, vector<3x200xf32> -> vector<3x200xf32>
    %320 = arith.addf %315, %319 : vector<3x200xf32>
    %c6_276 = arith.constant 6 : index
    %c0_277 = arith.constant 0 : index
    %321 = vector.load %arg20[%c6_276, %c0_277] : memref<12x100xf32, #tpu.memory_space<vmem>>, vector<3x100xf32>
    %c6_278 = arith.constant 6 : index
    %c0_279 = arith.constant 0 : index
    %c0_280 = arith.constant 0 : index
    %322 = vector.load %arg8[%c6_278, %c0_279, %c0_280] : memref<10x100x200xf32, #tpu.memory_space<vmem>>, vector<1x100x200xf32>
    %323 = vector.shape_cast %322 : vector<1x100x200xf32> to vector<100x200xf32>
    %cst_281 = arith.constant dense<0.000000e+00> : vector<3x200xf32>
    %324 = tpu.matmul %321, %323, %cst_281 {dimension_numbers = #tpu.dot_dimension_numbers<[1], [0], [0], [1], [0, 0, 1, 1], [], []>} : vector<3x100xf32>, vector<100x200xf32>, vector<3x200xf32> -> vector<3x200xf32>
    %325 = arith.addf %320, %324 : vector<3x200xf32>
    %c7_282 = arith.constant 7 : index
    %c0_283 = arith.constant 0 : index
    %326 = vector.load %arg20[%c7_282, %c0_283] : memref<12x100xf32, #tpu.memory_space<vmem>>, vector<3x100xf32>
    %c7_284 = arith.constant 7 : index
    %c0_285 = arith.constant 0 : index
    %c0_286 = arith.constant 0 : index
    %327 = vector.load %arg8[%c7_284, %c0_285, %c0_286] : memref<10x100x200xf32, #tpu.memory_space<vmem>>, vector<1x100x200xf32>
    %328 = vector.shape_cast %327 : vector<1x100x200xf32> to vector<100x200xf32>
    %cst_287 = arith.constant dense<0.000000e+00> : vector<3x200xf32>
    %329 = tpu.matmul %326, %328, %cst_287 {dimension_numbers = #tpu.dot_dimension_numbers<[1], [0], [0], [1], [0, 0, 1, 1], [], []>} : vector<3x100xf32>, vector<100x200xf32>, vector<3x200xf32> -> vector<3x200xf32>
    %330 = arith.addf %325, %329 : vector<3x200xf32>
    %c8_288 = arith.constant 8 : index
    %c0_289 = arith.constant 0 : index
    %331 = vector.load %arg20[%c8_288, %c0_289] : memref<12x100xf32, #tpu.memory_space<vmem>>, vector<3x100xf32>
    %c8_290 = arith.constant 8 : index
    %c0_291 = arith.constant 0 : index
    %c0_292 = arith.constant 0 : index
    %332 = vector.load %arg8[%c8_290, %c0_291, %c0_292] : memref<10x100x200xf32, #tpu.memory_space<vmem>>, vector<1x100x200xf32>
    %333 = vector.shape_cast %332 : vector<1x100x200xf32> to vector<100x200xf32>
    %cst_293 = arith.constant dense<0.000000e+00> : vector<3x200xf32>
    %334 = tpu.matmul %331, %333, %cst_293 {dimension_numbers = #tpu.dot_dimension_numbers<[1], [0], [0], [1], [0, 0, 1, 1], [], []>} : vector<3x100xf32>, vector<100x200xf32>, vector<3x200xf32> -> vector<3x200xf32>
    %335 = arith.addf %330, %334 : vector<3x200xf32>
    %c9_294 = arith.constant 9 : index
    %c0_295 = arith.constant 0 : index
    %336 = vector.load %arg20[%c9_294, %c0_295] : memref<12x100xf32, #tpu.memory_space<vmem>>, vector<3x100xf32>
    %c9_296 = arith.constant 9 : index
    %c0_297 = arith.constant 0 : index
    %c0_298 = arith.constant 0 : index
    %337 = vector.load %arg8[%c9_296, %c0_297, %c0_298] : memref<10x100x200xf32, #tpu.memory_space<vmem>>, vector<1x100x200xf32>
    %338 = vector.shape_cast %337 : vector<1x100x200xf32> to vector<100x200xf32>
    %cst_299 = arith.constant dense<0.000000e+00> : vector<3x200xf32>
    %339 = tpu.matmul %336, %338, %cst_299 {dimension_numbers = #tpu.dot_dimension_numbers<[1], [0], [0], [1], [0, 0, 1, 1], [], []>} : vector<3x100xf32>, vector<100x200xf32>, vector<3x200xf32> -> vector<3x200xf32>
    %340 = arith.addf %335, %339 : vector<3x200xf32>
    %341 = tpu.iota {dimensions = array<i32: 0>} : vector<1x3xi32>
    %c3_i32_300 = arith.constant 3 : i32
    %342 = vector.broadcast %c3_i32_300 : i32 to vector<1x3xi32>
    %343 = arith.muli %342, %341 : vector<1x3xi32>
    %344 = tpu.iota {dimensions = array<i32: 1>} : vector<1x3xi32>
    %c0_i32_301 = arith.constant 0 : i32
    %345 = vector.broadcast %c0_i32_301 : i32 to vector<1x3xi32>
    %346 = arith.addi %343, %345 : vector<1x3xi32>
    %347 = arith.cmpi eq, %344, %346 : vector<1x3xi32>
    %348 = arith.extui %347 : vector<1x3xi1> to vector<1x3xi32>
    %349 = arith.sitofp %348 : vector<1x3xi32> to vector<1x3xf32>
    %cst_302 = arith.constant dense<0.000000e+00> : vector<1x200xf32>
    %350 = tpu.matmul %349, %340, %cst_302 {dimension_numbers = #tpu.dot_dimension_numbers<[1], [0], [0], [1], [0, 0, 1, 1], [], []>} : vector<1x3xf32>, vector<3x200xf32>, vector<1x200xf32> -> vector<1x200xf32>
    %c1_i32_303 = arith.constant 1 : i32
    %351 = vector.broadcast %c1_i32_303 : i32 to vector<1x3xi32>
    %352 = arith.addi %343, %351 : vector<1x3xi32>
    %353 = arith.cmpi eq, %344, %352 : vector<1x3xi32>
    %354 = arith.extui %353 : vector<1x3xi1> to vector<1x3xi32>
    %355 = arith.sitofp %354 : vector<1x3xi32> to vector<1x3xf32>
    %cst_304 = arith.constant dense<0.000000e+00> : vector<1x200xf32>
    %356 = tpu.matmul %355, %340, %cst_304 {dimension_numbers = #tpu.dot_dimension_numbers<[1], [0], [0], [1], [0, 0, 1, 1], [], []>} : vector<1x3xf32>, vector<3x200xf32>, vector<1x200xf32> -> vector<1x200xf32>
    %357 = arith.maximumf %350, %356 : vector<1x200xf32>
    %c2_i32_305 = arith.constant 2 : i32
    %358 = vector.broadcast %c2_i32_305 : i32 to vector<1x3xi32>
    %359 = arith.addi %343, %358 : vector<1x3xi32>
    %360 = arith.cmpi eq, %344, %359 : vector<1x3xi32>
    %361 = arith.extui %360 : vector<1x3xi1> to vector<1x3xi32>
    %362 = arith.sitofp %361 : vector<1x3xi32> to vector<1x3xf32>
    %cst_306 = arith.constant dense<0.000000e+00> : vector<1x200xf32>
    %363 = tpu.matmul %362, %340, %cst_306 {dimension_numbers = #tpu.dot_dimension_numbers<[1], [0], [0], [1], [0, 0, 1, 1], [], []>} : vector<1x3xf32>, vector<3x200xf32>, vector<1x200xf32> -> vector<1x200xf32>
    %364 = arith.maximumf %357, %363 : vector<1x200xf32>
    %c0_307 = arith.constant 0 : index
    %c0_308 = arith.constant 0 : index
    %365 = vector.load %arg9[%c0_307, %c0_308] : memref<3x200xf32, #tpu.memory_space<vmem>>, vector<1x200xf32>
    %366 = arith.addf %364, %365 : vector<1x200xf32>
    %cst_309 = arith.constant 0.000000e+00 : f32
    %367 = vector.broadcast %cst_309 : f32 to vector<1x200xf32>
    %368 = arith.cmpf ogt, %366, %367 : vector<1x200xf32>
    %cst_310 = arith.constant 0.000000e+00 : f32
    %369 = vector.broadcast %cst_310 : f32 to vector<1x200xf32>
    %370 = arith.minimumf %366, %369 : vector<1x200xf32>
    %371 = math.exp %370 : vector<1x200xf32>
    %cst_311 = arith.constant 1.000000e+00 : f32
    %372 = vector.broadcast %cst_311 : f32 to vector<1x200xf32>
    %373 = arith.subf %371, %372 : vector<1x200xf32>
    %374 = arith.select %368, %366, %373 : vector<1x200xi1>, vector<1x200xf32>
    %c1_312 = arith.constant 1 : index
    %c0_313 = arith.constant 0 : index
    %375 = vector.load %arg9[%c1_312, %c0_313] : memref<3x200xf32, #tpu.memory_space<vmem>>, vector<1x200xf32>
    %376 = arith.mulf %374, %375 : vector<1x200xf32>
    %c2_314 = arith.constant 2 : index
    %c0_315 = arith.constant 0 : index
    %377 = vector.load %arg9[%c2_314, %c0_315] : memref<3x200xf32, #tpu.memory_space<vmem>>, vector<1x200xf32>
    %378 = arith.addf %376, %377 : vector<1x200xf32>
    %cst_316 = arith.constant 0.000000e+00 : f32
    %379 = vector.broadcast %cst_316 : f32 to vector<1x144xf32>
    %c0_317 = arith.constant 0 : index
    %c0_318 = arith.constant 0 : index
    %c0_319 = arith.constant 0 : index
    %380 = vector.load %arg10[%c0_317, %c0_318, %c0_319] : memref<1x200x144xf32, #tpu.memory_space<vmem>>, vector<1x200x144xf32>
    %381 = vector.shape_cast %380 : vector<1x200x144xf32> to vector<200x144xf32>
    %cst_320 = arith.constant dense<0.000000e+00> : vector<1x144xf32>
    %382 = tpu.matmul %378, %381, %cst_320 {dimension_numbers = #tpu.dot_dimension_numbers<[1], [0], [0], [1], [0, 0, 1, 1], [], []>} : vector<1x200xf32>, vector<200x144xf32>, vector<1x144xf32> -> vector<1x144xf32>
    %383 = arith.addf %379, %382 : vector<1x144xf32>
    %c0_321 = arith.constant 0 : index
    %c0_322 = arith.constant 0 : index
    %384 = vector.load %arg11[%c0_321, %c0_322] : memref<1x144xf32, #tpu.memory_space<vmem>>, vector<1x144xf32>
    %385 = arith.addf %383, %384 : vector<1x144xf32>
    %cst_323 = arith.constant 0.000000e+00 : f32
    %386 = vector.broadcast %cst_323 : f32 to vector<1x144xf32>
    %387 = arith.cmpf ogt, %385, %386 : vector<1x144xf32>
    %cst_324 = arith.constant 0.000000e+00 : f32
    %388 = vector.broadcast %cst_324 : f32 to vector<1x144xf32>
    %389 = arith.minimumf %385, %388 : vector<1x144xf32>
    %390 = math.exp %389 : vector<1x144xf32>
    %cst_325 = arith.constant 1.000000e+00 : f32
    %391 = vector.broadcast %cst_325 : f32 to vector<1x144xf32>
    %392 = arith.subf %390, %391 : vector<1x144xf32>
    %393 = arith.select %387, %385, %392 : vector<1x144xi1>, vector<1x144xf32>
    %c0_326 = arith.constant 0 : index
    %c0_327 = arith.constant 0 : index
    %394 = vector.load %arg12[%c0_326, %c0_327] : memref<144x44xf32, #tpu.memory_space<vmem>>, vector<144x44xf32>
    %cst_328 = arith.constant dense<0.000000e+00> : vector<1x44xf32>
    %395 = tpu.matmul %393, %394, %cst_328 {dimension_numbers = #tpu.dot_dimension_numbers<[1], [0], [0], [1], [0, 0, 1, 1], [], []>} : vector<1x144xf32>, vector<144x44xf32>, vector<1x44xf32> -> vector<1x44xf32>
    %c0_329 = arith.constant 0 : index
    %c0_330 = arith.constant 0 : index
    %396 = vector.load %arg13[%c0_329, %c0_330] : memref<1x44xf32, #tpu.memory_space<vmem>>, vector<1x44xf32>
    %397 = arith.addf %395, %396 : vector<1x44xf32>
    %cst_331 = arith.constant 0.000000e+00 : f32
    %398 = vector.broadcast %cst_331 : f32 to vector<1x44xf32>
    %399 = arith.cmpf ogt, %397, %398 : vector<1x44xf32>
    %cst_332 = arith.constant 0.000000e+00 : f32
    %400 = vector.broadcast %cst_332 : f32 to vector<1x44xf32>
    %401 = arith.minimumf %397, %400 : vector<1x44xf32>
    %402 = math.exp %401 : vector<1x44xf32>
    %cst_333 = arith.constant 1.000000e+00 : f32
    %403 = vector.broadcast %cst_333 : f32 to vector<1x44xf32>
    %404 = arith.subf %402, %403 : vector<1x44xf32>
    %405 = arith.select %399, %397, %404 : vector<1x44xi1>, vector<1x44xf32>
    %c0_334 = arith.constant 0 : index
    %c0_335 = arith.constant 0 : index
    %406 = vector.load %arg14[%c0_334, %c0_335] : memref<44x4xf32, #tpu.memory_space<vmem>>, vector<44x4xf32>
    %cst_336 = arith.constant dense<0.000000e+00> : vector<1x4xf32>
    %407 = tpu.matmul %405, %406, %cst_336 {dimension_numbers = #tpu.dot_dimension_numbers<[1], [0], [0], [1], [0, 0, 1, 1], [], []>} : vector<1x44xf32>, vector<44x4xf32>, vector<1x4xf32> -> vector<1x4xf32>
    %c0_337 = arith.constant 0 : index
    %c0_338 = arith.constant 0 : index
    %408 = vector.load %arg15[%c0_337, %c0_338] : memref<1x4xf32, #tpu.memory_space<vmem>>, vector<1x4xf32>
    %409 = arith.addf %407, %408 : vector<1x4xf32>
    %c0_339 = arith.constant 0 : index
    %c0_340 = arith.constant 0 : index
    %c0_341 = arith.constant 0 : index
    %410 = vector.load %arg16[%c0_339, %c0_340, %c0_341] : memref<1x1x4xf32, #tpu.memory_space<vmem>>, vector<1x1x4xf32>
    %411 = vector.shape_cast %410 : vector<1x1x4xf32> to vector<1x4xf32>
    %412 = vector.shape_cast %409 : vector<1x4xf32> to vector<1x1x4xf32>
    tpu.vector_store %arg16[%c0_339, %c0_340, %c0_341], %412 {strides = array<i32>} : memref<1x1x4xf32, #tpu.memory_space<vmem>>, vector<1x1x4xf32>,
    return
  }
  func.func @transform_0(%arg0: i32) -> (i32, i32, i32) {
    %c0_i32 = arith.constant 0 : i32
    %c0_i32_0 = arith.constant 0 : i32
    %c0_i32_1 = arith.constant 0 : i32
    return %arg0, %c0_i32, %c0_i32_0 : i32, i32, i32
  }
  func.func @transform_1(%arg0: i32) -> (i32, i32, i32) {
    %c0_i32 = arith.constant 0 : i32
    %c0_i32_0 = arith.constant 0 : i32
    %c0_i32_1 = arith.constant 0 : i32
    %c0_i32_2 = arith.constant 0 : i32
    return %c0_i32, %c0_i32_0, %c0_i32_1 : i32, i32, i32
  }
  func.func @transform_2(%arg0: i32) -> (i32, i32) {
    %c0_i32 = arith.constant 0 : i32
    %c0_i32_0 = arith.constant 0 : i32
    %c0_i32_1 = arith.constant 0 : i32
    return %c0_i32, %c0_i32_0 : i32, i32
  }
  func.func @transform_3(%arg0: i32) -> (i32, i32, i32) {
    %c0_i32 = arith.constant 0 : i32
    %c0_i32_0 = arith.constant 0 : i32
    %c0_i32_1 = arith.constant 0 : i32
    %c0_i32_2 = arith.constant 0 : i32
    return %c0_i32, %c0_i32_0, %c0_i32_1 : i32, i32, i32
  }
  func.func @transform_4(%arg0: i32) -> (i32, i32) {
    %c0_i32 = arith.constant 0 : i32
    %c0_i32_0 = arith.constant 0 : i32
    %c0_i32_1 = arith.constant 0 : i32
    return %c0_i32, %c0_i32_0 : i32, i32
  }
  func.func @transform_5(%arg0: i32) -> (i32, i32, i32) {
    %c0_i32 = arith.constant 0 : i32
    %c0_i32_0 = arith.constant 0 : i32
    %c0_i32_1 = arith.constant 0 : i32
    %c0_i32_2 = arith.constant 0 : i32
    return %c0_i32, %c0_i32_0, %c0_i32_1 : i32, i32, i32
  }
  func.func @transform_6(%arg0: i32) -> (i32, i32) {
    %c0_i32 = arith.constant 0 : i32
    %c0_i32_0 = arith.constant 0 : i32
    %c0_i32_1 = arith.constant 0 : i32
    return %c0_i32, %c0_i32_0 : i32, i32
  }
  func.func @transform_7(%arg0: i32) -> (i32, i32, i32) {
    %c0_i32 = arith.constant 0 : i32
    %c0_i32_0 = arith.constant 0 : i32
    %c0_i32_1 = arith.constant 0 : i32
    %c0_i32_2 = arith.constant 0 : i32
    return %c0_i32, %c0_i32_0, %c0_i32_1 : i32, i32, i32
  }
  func.func @transform_8(%arg0: i32) -> (i32, i32) {
    %c0_i32 = arith.constant 0 : i32
    %c0_i32_0 = arith.constant 0 : i32
    %c0_i32_1 = arith.constant 0 : i32
    return %c0_i32, %c0_i32_0 : i32, i32
  }
  func.func @transform_9(%arg0: i32) -> (i32, i32, i32) {
    %c0_i32 = arith.constant 0 : i32
    %c0_i32_0 = arith.constant 0 : i32
    %c0_i32_1 = arith.constant 0 : i32
    %c0_i32_2 = arith.constant 0 : i32
    return %c0_i32, %c0_i32_0, %c0_i32_1 : i32, i32, i32
  }
  func.func @transform_10(%arg0: i32) -> (i32, i32) {
    %c0_i32 = arith.constant 0 : i32
    %c0_i32_0 = arith.constant 0 : i32
    %c0_i32_1 = arith.constant 0 : i32
    return %c0_i32, %c0_i32_0 : i32, i32
  }
  func.func @transform_11(%arg0: i32) -> (i32, i32) {
    %c0_i32 = arith.constant 0 : i32
    %c0_i32_0 = arith.constant 0 : i32
    %c0_i32_1 = arith.constant 0 : i32
    return %c0_i32, %c0_i32_0 : i32, i32
  }
  func.func @transform_12(%arg0: i32) -> (i32, i32) {
    %c0_i32 = arith.constant 0 : i32
    %c0_i32_0 = arith.constant 0 : i32
    %c0_i32_1 = arith.constant 0 : i32
    return %c0_i32, %c0_i32_0 : i32, i32
  }
  func.func @transform_13(%arg0: i32) -> (i32, i32) {
    %c0_i32 = arith.constant 0 : i32
    %c0_i32_0 = arith.constant 0 : i32
    %c0_i32_1 = arith.constant 0 : i32
    return %c0_i32, %c0_i32_0 : i32, i32
  }
  func.func @transform_14(%arg0: i32) -> (i32, i32) {
    %c0_i32 = arith.constant 0 : i32
    %c0_i32_0 = arith.constant 0 : i32
    %c0_i32_1 = arith.constant 0 : i32
    return %c0_i32, %c0_i32_0 : i32, i32
  }
  func.func @transform_15(%arg0: i32) -> (i32, i32, i32) {
    %c0_i32 = arith.constant 0 : i32
    %c0_i32_0 = arith.constant 0 : i32
    %c0_i32_1 = arith.constant 0 : i32
    return %arg0, %c0_i32, %c0_i32_0 : i32, i32, i32
  }
}

</mosaic_0001>

<bundles_post_ra>
// kernel: cnn_forward.1
= control target key start
LH: loop header
LB: loop body
LE: loop exit
PB: predicated region body
PF: predicated region fallthrough
CT: control target
= control target key end

     0   :  { %s12673_s0 = inlined_call_operand.vmem [shape: f32[2,81,22], index: 0, kind: input, shape index: {}]   ;;  %s12674_s1 = inlined_call_operand.vmem [shape: f32[10,22,25], index: 1, kind: input, shape index: {}]   ;;  %s12675_s2 = inlined_call_operand.vmem [shape: f32[3,25], index: 2, kind: input, shape index: {}]   ;;  %s12676_s3 = inlined_call_operand.vmem [shape: f32[10,25,50], index: 3, kind: input, shape index: {}]   ;;  %s12677_s4 = inlined_call_operand.vmem [shape: f32[3,50], index: 4, kind: input, shape index: {}]   ;;  %s12678_s5 = inlined_call_operand.vmem [shape: f32[10,50,100], index: 5, kind: input, shape index: {}]   ;;  %s12679_s6 = inlined_call_operand.vmem [shape: f32[3,100], index: 6, kind: input, shape index: {}]   ;;  %s12680_s7 = inlined_call_operand.vmem [shape: f32[10,100,200], index: 7, kind: input, shape index: {}]   ;;  %s12681_s8 = inlined_call_operand.vmem [shape: f32[3,200], index: 8, kind: input, shape index: {}]   ;;  %s12682_s9 = inlined_call_operand.vmem [shape: f32[1,200,144], index: 9, kind: input, shape index: {}]   ;;  %s12683_s10 = inlined_call_operand.vmem [shape: f32[1,144], index: 10, kind: input, shape index: {}]   ;;  %s12684_s11 = inlined_call_operand.vmem [shape: f32[144,44], index: 11, kind: input, shape index: {}]   ;;  %s12685_s12 = inlined_call_operand.vmem [shape: f32[1,44], index: 12, kind: input, shape index: {}]   ;;  %s12686_s13 = inlined_call_operand.vmem [shape: f32[44,4], index: 13, kind: input, shape index: {}]   ;;  %s12687_s14 = inlined_call_operand.vmem [shape: f32[1,4], index: 14, kind: input, shape index: {}]   ;;  %s12688_s15 = inlined_call_operand.hbm [shape: f32[2,1,4], index: 15, kind: output, shape index: {}]  }
   0x1   :  { %12689 = sst [smem:[#allocation10_spill]] %s12673_s0 }
   0x2   :  { %12690 = sst [smem:[#allocation11_spill]] %s12674_s1 }
   0x3   :  { %12691 = sst [smem:[#allocation12_spill]] %s12675_s2 }
   0x4   :  { %12692 = sst [smem:[#allocation13_spill]] %s12676_s3 }
   0x5   :  { %12693 = sst [smem:[#allocation14_spill]] %s12677_s4 }
   0x6   :  { %20 = vsyncpa [#allocation7], 0 }
   0x7   :  { %22 = vsyncpa [#allocation7 + $0x1], 0  ;;  %s10231_s18 = smov 0   ;;  %s10233_s19 = smov 0  }
   0x8   :  { %s10235_s20 = smov 0   ;;  %s10237_s21 = smov 0  }
   0x9 LB: > { %s10252_s22 = sadd.s32 4294967295, %s10144_s21   ;;  %s7149_s23 = sadd.s32 4294967294, %s10144_s21   ;;  %s10144_s21 = sphi %s10237_s21, %s12708_s21   ;;  %s10140_s20 = sphi %s10235_s20, %s12707_s20   ;;  %s10136_s19 = sphi %s10233_s19, %s12706_s19   ;;  %s10132_s18 = sphi %s10231_s18, %s12705_s18  }
   0xa   : > { %s10256_s24 = sadd.s32 1, %s10144_s21   ;;  %s355_s25 = sadd.s32 1, %s10140_s20 }
   0xb   : > { %s352_s26 = ssub.s32 %s10144_s21, %s10256_s24  ;;  %p365_p0 = scmp.ne.s32.totalorder %s10140_s20, %s10136_s19 }
   0xc   : > { %p353_p1 = scmp.eq.s32.totalorder %s352_s26, 0  ;;  %p366_p2 = scmp.eq.s32.totalorder %s10252_s22, 1 }
   0xd   : > { %p371_p3 = scmp.ne.s32.totalorder %s10136_s19, %s10132_s18  ;;  %p372_p4 = scmp.eq.s32.totalorder %s7149_s23, 1 }
   0xe   : > { %s10267_s27 = scalar_select %p353_p1, %s10140_s20, %s355_s25  }
   0xf   : > { %p10269_p5 = por %p366_p2, %p365_p0  ;;  %p10273_p6 = por %p372_p4, %p371_p3 }
  0x10   : > { %12694 = sst [smem:[#allocation9_spill]] %s10267_s27  ;;  %p7152_p7 = scmp.ge.s32.totalorder %s10144_s21, 1 }
  0x11   : > { %p440_p8 = scmp.lt.s32.totalorder %s10144_s21, 3 }
  0x13   : > { %p441_p9 = pnand %p7152_p7, %p440_p8 }
  0x14   : > { %s12697_s1 = sld [smem:[#allocation11_spill]] (!%p441_p9)  ;;  %v10146_v2 = vmov (!%p441_p9), 0.0|0.0   ;;  %p487_p10 = scmp.lt.s32.totalorder (!%p441_p9), %s10252_s22, 1  ;;  %vm503_vm0 = vcmask (!%p441_p9), 179200   ;;  %vm10147_vm1 = vmmov (!%p441_p9), 0   ;;  %v10148_v4 = vmov (!%p441_p9), 0.0  }
  0x15   : > { %444 = sbr.rel (%p441_p9) target bundleno = 3484 (0xd9c), region = 80  ;;  %9067 = vmatprep.subr.bf16.mxu0 (!%p441_p9), %v10146_v2  ;;  %8220 = vmatprep.mubr.msk.f32.mxu0 (!%p441_p9), %vm10147_vm1, %v10148_v4  ;;  %504 = vst.msk [vmem:[#allocation2] sm:$0xff] (!%p441_p9), %vm503_vm0, %v10148_v4  ;;  %505 = vst.msk [vmem:[#allocation2 + $0x8] sm:$0xff] (!%p441_p9), %vm503_vm0, %v10148_v4  ;;  %vm591_vm2 = vcmask (!%p441_p9), 1045504   ;;  %s12698_s0 = sld [smem:[#allocation10_spill]] (!%p441_p9)  ;;  %vm527_vm3 = vcmask (!%p441_p9), 172032  }
  0x16   : > { %506 = vst.msk [vmem:[#allocation2 + $0x10] sm:$0xff] (!%p441_p9), %vm503_vm0, %v10148_v4  ;;  %507 = vst.msk [vmem:[#allocation2 + $0x18] sm:$0xff] (!%p441_p9), %vm503_vm0, %v10148_v4  ;;  %vm515_vm4 = vcmask (!%p441_p9), 173056   ;;  %vm2350_vm6 = vcmask (!%p441_p9), 662528   ;;  %vm2363_vm9 = vcmask (!%p441_p9), 1040384   ;;  %s12699_s3 = sld [smem:[#allocation13_spill]] (!%p441_p9) }
  0x17   : > { %508 = vst.msk [vmem:[#allocation2 + $0x20] sm:$0xff] (!%p441_p9), %vm503_vm0, %v10148_v4  ;;  %509 = vst.msk [vmem:[#allocation2 + $0x28] sm:$0xff] (!%p441_p9), %vm503_vm0, %v10148_v4  ;;  %s12702_s2 = sld [smem:[#allocation12_spill]] (!%p441_p9)  ;;  %s12703_s4 = sld [smem:[#allocation14_spill]] (!%p441_p9) }
  0x18   : > { %510 = vst.msk [vmem:[#allocation2 + $0x30] sm:$0xff] (!%p441_p9), %vm503_vm0, %v10148_v4  ;;  %511 = vst.msk [vmem:[#allocation2 + $0x38] sm:$0xff] (!%p441_p9), %vm503_vm0, %v10148_v4  ;;  %s485_s17 = sand.u32 (!%p441_p9), 1, %s10136_s19   ;;  %s7822_s26 = sshll.u32 (!%p441_p9), %s10252_s22, 4 }
  0x19   : > { %512 = vst.msk [vmem:[#allocation2 + $0x40] sm:$0xff] (!%p441_p9), %vm503_vm0, %v10148_v4  ;;  %513 = vst.msk [vmem:[#allocation2 + $0x48] sm:$0xff] (!%p441_p9), %vm503_vm0, %v10148_v4 }
  0x1a   : > { %v7154_v0 = vld [vmem:[%s12697_s1 + $0x18] sm:$0xff] (!%p441_p9)  ;;  %v7155_v1 = vld [vmem:[%s12697_s1 + $0x20] sm:$0xff] (!%p441_p9)  ;;  %514 = vst.msk [vmem:[#allocation2 + $0x50] sm:$0xff] (!%p441_p9), %vm503_vm0, %v10148_v4  ;;  %v7156_v5 = vld [vmem:[%s12697_s1 + $0x28] sm:$0x3f] (!%p441_p9) }
  0x1b   : > { %v9068_v3 = vpack.c.bf16 (!%p441_p9), %v7155_v1, %v7154_v0  ;;  %v540_v15 = vld [vmem:[%s12697_s1] sm:$0xff] (!%p441_p9)  ;;  %v541_v16 = vld [vmem:[%s12697_s1 + $0x8] sm:$0xff] (!%p441_p9)  ;;  %v542_v21 = vld [vmem:[%s12697_s1 + $0x10] sm:$0x3f] (!%p441_p9)  ;;  %516 = vst.msk [vmem:[#allocation2 + $0x58] sm:$0x3] (!%p441_p9), %vm515_vm4, %v10148_v4 }
  0x1c   : > { %s488_s25 = scalar_select %p487_p10, %s10252_s22, 1  ;;  %v9071_v18 = vpack.c.bf16 %v541_v16, %v540_v15  ;;  %v7181_v31 = vld [vmem:[%s12697_s1 + $0x30] sm:$0xff]  ;;  %v7182_v32 = vld [vmem:[%s12697_s1 + $0x38] sm:$0xff]  ;;  %v7183_v36 = vld [vmem:[%s12697_s1 + $0x40] sm:$0x3f]  ;;  %vm2737_vm4 = vcmask 203776  }
  0x1d   : > { %9069 = vmatpush3.bf16.msra.mxu0 %v9068_v3  ;;  %v9074_v34 = vpack.c.bf16 %v7182_v32, %v7181_v31  ;;  %v7196_v47 = vld [vmem:[%s12697_s1 + $0x48] sm:$0xff]  ;;  %v7197_v48 = vld [vmem:[%s12697_s1 + $0x50] sm:$0xff]  ;;  %v7198_v52 = vld [vmem:[%s12697_s1 + $0x58] sm:$0x3f]  ;;  %2739 = vst.msk [vmem:[#allocation3 + $0x8] sm:$0xff] %vm2737_vm4, %v10148_v4  ;;  %s10150_s22 = smov [#allocation6]  }
  0x1e   : > { %8218 = vmatprep.subr.mxu0 %v10148_v4  ;;  %s10014_s16 = smul.u32 88, %s488_s25  ;;  %v9077_v50 = vpack.c.bf16 %v7197_v48, %v7196_v47  ;;  %v7211_v62 = vld [vmem:[%s12697_s1 + $0x60] sm:$0xff]  ;;  %v7212_v63 = vld [vmem:[%s12697_s1 + $0x68] sm:$0xff]  ;;  %v7226_v15 = vld [vmem:[%s12697_s1 + $0x78] sm:$0xff]  ;;  %2740 = vst.msk [vmem:[#allocation3 + $0x10] sm:$0xff] %vm2737_vm4, %v10148_v4 }
  0x1f   : > { %v9080_v1 = vpack.c.bf16 %v7212_v63, %v7211_v62  ;;  %v7227_v16 = vld [vmem:[%s12697_s1 + $0x80] sm:$0xff]  ;;  %v7241_v48 = vld [vmem:[%s12697_s1 + $0x90] sm:$0xff]  ;;  %v7256_v63 = vld [vmem:[%s12697_s1 + $0xa8] sm:$0xff]  ;;  %2738 = vst.msk [vmem:[#allocation3] sm:$0xff] %vm2737_vm4, %v10148_v4 }
  0x20   : > { %s10322_s27 = scalar_lea.vmem %s12698_s0, %s10014_s16  ;;  %2741 = vst.msk [vmem:[#allocation3 + $0x18] sm:$0xff] %vm2737_vm4, %v10148_v4  ;;  %s12631_s0 = scalar_lea.hbm %s12688_s15, %s7822_s26 }
  0x21   : > { %8219 = vmatpush3.msk.msra.mxu0 %vm591_vm2, %v7156_v5  ;;  %v492_v6 = vld [vmem:[%s10322_s27] sm:$0xff]  ;;  %v493_v7 = vld [vmem:[%s10322_s27 + $0x8] sm:$0xff]  ;;  %v494_v8 = vld [vmem:[%s10322_s27 + $0x10] sm:$0xff] }
  0x22   : > { %9070 = vmatprep.subr.bf16.mxu0 %v10146_v2  ;;  %517 = vst.msk [vmem:[#allocation2 + $0x4] sm:$0xff] %vm503_vm0, %v492_v6  ;;  %518 = vst.msk [vmem:[#allocation2 + $0xc] sm:$0xff] %vm503_vm0, %v493_v7  ;;  %v495_v9 = vld [vmem:[%s10322_s27 + $0x18] sm:$0xff]  ;;  %v496_v10 = vld [vmem:[%s10322_s27 + $0x20] sm:$0xff] }
  0x23   : > { %519 = vst.msk [vmem:[#allocation2 + $0x14] sm:$0xff] %vm503_vm0, %v494_v8  ;;  %v497_v11 = vld [vmem:[%s10322_s27 + $0x28] sm:$0xff]  ;;  %520 = vst.msk [vmem:[#allocation2 + $0x1c] sm:$0xff] %vm503_vm0, %v495_v9  ;;  %v498_v12 = vld [vmem:[%s10322_s27 + $0x30] sm:$0xff] }
  0x24   : > { %521 = vst.msk [vmem:[#allocation2 + $0x24] sm:$0xff] %vm503_vm0, %v496_v10  ;;  %522 = vst.msk [vmem:[#allocation2 + $0x2c] sm:$0xff] %vm503_vm0, %v497_v11  ;;  %v499_v13 = vld [vmem:[%s10322_s27 + $0x38] sm:$0xff]  ;;  %v500_v14 = vld [vmem:[%s10322_s27 + $0x40] sm:$0xff] }
  0x25   : > { %523 = vst.msk [vmem:[#allocation2 + $0x34] sm:$0xff] %vm503_vm0, %v498_v12  ;;  %524 = vst.msk [vmem:[#allocation2 + $0x3c] sm:$0xff] %vm503_vm0, %v499_v13  ;;  %v501_v17 = vld [vmem:[%s10322_s27 + $0x48] sm:$0xff]  ;;  %v502_v45 = vld [vmem:[%s10322_s27 + $0x50] sm:$0x1]  ;;  %s7082_s27 = scalar_lea.sflag [#allocation7], %s485_s17 }
  0x26   : > { %525 = vst.msk [vmem:[#allocation2 + $0x44] sm:$0xff] %vm503_vm0, %v500_v14  ;;  %526 = vst.msk [vmem:[#allocation2 + $0x4c] sm:$0xff] %vm503_vm0, %v501_v17  ;;  %v7213_v5 = vld [vmem:[%s12697_s1 + $0x70] sm:$0x3f] }
  0x27   : > { %528 = vst.msk [vmem:[#allocation2 + $0x54] sm:$0x1] %vm527_vm3, %v502_v45  ;;  %v1427_v62 = vld [vmem:[#allocation2 + $0x55] sm:$0x1] }
  0x29   : > { %v543_v19 = vld [vmem:[#allocation2 + $0x1] sm:$0xff]  ;;  %v10354_v20 = vld [vmem:[#allocation2 + $0x9] sm:$0xff] }
  0x2a   : > { %8221 = vmatmul.mubr.msk.f32.vlgmr.msra.gmra.mrb[0].mxu0 %vm503_vm0, %v543_v19  ;;  %v10364_v22 = vld [vmem:[#allocation2 + $0x11] sm:$0xff]  ;;  %v10372_v23 = vld [vmem:[#allocation2 + $0x19] sm:$0xff]  ;;  %v10426_v35 = vld [vmem:[#allocation2 + $0x8] sm:$0xff] }
  0x2b   : > { %8223 = vmatprep.mubr.msk.f32.mxu0 %vm10147_vm1, %v10148_v4  ;;  %9072 = vmatpush3.bf16.msra.mxu0 %v9071_v18  ;;  %v10378_v24 = vld [vmem:[#allocation2 + $0x21] sm:$0xff]  ;;  %v10384_v25 = vld [vmem:[#allocation2 + $0x29] sm:$0xff]  ;;  %v10444_v38 = vld [vmem:[#allocation2 + $0x18] sm:$0xff]  ;;  %v9083_v18 = vpack.c.bf16 %v7227_v16, %v7226_v15 }
  0x2c   : > { %8257 = vmatprep.subr.mxu0 %v10148_v4  ;;  %v10390_v26 = vld [vmem:[#allocation2 + $0x31] sm:$0xff]  ;;  %v10396_v27 = vld [vmem:[#allocation2 + $0x39] sm:$0xff]  ;;  %v10456_v40 = vld [vmem:[#allocation2 + $0x28] sm:$0xff] }
  0x2d   : > { %v10402_v28 = vld [vmem:[#allocation2 + $0x41] sm:$0xff]  ;;  %v10408_v29 = vld [vmem:[#allocation2 + $0x49] sm:$0xff]  ;;  %v553_v30 = vld [vmem:[#allocation2 + $0x51] sm:$0x1] }
  0x2e   : > { %8224 = vmatmul.mubr.msk.f32.gmra.mrb[2].mxu0 %vm503_vm0, %v10354_v20  ;;  %v529_v33 = vld [vmem:[#allocation2] sm:$0xff]  ;;  %v10436_v37 = vld [vmem:[#allocation2 + $0x10] sm:$0xff]  ;;  %v10468_v42 = vld [vmem:[#allocation2 + $0x38] sm:$0xff] }
  0x2f   : > { %8226 = vmatprep.mubr.msk.f32.mxu0 %vm10147_vm1, %v10148_v4  ;;  %8258 = vmatpush3.msk.msra.mxu0 %vm591_vm2, %v542_v21  ;;  %v10450_v39 = vld [vmem:[#allocation2 + $0x20] sm:$0xff]  ;;  %v10462_v41 = vld [vmem:[#allocation2 + $0x30] sm:$0xff]  ;;  %v10480_v44 = vld [vmem:[#allocation2 + $0x48] sm:$0xff] }
  0x30   : > { %9073 = vmatprep.subr.bf16.mxu0 %v10146_v2  ;;  %v10474_v43 = vld [vmem:[#allocation2 + $0x40] sm:$0xff]  ;;  %v539_v46 = vld [vmem:[#allocation2 + $0x50] sm:$0x1]  ;;  %v873_v53 = vld [vmem:[#allocation2 + $0x12] sm:$0xff] }
  0x31   : > { %v871_v49 = vld [vmem:[#allocation2 + $0x2] sm:$0xff]  ;;  %v872_v51 = vld [vmem:[#allocation2 + $0xa] sm:$0xff]  ;;  %v874_v54 = vld [vmem:[#allocation2 + $0x1a] sm:$0xff] }
  0x32   : > { %8227 = vmatmul.mubr.msk.f32.gmra.mrb[4].mxu0 %vm503_vm0, %v10364_v22  ;;  %v875_v55 = vld [vmem:[#allocation2 + $0x22] sm:$0xff]  ;;  %v876_v56 = vld [vmem:[#allocation2 + $0x2a] sm:$0xff]  ;;  %v877_v57 = vld [vmem:[#allocation2 + $0x32] sm:$0xff] }
  0x33   : > { %8229 = vmatprep.mubr.msk.f32.mxu0 %vm10147_vm1, %v10148_v4  ;;  %v878_v58 = vld [vmem:[#allocation2 + $0x3a] sm:$0xff]  ;;  %v879_v59 = vld [vmem:[#allocation2 + $0x42] sm:$0xff]  ;;  %v880_v60 = vld [vmem:[#allocation2 + $0x4a] sm:$0xff] }
  0x34   : > { %v881_v61 = vld [vmem:[#allocation2 + $0x52] sm:$0x1]  ;;  %v1053_v0 = vld [vmem:[#allocation2 + $0x3] sm:$0xff]  ;;  %v1055_v6 = vld [vmem:[#allocation2 + $0x13] sm:$0xff] }
  0x35   : > { %v1054_v3 = vld [vmem:[#allocation2 + $0xb] sm:$0xff]  ;;  %v1056_v7 = vld [vmem:[#allocation2 + $0x1b] sm:$0xff]  ;;  %v1057_v8 = vld [vmem:[#allocation2 + $0x23] sm:$0xff] }
  0x36   : > { %8230 = vmatmul.mubr.msk.f32.gmra.mrb[6].mxu0 %vm503_vm0, %v10372_v23  ;;  %v1058_v9 = vld [vmem:[#allocation2 + $0x2b] sm:$0xff]  ;;  %v1059_v10 = vld [vmem:[#allocation2 + $0x33] sm:$0xff]  ;;  %v1060_v11 = vld [vmem:[#allocation2 + $0x3b] sm:$0xff] }
  0x37   : > { %8232 = vmatprep.mubr.msk.f32.mxu0 %vm10147_vm1, %v10148_v4  ;;  %v1061_v12 = vld [vmem:[#allocation2 + $0x43] sm:$0xff]  ;;  %v1062_v13 = vld [vmem:[#allocation2 + $0x4b] sm:$0xff]  ;;  %v1063_v14 = vld [vmem:[#allocation2 + $0x53] sm:$0x1] }
  0x38   : > { %v1235_v17 = vld [vmem:[#allocation2 + $0x4] sm:$0xff]  ;;  %v1236_v19 = vld [vmem:[#allocation2 + $0xc] sm:$0xff]  ;;  %v1238_v31 = vld [vmem:[#allocation2 + $0x1c] sm:$0xff] }
  0x39   : > { %v7228_v21 = vld [vmem:[%s12697_s1 + $0x88] sm:$0x3f]  ;;  %v1245_v47 = vld [vmem:[#allocation2 + $0x54] sm:$0x1]  ;;  %v1609_v15 = vld [vmem:[#allocation2 + $0x56] sm:$0x1] }
  0x3a   : > { %8233 = vmatmul.mubr.msk.f32.gmra.mrb[8].mxu0 %vm503_vm0, %v10378_v24  ;;  %v1239_v32 = vld [vmem:[#allocation2 + $0x24] sm:$0xff] }
  0x3b   : > { %8235 = vmatprep.mubr.msk.f32.mxu0 %vm10147_vm1, %v10148_v4  ;;  %v1243_v45 = vld [vmem:[#allocation2 + $0x44] sm:$0xff] }
  0x3c   : > { %v7271_v16 = vld [vmem:[%s12697_s1 + $0xc0] sm:$0xff] }
  0x3e   : > { %8236 = vmatmul.mubr.msk.f32.gmra.mrb[10].mxu0 %vm503_vm0, %v10384_v25 }
  0x3f   : > { %8238 = vmatprep.mubr.msk.f32.mxu0 %vm10147_vm1, %v10148_v4 }
  0x42   : > { %8239 = vmatmul.mubr.msk.f32.gmra.mrb[12].mxu0 %vm503_vm0, %v10390_v26 }
  0x43   : > { %8241 = vmatprep.mubr.msk.f32.mxu0 %vm10147_vm1, %v10148_v4 }
  0x46   : > { %8242 = vmatmul.mubr.msk.f32.gmra.mrb[14].mxu0 %vm503_vm0, %v10396_v27 }
  0x47   : > { %8244 = vmatprep.mubr.msk.f32.mxu0 %vm10147_vm1, %v10148_v4 }
  0x4a   : > { %8245 = vmatmul.mubr.msk.f32.gmra.mrb[16].mxu0 %vm503_vm0, %v10402_v28 }
  0x4b   : > { %8247 = vmatprep.mubr.msk.f32.mxu0 %vm10147_vm1, %v10148_v4 }
  0x4e   : > { %8248 = vmatmul.mubr.msk.f32.gmra.mrb[18].mxu0 %vm503_vm0, %v10408_v29 }
  0x4f   : > { %8250 = vmatprep.mubr.msk.f32.mxu0 %vm10147_vm1, %v10148_v4 }
  0x52   : > { %8251 = vmatmul.mubr.msk.f32.gmra.mrb[20].mxu0 %vm503_vm0, %v553_v30  ;;  %v1237_v30 = vld [vmem:[#allocation2 + $0x14] sm:$0xff] }
  0x53   : > { %8259 = vmatprep.mubr.msk.f32.mxu0 %vm10147_vm1, %v10148_v4 }
  0x56   : > { %8260 = vmatmul.mubr.msk.f32.vlgmr.msra.gmra.mrb[0].mxu0 %vm503_vm0, %v529_v33  ;;  %v1240_v33 = vld [vmem:[#allocation2 + $0x2c] sm:$0xff] }
  0x57   : > { %8262 = vmatprep.mubr.msk.f32.mxu0 %vm10147_vm1, %v10148_v4  ;;  %9075 = vmatpush3.bf16.msra.mxu0 %v9074_v34  ;;  %v1241_v34 = vld [vmem:[#allocation2 + $0x34] sm:$0xff] }
  0x58   : > { %8296 = vmatprep.subr.mxu0 %v10148_v4 }
  0x5a   : > { %8263 = vmatmul.mubr.msk.f32.gmra.mrb[2].mxu0 %vm503_vm0, %v10426_v35 }
  0x5b   : > { %8265 = vmatprep.mubr.msk.f32.mxu0 %vm10147_vm1, %v10148_v4  ;;  %8297 = vmatpush3.msk.msra.mxu0 %vm591_vm2, %v7183_v36  ;;  %v1242_v36 = vld [vmem:[#allocation2 + $0x3c] sm:$0xff] }
  0x5c   : > { %9076 = vmatprep.subr.bf16.mxu0 %v10146_v2 }
  0x5e   : > { %8266 = vmatmul.mubr.msk.f32.gmra.mrb[4].mxu0 %vm503_vm0, %v10436_v37 }
  0x5f   : > { %8268 = vmatprep.mubr.msk.f32.mxu0 %vm10147_vm1, %v10148_v4 }
  0x62   : > { %8269 = vmatmul.mubr.msk.f32.gmra.mrb[6].mxu0 %vm503_vm0, %v10444_v38 }
  0x63   : > { %8271 = vmatprep.mubr.msk.f32.mxu0 %vm10147_vm1, %v10148_v4 }
  0x66   : > { %8272 = vmatmul.mubr.msk.f32.gmra.mrb[8].mxu0 %vm503_vm0, %v10450_v39 }
  0x67   : > { %8274 = vmatprep.mubr.msk.f32.mxu0 %vm10147_vm1, %v10148_v4 }
  0x6a   : > { %8275 = vmatmul.mubr.msk.f32.gmra.mrb[10].mxu0 %vm503_vm0, %v10456_v40 }
  0x6b   : > { %8277 = vmatprep.mubr.msk.f32.mxu0 %vm10147_vm1, %v10148_v4 }
  0x6e   : > { %8278 = vmatmul.mubr.msk.f32.gmra.mrb[12].mxu0 %vm503_vm0, %v10462_v41 }
  0x6f   : > { %8280 = vmatprep.mubr.msk.f32.mxu0 %vm10147_vm1, %v10148_v4 }
  0x72   : > { %8281 = vmatmul.mubr.msk.f32.gmra.mrb[14].mxu0 %vm503_vm0, %v10468_v42 }
  0x73   : > { %8283 = vmatprep.mubr.msk.f32.mxu0 %vm10147_vm1, %v10148_v4 }
  0x76   : > { %8284 = vmatmul.mubr.msk.f32.gmra.mrb[16].mxu0 %vm503_vm0, %v10474_v43 }
  0x77   : > { %8286 = vmatprep.mubr.msk.f32.mxu0 %vm10147_vm1, %v10148_v4 }
  0x7a   : > { %8287 = vmatmul.mubr.msk.f32.gmra.mrb[18].mxu0 %vm503_vm0, %v10480_v44 }
  0x7b   : > { %8289 = vmatprep.mubr.msk.f32.mxu0 %vm10147_vm1, %v10148_v4 }
  0x7e   : > { %8290 = vmatmul.mubr.msk.f32.gmra.mrb[20].mxu0 %vm503_vm0, %v539_v46  ;;  %v1244_v46 = vld [vmem:[#allocation2 + $0x4c] sm:$0xff] }
  0x7f   : > { %8298 = vmatprep.mubr.msk.f32.mxu0 %vm10147_vm1, %v10148_v4 }
  0x82   : > { %8299 = vmatmul.mubr.msk.f32.vlgmr.msra.gmra.mrb[0].mxu0 %vm503_vm0, %v871_v49  ;;  %v7242_v49 = vld [vmem:[%s12697_s1 + $0x98] sm:$0xff] }
  0x83   : > { %8301 = vmatprep.mubr.msk.f32.mxu0 %vm10147_vm1, %v10148_v4  ;;  %9078 = vmatpush3.bf16.msra.mxu0 %v9077_v50  ;;  %v1417_v50 = vld [vmem:[#allocation2 + $0x5] sm:$0xff] }
  0x84   : > { %8335 = vmatprep.subr.mxu0 %v10148_v4 }
  0x86   : > { %8302 = vmatmul.mubr.msk.f32.gmra.mrb[2].mxu0 %vm503_vm0, %v872_v51  ;;  %v9086_v51 = vpack.c.bf16 %v7242_v49, %v7241_v48  ;;  %v1791_v48 = vld [vmem:[#allocation2 + $0x57] sm:$0x1]  ;;  %v7286_v49 = vld [vmem:[%s12697_s1 + $0xd8] sm:$0xff] }
  0x87   : > { %8304 = vmatprep.mubr.msk.f32.mxu0 %vm10147_vm1, %v10148_v4  ;;  %8336 = vmatpush3.msk.msra.mxu0 %vm591_vm2, %v7198_v52  ;;  %v1418_v52 = vld [vmem:[#allocation2 + $0xd] sm:$0xff] }
  0x88   : > { %9079 = vmatprep.subr.bf16.mxu0 %v10146_v2 }
  0x8a   : > { %8305 = vmatmul.mubr.msk.f32.gmra.mrb[4].mxu0 %vm503_vm0, %v873_v53  ;;  %v7243_v53 = vld [vmem:[%s12697_s1 + $0xa0] sm:$0x3f] }
  0x8b   : > { %8307 = vmatprep.mubr.msk.f32.mxu0 %vm10147_vm1, %v10148_v4 }
  0x8e   : > { %8308 = vmatmul.mubr.msk.f32.gmra.mrb[6].mxu0 %vm503_vm0, %v874_v54  ;;  %v1419_v54 = vld [vmem:[#allocation2 + $0x15] sm:$0xff] }
  0x8f   : > { %8310 = vmatprep.mubr.msk.f32.mxu0 %vm10147_vm1, %v10148_v4 }
  0x92   : > { %8311 = vmatmul.mubr.msk.f32.gmra.mrb[8].mxu0 %vm503_vm0, %v875_v55  ;;  %v1420_v55 = vld [vmem:[#allocation2 + $0x1d] sm:$0xff] }
  0x93   : > { %8313 = vmatprep.mubr.msk.f32.mxu0 %vm10147_vm1, %v10148_v4 }
  0x96   : > { %8314 = vmatmul.mubr.msk.f32.gmra.mrb[10].mxu0 %vm503_vm0, %v876_v56  ;;  %v1421_v56 = vld [vmem:[#allocation2 + $0x25] sm:$0xff] }
  0x97   : > { %8316 = vmatprep.mubr.msk.f32.mxu0 %vm10147_vm1, %v10148_v4 }
  0x9a   : > { %8317 = vmatmul.mubr.msk.f32.gmra.mrb[12].mxu0 %vm503_vm0, %v877_v57  ;;  %v1422_v57 = vld [vmem:[#allocation2 + $0x2d] sm:$0xff] }
  0x9b   : > { %8319 = vmatprep.mubr.msk.f32.mxu0 %vm10147_vm1, %v10148_v4 }
  0x9e   : > { %8320 = vmatmul.mubr.msk.f32.gmra.mrb[14].mxu0 %vm503_vm0, %v878_v58  ;;  %v1423_v58 = vld [vmem:[#allocation2 + $0x35] sm:$0xff] }
  0x9f   : > { %8322 = vmatprep.mubr.msk.f32.mxu0 %vm10147_vm1, %v10148_v4 }
  0xa2   : > { %8323 = vmatmul.mubr.msk.f32.gmra.mrb[16].mxu0 %vm503_vm0, %v879_v59  ;;  %v1424_v59 = vld [vmem:[#allocation2 + $0x3d] sm:$0xff] }
  0xa3   : > { %8325 = vmatprep.mubr.msk.f32.mxu0 %vm10147_vm1, %v10148_v4 }
  0xa6   : > { %8326 = vmatmul.mubr.msk.f32.gmra.mrb[18].mxu0 %vm503_vm0, %v880_v60  ;;  %v1425_v60 = vld [vmem:[#allocation2 + $0x45] sm:$0xff] }
  0xa7   : > { %8328 = vmatprep.mubr.msk.f32.mxu0 %vm10147_vm1, %v10148_v4 }
  0xaa   : > { %8329 = vmatmul.mubr.msk.f32.gmra.mrb[20].mxu0 %vm503_vm0, %v881_v61  ;;  %v1426_v61 = vld [vmem:[#allocation2 + $0x4d] sm:$0xff] }
  0xab   : > { %8337 = vmatprep.mubr.msk.f32.mxu0 %vm10147_vm1, %v10148_v4 }
  0xae   : > { %8338 = vmatmul.mubr.msk.f32.vlgmr.msra.gmra.mrb[0].mxu0 %vm503_vm0, %v1053_v0  ;;  %v7257_v0 = vld [vmem:[%s12697_s1 + $0xb0] sm:$0xff] }
  0xaf   : > { %8340 = vmatprep.mubr.msk.f32.mxu0 %vm10147_vm1, %v10148_v4  ;;  %9081 = vmatpush3.bf16.msra.mxu0 %v9080_v1  ;;  %v1599_v1 = vld [vmem:[#allocation2 + $0x6] sm:$0xff] }
  0xb0   : > { %8374 = vmatprep.subr.mxu0 %v10148_v4 }
  0xb2   : > { %8341 = vmatmul.mubr.msk.f32.gmra.mrb[2].mxu0 %vm503_vm0, %v1054_v3  ;;  %v9089_v3 = vpack.c.bf16 %v7257_v0, %v7256_v63 }
  0xb3   : > { %8343 = vmatprep.mubr.msk.f32.mxu0 %vm10147_vm1, %v10148_v4  ;;  %8375 = vmatpush3.msk.msra.mxu0 %vm591_vm2, %v7213_v5  ;;  %v1600_v5 = vld [vmem:[#allocation2 + $0xe] sm:$0xff] }
  0xb4   : > { %9082 = vmatprep.subr.bf16.mxu0 %v10146_v2 }
  0xb6   : > { %8344 = vmatmul.mubr.msk.f32.gmra.mrb[4].mxu0 %vm503_vm0, %v1055_v6  ;;  %v7258_v6 = vld [vmem:[%s12697_s1 + $0xb8] sm:$0x3f] }
  0xb7   : > { %8346 = vmatprep.mubr.msk.f32.mxu0 %vm10147_vm1, %v10148_v4 }
  0xba   : > { %8347 = vmatmul.mubr.msk.f32.gmra.mrb[6].mxu0 %vm503_vm0, %v1056_v7  ;;  %v1601_v7 = vld [vmem:[#allocation2 + $0x16] sm:$0xff] }
  0xbb   : > { %8349 = vmatprep.mubr.msk.f32.mxu0 %vm10147_vm1, %v10148_v4 }
  0xbe   : > { %8350 = vmatmul.mubr.msk.f32.gmra.mrb[8].mxu0 %vm503_vm0, %v1057_v8  ;;  %v1602_v8 = vld [vmem:[#allocation2 + $0x1e] sm:$0xff] }
  0xbf   : > { %8352 = vmatprep.mubr.msk.f32.mxu0 %vm10147_vm1, %v10148_v4 }
  0xc2   : > { %8353 = vmatmul.mubr.msk.f32.gmra.mrb[10].mxu0 %vm503_vm0, %v1058_v9  ;;  %v1603_v9 = vld [vmem:[#allocation2 + $0x26] sm:$0xff] }
  0xc3   : > { %8355 = vmatprep.mubr.msk.f32.mxu0 %vm10147_vm1, %v10148_v4 }
  0xc6   : > { %8356 = vmatmul.mubr.msk.f32.gmra.mrb[12].mxu0 %vm503_vm0, %v1059_v10  ;;  %v1604_v10 = vld [vmem:[#allocation2 + $0x2e] sm:$0xff] }
  0xc7   : > { %8358 = vmatprep.mubr.msk.f32.mxu0 %vm10147_vm1, %v10148_v4 }
  0xca   : > { %8359 = vmatmul.mubr.msk.f32.gmra.mrb[14].mxu0 %vm503_vm0, %v1060_v11  ;;  %v1605_v11 = vld [vmem:[#allocation2 + $0x36] sm:$0xff] }
  0xcb   : > { %8361 = vmatprep.mubr.msk.f32.mxu0 %vm10147_vm1, %v10148_v4 }
  0xce   : > { %8362 = vmatmul.mubr.msk.f32.gmra.mrb[16].mxu0 %vm503_vm0, %v1061_v12  ;;  %v1606_v12 = vld [vmem:[#allocation2 + $0x3e] sm:$0xff] }
  0xcf   : > { %8364 = vmatprep.mubr.msk.f32.mxu0 %vm10147_vm1, %v10148_v4 }
  0xd2   : > { %8365 = vmatmul.mubr.msk.f32.gmra.mrb[18].mxu0 %vm503_vm0, %v1062_v13  ;;  %v1607_v13 = vld [vmem:[#allocation2 + $0x46] sm:$0xff] }
  0xd3   : > { %8367 = vmatprep.mubr.msk.f32.mxu0 %vm10147_vm1, %v10148_v4 }
  0xd6   : > { %8368 = vmatmul.mubr.msk.f32.gmra.mrb[20].mxu0 %vm503_vm0, %v1063_v14  ;;  %v1608_v14 = vld [vmem:[#allocation2 + $0x4e] sm:$0xff] }
  0xd7   : > { %8376 = vmatprep.mubr.msk.f32.mxu0 %vm10147_vm1, %v10148_v4 }
  0xda   : > { %8377 = vmatmul.mubr.msk.f32.vlgmr.msra.gmra.mrb[0].mxu0 %vm503_vm0, %v1235_v17  ;;  %v7272_v17 = vld [vmem:[%s12697_s1 + $0xc8] sm:$0xff] }
  0xdb   : > { %8379 = vmatprep.mubr.msk.f32.mxu0 %vm10147_vm1, %v10148_v4  ;;  %9084 = vmatpush3.bf16.msra.mxu0 %v9083_v18  ;;  %v1781_v18 = vld [vmem:[#allocation2 + $0x7] sm:$0xff] }
  0xdc   : > { %8413 = vmatprep.subr.mxu0 %v10148_v4 }
  0xde   : > { %8380 = vmatmul.mubr.msk.f32.gmra.mrb[2].mxu0 %vm503_vm0, %v1236_v19  ;;  %v9092_v19 = vpack.c.bf16 %v7272_v17, %v7271_v16 }
  0xdf   : > { %8382 = vmatprep.mubr.msk.f32.mxu0 %vm10147_vm1, %v10148_v4  ;;  %8414 = vmatpush3.msk.msra.mxu0 %vm591_vm2, %v7228_v21  ;;  %v1782_v21 = vld [vmem:[#allocation2 + $0xf] sm:$0xff] }
  0xe0   : > { %9085 = vmatprep.subr.bf16.mxu0 %v10146_v2 }
  0xe2   : > { %8383 = vmatmul.mubr.msk.f32.gmra.mrb[4].mxu0 %vm503_vm0, %v1237_v30  ;;  %v7273_v30 = vld [vmem:[%s12697_s1 + $0xd0] sm:$0x3f] }
  0xe3   : > { %8385 = vmatprep.mubr.msk.f32.mxu0 %vm10147_vm1, %v10148_v4 }
  0xe6   : > { %8386 = vmatmul.mubr.msk.f32.gmra.mrb[6].mxu0 %vm503_vm0, %v1238_v31  ;;  %v1783_v31 = vld [vmem:[#allocation2 + $0x17] sm:$0xff] }
  0xe7   : > { %8388 = vmatprep.mubr.msk.f32.mxu0 %vm10147_vm1, %v10148_v4 }
  0xea   : > { %8389 = vmatmul.mubr.msk.f32.gmra.mrb[8].mxu0 %vm503_vm0, %v1239_v32  ;;  %v1784_v32 = vld [vmem:[#allocation2 + $0x1f] sm:$0xff] }
  0xeb   : > { %8391 = vmatprep.mubr.msk.f32.mxu0 %vm10147_vm1, %v10148_v4 }
  0xee   : > { %8392 = vmatmul.mubr.msk.f32.gmra.mrb[10].mxu0 %vm503_vm0, %v1240_v33  ;;  %v1785_v33 = vld [vmem:[#allocation2 + $0x27] sm:$0xff] }
  0xef   : > { %8394 = vmatprep.mubr.msk.f32.mxu0 %vm10147_vm1, %v10148_v4 }
  0xf2   : > { %8395 = vmatmul.mubr.msk.f32.gmra.mrb[12].mxu0 %vm503_vm0, %v1241_v34  ;;  %v1786_v34 = vld [vmem:[#allocation2 + $0x2f] sm:$0xff] }
  0xf3   : > { %8397 = vmatprep.mubr.msk.f32.mxu0 %vm10147_vm1, %v10148_v4 }
  0xf6   : > { %8398 = vmatmul.mubr.msk.f32.gmra.mrb[14].mxu0 %vm503_vm0, %v1242_v36  ;;  %v1787_v36 = vld [vmem:[#allocation2 + $0x37] sm:$0xff] }
  0xf7   : > { %8400 = vmatprep.mubr.msk.f32.mxu0 %vm10147_vm1, %v10148_v4 }
  0xfa   : > { %8401 = vmatmul.mubr.msk.f32.gmra.mrb[16].mxu0 %vm503_vm0, %v1243_v45  ;;  %v1788_v45 = vld [vmem:[#allocation2 + $0x3f] sm:$0xff] }
  0xfb   : > { %8403 = vmatprep.mubr.msk.f32.mxu0 %vm10147_vm1, %v10148_v4 }
  0xfe   : > { %8404 = vmatmul.mubr.msk.f32.gmra.mrb[18].mxu0 %vm503_vm0, %v1244_v46  ;;  %v1789_v46 = vld [vmem:[#allocation2 + $0x47] sm:$0xff] }
  0xff   : > { %8406 = vmatprep.mubr.msk.f32.mxu0 %vm10147_vm1, %v10148_v4 }
 0x102   : > { %8407 = vmatmul.mubr.msk.f32.gmra.mrb[20].mxu0 %vm503_vm0, %v1245_v47  ;;  %v1790_v47 = vld [vmem:[#allocation2 + $0x4f] sm:$0xff] }
 0x103   : > { %8415 = vmatprep.mubr.msk.f32.mxu0 %vm10147_vm1, %v10148_v4 }
 0x106   : > { %8416 = vmatmul.mubr.msk.f32.vlgmr.msra.gmra.mrb[0].mxu0 %vm503_vm0, %v1417_v50  ;;  %v7287_v50 = vld [vmem:[%s12697_s1 + $0xe0] sm:$0xff] }
 0x107   : > { %8418 = vmatprep.mubr.msk.f32.mxu0 %vm10147_vm1, %v10148_v4  ;;  %9087 = vmatpush3.bf16.msra.mxu0 %v9086_v51  ;;  %v9095_v51 = vpack.c.bf16 %v7287_v50, %v7286_v49 }
 0x108   : > { %8452 = vmatprep.subr.mxu0 %v10148_v4 }
 0x10a   : > { %8419 = vmatmul.mubr.msk.f32.gmra.mrb[2].mxu0 %vm503_vm0, %v1418_v52  ;;  %v7288_v52 = vld [vmem:[%s12697_s1 + $0xe8] sm:$0x3f]  ;;  %s486_s1 = scalar_lea.vmem [#allocation6], %s485_s17 }
 0x10b   : > { %8421 = vmatprep.mubr.msk.f32.mxu0 %vm10147_vm1, %v10148_v4  ;;  %8453 = vmatpush3.msk.msra.mxu0 %vm591_vm2, %v7243_v53 }
 0x10c   : > { %9088 = vmatprep.subr.bf16.mxu0 %v10146_v2 }
 0x10e   : > { %8422 = vmatmul.mubr.msk.f32.gmra.mrb[4].mxu0 %vm503_vm0, %v1419_v54 }
 0x10f   : > { %8424 = vmatprep.mubr.msk.f32.mxu0 %vm10147_vm1, %v10148_v4 }
 0x112   : > { %8425 = vmatmul.mubr.msk.f32.gmra.mrb[6].mxu0 %vm503_vm0, %v1420_v55 }
 0x113   : > { %8427 = vmatprep.mubr.msk.f32.mxu0 %vm10147_vm1, %v10148_v4 }
 0x116   : > { %8428 = vmatmul.mubr.msk.f32.gmra.mrb[8].mxu0 %vm503_vm0, %v1421_v56 }
 0x117   : > { %8430 = vmatprep.mubr.msk.f32.mxu0 %vm10147_vm1, %v10148_v4 }
 0x11a   : > { %8431 = vmatmul.mubr.msk.f32.gmra.mrb[10].mxu0 %vm503_vm0, %v1422_v57 }
 0x11b   : > { %8433 = vmatprep.mubr.msk.f32.mxu0 %vm10147_vm1, %v10148_v4 }
 0x11e   : > { %8434 = vmatmul.mubr.msk.f32.gmra.mrb[12].mxu0 %vm503_vm0, %v1423_v58 }
 0x11f   : > { %8436 = vmatprep.mubr.msk.f32.mxu0 %vm10147_vm1, %v10148_v4 }
 0x122   : > { %8437 = vmatmul.mubr.msk.f32.gmra.mrb[14].mxu0 %vm503_vm0, %v1424_v59 }
 0x123   : > { %8439 = vmatprep.mubr.msk.f32.mxu0 %vm10147_vm1, %v10148_v4 }
 0x126   : > { %8440 = vmatmul.mubr.msk.f32.gmra.mrb[16].mxu0 %vm503_vm0, %v1425_v60 }
 0x127   : > { %8442 = vmatprep.mubr.msk.f32.mxu0 %vm10147_vm1, %v10148_v4 }
 0x12a   : > { %8443 = vmatmul.mubr.msk.f32.gmra.mrb[18].mxu0 %vm503_vm0, %v1426_v61 }
 0x12b   : > { %8445 = vmatprep.mubr.msk.f32.mxu0 %vm10147_vm1, %v10148_v4 }
 0x12e   : > { %8446 = vmatmul.mubr.msk.f32.gmra.mrb[20].mxu0 %vm503_vm0, %v1427_v62 }
 0x12f   : > { %8454 = vmatprep.mubr.msk.f32.mxu0 %vm10147_vm1, %v10148_v4 }
 0x132   : > { %8455 = vmatmul.mubr.msk.f32.vlgmr.msra.gmra.mrb[0].mxu0 %vm503_vm0, %v1599_v1 }
 0x133   : > { %8457 = vmatprep.mubr.msk.f32.mxu0 %vm10147_vm1, %v10148_v4  ;;  %9090 = vmatpush3.bf16.msra.mxu0 %v9089_v3 }
 0x134   : > { %8491 = vmatprep.subr.mxu0 %v10148_v4 }
 0x136   : > { %8458 = vmatmul.mubr.msk.f32.gmra.mrb[2].mxu0 %vm503_vm0, %v1600_v5 }
 0x137   : > { %8460 = vmatprep.mubr.msk.f32.mxu0 %vm10147_vm1, %v10148_v4  ;;  %8492 = vmatpush3.msk.msra.mxu0 %vm591_vm2, %v7258_v6 }
 0x138   : > { %9091 = vmatprep.subr.bf16.mxu0 %v10146_v2 }
 0x13a   : > { %8461 = vmatmul.mubr.msk.f32.gmra.mrb[4].mxu0 %vm503_vm0, %v1601_v7 }
 0x13b   : > { %8463 = vmatprep.mubr.msk.f32.mxu0 %vm10147_vm1, %v10148_v4 }
 0x13e   : > { %8464 = vmatmul.mubr.msk.f32.gmra.mrb[6].mxu0 %vm503_vm0, %v1602_v8 }
 0x13f   : > { %8466 = vmatprep.mubr.msk.f32.mxu0 %vm10147_vm1, %v10148_v4 }
 0x142   : > { %8467 = vmatmul.mubr.msk.f32.gmra.mrb[8].mxu0 %vm503_vm0, %v1603_v9 }
 0x143   : > { %8469 = vmatprep.mubr.msk.f32.mxu0 %vm10147_vm1, %v10148_v4 }
 0x146   : > { %8470 = vmatmul.mubr.msk.f32.gmra.mrb[10].mxu0 %vm503_vm0, %v1604_v10 }
 0x147   : > { %8472 = vmatprep.mubr.msk.f32.mxu0 %vm10147_vm1, %v10148_v4 }
 0x14a   : > { %8473 = vmatmul.mubr.msk.f32.gmra.mrb[12].mxu0 %vm503_vm0, %v1605_v11 }
 0x14b   : > { %8475 = vmatprep.mubr.msk.f32.mxu0 %vm10147_vm1, %v10148_v4 }
 0x14e   : > { %8476 = vmatmul.mubr.msk.f32.gmra.mrb[14].mxu0 %vm503_vm0, %v1606_v12 }
 0x14f   : > { %8478 = vmatprep.mubr.msk.f32.mxu0 %vm10147_vm1, %v10148_v4 }
 0x152   : > { %8479 = vmatmul.mubr.msk.f32.gmra.mrb[16].mxu0 %vm503_vm0, %v1607_v13 }
 0x153   : > { %8481 = vmatprep.mubr.msk.f32.mxu0 %vm10147_vm1, %v10148_v4 }
 0x156   : > { %8482 = vmatmul.mubr.msk.f32.gmra.mrb[18].mxu0 %vm503_vm0, %v1608_v14 }
 0x157   : > { %8484 = vmatprep.mubr.msk.f32.mxu0 %vm10147_vm1, %v10148_v4 }
 0x15a   : > { %8485 = vmatmul.mubr.msk.f32.gmra.mrb[20].mxu0 %vm503_vm0, %v1609_v15 }
 0x15b   : > { %8493 = vmatprep.mubr.msk.f32.mxu0 %vm10147_vm1, %v10148_v4 }
 0x15e   : > { %8494 = vmatmul.mubr.msk.f32.vlgmr.msra.gmra.mrb[0].mxu0 %vm503_vm0, %v1781_v18 }
 0x15f   : > { %8496 = vmatprep.mubr.msk.f32.mxu0 %vm10147_vm1, %v10148_v4  ;;  %9093 = vmatpush3.bf16.msra.mxu0 %v9092_v19 }
 0x160   : > { %8530 = vmatprep.subr.mxu0 %v10148_v4 }
 0x162   : > { %8497 = vmatmul.mubr.msk.f32.gmra.mrb[2].mxu0 %vm503_vm0, %v1782_v21 }
 0x163   : > { %8499 = vmatprep.mubr.msk.f32.mxu0 %vm10147_vm1, %v10148_v4  ;;  %8531 = vmatpush3.msk.msra.mxu0 %vm591_vm2, %v7273_v30 }
 0x164   : > { %9094 = vmatprep.subr.bf16.mxu0 %v10146_v2 }
 0x166   : > { %8500 = vmatmul.mubr.msk.f32.gmra.mrb[4].mxu0 %vm503_vm0, %v1783_v31 }
 0x167   : > { %8502 = vmatprep.mubr.msk.f32.mxu0 %vm10147_vm1, %v10148_v4 }
 0x16a   : > { %8503 = vmatmul.mubr.msk.f32.gmra.mrb[6].mxu0 %vm503_vm0, %v1784_v32 }
 0x16b   : > { %8505 = vmatprep.mubr.msk.f32.mxu0 %vm10147_vm1, %v10148_v4 }
 0x16e   : > { %8506 = vmatmul.mubr.msk.f32.gmra.mrb[8].mxu0 %vm503_vm0, %v1785_v33 }
 0x16f   : > { %8508 = vmatprep.mubr.msk.f32.mxu0 %vm10147_vm1, %v10148_v4 }
 0x172   : > { %8509 = vmatmul.mubr.msk.f32.gmra.mrb[10].mxu0 %vm503_vm0, %v1786_v34 }
 0x173   : > { %8511 = vmatprep.mubr.msk.f32.mxu0 %vm10147_vm1, %v10148_v4 }
 0x176   : > { %8512 = vmatmul.mubr.msk.f32.gmra.mrb[12].mxu0 %vm503_vm0, %v1787_v36 }
 0x177   : > { %8514 = vmatprep.mubr.msk.f32.mxu0 %vm10147_vm1, %v10148_v4 }
 0x17a   : > { %8515 = vmatmul.mubr.msk.f32.gmra.mrb[14].mxu0 %vm503_vm0, %v1788_v45 }
 0x17b   : > { %8517 = vmatprep.mubr.msk.f32.mxu0 %vm10147_vm1, %v10148_v4 }
 0x17e   : > { %8518 = vmatmul.mubr.msk.f32.gmra.mrb[16].mxu0 %vm503_vm0, %v1789_v46 }
 0x17f   : > { %8520 = vmatprep.mubr.msk.f32.mxu0 %vm10147_vm1, %v10148_v4 }
 0x182   : > { %8521 = vmatmul.mubr.msk.f32.gmra.mrb[18].mxu0 %vm503_vm0, %v1790_v47 }
 0x183   : > { %8523 = vmatprep.mubr.msk.f32.mxu0 %vm10147_vm1, %v10148_v4 }
 0x186   : > { %8524 = vmatmul.mubr.msk.f32.gmra.mrb[20].mxu0 %vm503_vm0, %v1791_v48 }
 0x187   : > { %8532 = vmatprep.mubr.msk.f32.mxu0 %vm10147_vm1, %v10148_v4 }
 0x18a   : > { %8533 = vmatmul.mubr.msk.f32.vlgmr.msra.gmra.mrb[0].mxu0 %vm503_vm0, %v10426_v35  ;;  %v1972_v35 = vld [vmem:[#allocation2 + $0x50] sm:$0xff] }
 0x18b   : > { %8535 = vmatprep.mubr.msk.f32.mxu0 %vm10147_vm1, %v10148_v4  ;;  %9096 = vmatpush3.bf16.msra.mxu0 %v9095_v51 }
 0x18c   : > { %8569 = vmatprep.subr.mxu0 %v10148_v4 }
 0x18e   : > { %8536 = vmatmul.mubr.msk.f32.gmra.mrb[2].mxu0 %vm503_vm0, %v10436_v37  ;;  %v1973_v37 = vld [vmem:[#allocation2 + $0x58] sm:$0x1] }
 0x18f   : > { %8538 = vmatprep.mubr.msk.f32.mxu0 %vm10147_vm1, %v10148_v4  ;;  %8570 = vmatpush3.msk.msra.mxu0 %vm591_vm2, %v7288_v52  ;;  %v7335_v52 = vld [vmem:[%s12699_s3 + $0x20] sm:$0xff] }
 0x192   : > { %8539 = vmatmul.mubr.msk.f32.gmra.mrb[4].mxu0 %vm503_vm0, %v10444_v38 }
 0x193   : > { %8541 = vmatprep.mubr.msk.f32.mxu0 %vm10147_vm1, %v10148_v4 }
 0x196   : > { %8542 = vmatmul.mubr.msk.f32.gmra.mrb[6].mxu0 %vm503_vm0, %v10450_v39 }
 0x197   : > { %8544 = vmatprep.mubr.msk.f32.mxu0 %vm10147_vm1, %v10148_v4 }
 0x19a   : > { %8545 = vmatmul.mubr.msk.f32.gmra.mrb[8].mxu0 %vm503_vm0, %v10456_v40 }
 0x19b   : > { %8547 = vmatprep.mubr.msk.f32.mxu0 %vm10147_vm1, %v10148_v4 }
 0x19e   : > { %8548 = vmatmul.mubr.msk.f32.gmra.mrb[10].mxu0 %vm503_vm0, %v10462_v41 }
 0x19f   : > { %8550 = vmatprep.mubr.msk.f32.mxu0 %vm10147_vm1, %v10148_v4 }
 0x1a2   : > { %8551 = vmatmul.mubr.msk.f32.gmra.mrb[12].mxu0 %vm503_vm0, %v10468_v42 }
 0x1a3   : > { %8553 = vmatprep.mubr.msk.f32.mxu0 %vm10147_vm1, %v10148_v4 }
 0x1a6   : > { %8554 = vmatmul.mubr.msk.f32.gmra.mrb[14].mxu0 %vm503_vm0, %v10474_v43 }
 0x1a7   : > { %8556 = vmatprep.mubr.msk.f32.mxu0 %vm10147_vm1, %v10148_v4 }
 0x1aa   : > { %8557 = vmatmul.mubr.msk.f32.gmra.mrb[16].mxu0 %vm503_vm0, %v10480_v44 }
 0x1ab   : > { %8559 = vmatprep.mubr.msk.f32.mxu0 %vm10147_vm1, %v10148_v4 }
 0x1ae   : > { %8560 = vmatmul.mubr.msk.f32.gmra.mrb[18].mxu0 %vm503_vm0, %v1972_v35  ;;  %v7336_v35 = vld [vmem:[%s12699_s3 + $0x28] sm:$0xff] }
 0x1af   : > { %8562 = vmatprep.mubr.msk.f32.mxu0 %vm10147_vm1, %v10148_v4 }
 0x1b2   : > { %8563 = vmatmul.mubr.msk.f32.gmra.mrb[20].mxu0 %vm503_vm0, %v1973_v37  ;;  %v9157_v37 = vpack.c.bf16 %v7336_v35, %v7335_v52 }
 0x1b3   : > { %8571 = vmatprep.mubr.msk.f32.mxu0 %vm10147_vm1, %v10148_v4 }
 0x1b6   : > { %8572 = vmatmul.mubr.msk.f32.vlgmr.msra.gmra.mrb[0].mxu0 %vm503_vm0, %v10354_v20  ;;  %v2154_v20 = vld [vmem:[#allocation2 + $0x51] sm:$0xff] }
 0x1b7   : > { %8574 = vmatprep.mubr.msk.f32.mxu0 %vm10147_vm1, %v10148_v4 }
 0x1ba   : > { %8575 = vmatmul.mubr.msk.f32.gmra.mrb[2].mxu0 %vm503_vm0, %v10364_v22  ;;  %v2155_v22 = vld [vmem:[#allocation2 + $0x59] sm:$0x1] }
 0x1bb   : > { %8577 = vmatprep.mubr.msk.f32.mxu0 %vm10147_vm1, %v10148_v4 }
 0x1be   : > { %8578 = vmatmul.mubr.msk.f32.gmra.mrb[4].mxu0 %vm503_vm0, %v10372_v23  ;;  %v2327_v23 = vlaneseq }
 0x1bf   : > { %8580 = vmatprep.mubr.msk.f32.mxu0 %vm10147_vm1, %v10148_v4 }
 0x1c2   : > { %8581 = vmatmul.mubr.msk.f32.gmra.mrb[6].mxu0 %vm503_vm0, %v10378_v24  ;;  %v10855_v24 = vshrl.u32 %v2327_v23, 7 }
 0x1c3   : > { %8583 = vmatprep.mubr.msk.f32.mxu0 %vm10147_vm1, %v10148_v4 }
 0x1c4   : > { %v2329_v3 = vadd.s32 8, %v10855_v24  ;;  %v2330_v6 = vadd.s32 16, %v10855_v24  ;;  %v2331_v9 = vadd.s32 24, %v10855_v24 }
 0x1c6   : > { %8584 = vmatmul.mubr.msk.f32.gmra.mrb[8].mxu0 %vm503_vm0, %v10384_v25  ;;  %v2332_v25 = vmul.u32 3, %v10855_v24  ;;  %v2333_v8 = vmul.u32 3, %v2329_v3 }
 0x1c7   : > { %8586 = vmatprep.mubr.msk.f32.mxu0 %vm10147_vm1, %v10148_v4  ;;  %v2334_v11 = vmul.u32 3, %v2330_v6  ;;  %v2335_v14 = vmul.u32 3, %v2331_v9 }
 0x1c8   : > { %v2453_v30 = vadd.s32 1, %v2333_v8  ;;  %v2570_v46 = vadd.s32 2, %v2333_v8 }
 0x1c9   : > { %v2454_v31 = vadd.s32 1, %v2334_v11  ;;  %v2455_v32 = vadd.s32 1, %v2335_v14  ;;  %v2571_v47 = vadd.s32 2, %v2334_v11  ;;  %v2572_v48 = vadd.s32 2, %v2335_v14 }
 0x1ca   : > { %8587 = vmatmul.mubr.msk.f32.gmra.mrb[10].mxu0 %vm503_vm0, %v10390_v26  ;;  %v10858_v26 = vand.u32 127, %v2327_v23  ;;  %v7338_v23 = vld [vmem:[%s12699_s3 + $0x38] sm:$0x1] }
 0x1cb   : > { %8589 = vmatprep.mubr.msk.f32.mxu0 %vm10147_vm1, %v10148_v4 }
 0x1cc   : > { %vm2338_vm5 = vcmp.eq.s32.totalorder %v10858_v26, %v2332_v25  ;;  %vm2339_vm10 = vcmp.eq.s32.totalorder %v10858_v26, %v2333_v8  ;;  %vm2340_vm11 = vcmp.eq.s32.totalorder %v10858_v26, %v2334_v11  ;;  %vm2341_vm12 = vcmp.eq.s32.totalorder %v10858_v26, %v2335_v14 }
 0x1cd   : > { %v10894_v17 = vsel %vm2339_vm10, 1.0, %v10148_v4  ;;  %v7303_v18 = vsel %vm2340_vm11, 1.0, %v10148_v4  ;;  %v7304_v19 = vsel %vm2341_vm12, 1.0, %v10148_v4  ;;  %vm2457_vm13 = vcmp.eq.s32.totalorder %v10858_v26, %v2453_v30 }
 0x1ce   : > { %8590 = vmatmul.mubr.msk.f32.gmra.mrb[12].mxu0 %vm503_vm0, %v10396_v27  ;;  %v10862_v27 = vsel %vm2338_vm5, 1.0, %v10148_v4  ;;  %vm2458_vm14 = vcmp.eq.s32.totalorder %v10858_v26, %v2454_v31  ;;  %v10923_v33 = vsel %vm2457_vm13, 1.0, %v10148_v4  ;;  %vm2459_vm15 = vcmp.eq.s32.totalorder %v10858_v26, %v2455_v32  ;;  %v7333_v31 = vld [vmem:[%s12702_s2 + $0x1] ss:$0 sm:$0xff] }
 0x1cf   : > { %8592 = vmatprep.mubr.msk.f32.mxu0 %vm10147_vm1, %v10148_v4  ;;  %8626 = vmatprep.mubr.msk.f32.mxu1 %vm2350_vm6, %v10862_v27  ;;  %v7312_v34 = vsel %vm2458_vm14, 1.0, %v10148_v4  ;;  %v7313_v36 = vsel %vm2459_vm15, 1.0, %v10148_v4  ;;  %vm2575_vm2 = vcmp.eq.s32.totalorder %v10858_v26, %v2571_v47  ;;  %vm2576_vm3 = vcmp.eq.s32.totalorder %v10858_v26, %v2572_v48 }
 0x1d0   : > { %v7321_v50 = vsel %vm2575_vm2, 1.0, %v10148_v4  ;;  %v7322_v51 = vsel %vm2576_vm3, 1.0, %v10148_v4  ;;  %vm10149_vm5 = vmmov 1   ;;  %vm2747_vm12 = vcmask 198656  }
 0x1d1   : > { %vm3870_vm13 = vcmask 220160   ;;  %vm3875_vm14 = vcmask 1042432   ;;  %vm4152_vm2 = vcmask 402432   ;;  %vm4182_vm3 = vcmask 1041408  }
 0x1d2   : > { %8593 = vmatmul.mubr.msk.f32.gmra.mrb[14].mxu0 %vm503_vm0, %v10402_v28  ;;  %v2452_v28 = vadd.s32 1, %v2332_v25  ;;  %vm9262_vm15 = vmpackc.low %vm3875_vm14, %vm10149_vm5  ;;  %4153 = vst.msk [vmem:[#allocation4 + $0x10] sm:$0x3] %vm4152_vm2, %v10148_v4  ;;  %vm6809_vm2 = vcmask 588800  }
 0x1d3   : > { %8595 = vmatprep.mubr.msk.f32.mxu0 %vm10147_vm1, %v10148_v4 }
 0x1d4   : > { %vm2456_vm7 = vcmp.eq.s32.totalorder %v10858_v26, %v2452_v28  ;;  %v2754_v28 = vld [vmem:[%s12699_s3 + $0x8] sm:$0xff] }
 0x1d5   : > { %v10909_v21 = vsel %vm2456_vm7, 1.0, %v10148_v4  ;;  %vm2742_vm7 = vcmask 199680  }
 0x1d6   : > { %8596 = vmatmul.mubr.msk.f32.gmra.mrb[16].mxu0 %vm503_vm0, %v10408_v29  ;;  %v10867_v29 = vadd.s32 2, %v2332_v25  ;;  %2743 = vst.msk [vmem:[#allocation3 + $0x20] sm:$0xf] %vm2742_vm7, %v10148_v4 }
 0x1d7   : > { %8598 = vmatprep.mubr.msk.f32.mxu0 %vm10147_vm1, %v10148_v4 }
 0x1d8   : > { %vm2573_vm8 = vcmp.eq.s32.totalorder %v10858_v26, %v10867_v29 }
 0x1d9   : > { %v10939_v45 = vsel %vm2573_vm8, 1.0, %v10148_v4 }
 0x1da   : > { %8599 = vmatmul.mubr.msk.f32.gmra.mrb[18].mxu0 %vm503_vm0, %v2154_v20  ;;  %v5377_v20 = vld [vmem:[%s12680_s7 + $0x58] sm:$0xff] }
 0x1db   : > { %8601 = vmatprep.mubr.msk.f32.mxu0 %vm10147_vm1, %v10148_v4 }
 0x1de   : > { %8602 = vmatmul.mubr.msk.f32.gmra.mrb[20].mxu0 %vm503_vm0, %v2155_v22  ;;  %vm2574_vm0 = vcmp.eq.s32.totalorder %v10858_v26, %v2570_v46  ;;  %v7337_v22 = vld [vmem:[%s12699_s3 + $0x30] sm:$0xff]  ;;  %v2753_v26 = vld [vmem:[%s12699_s3] sm:$0xff] }
 0x1df   : > { %5494 = vmatprep.mubr.f32.mxu0 %v10148_v4  ;;  %v10953_v49 = vsel %vm2574_vm0, 1.0, %v10148_v4  ;;  %v9161_v25 = vpack.c.bf16 %v7338_v23, %v7337_v22  ;;  %v10999_v29 = vpack.c.bf16 %v2754_v28, %v2753_v26  ;;  %vm4149_vm0 = vcmask 408576  }
 0x1e0   : > { %4151 = vst.msk [vmem:[#allocation4 + $0x8] sm:$0xff] %vm4149_vm0, %v10148_v4  ;;  %4150 = vst.msk [vmem:[#allocation4] sm:$0xff] %vm4149_vm0, %v10148_v4 }
 0x289   : > { %v2262_v38 = vpop.f32.mrb[0].mxu0 }
 0x28a   : > { %v8573_v39 = vpop.f32.mrb[1].mxu0 }
 0x28d   : > { %v2267_v40 = vpop.f32.mrb[2].mxu0 }
 0x28e   : > { %v10871_v41 = vpack.c.bf16 %v2267_v40, %v2262_v38  ;;  %v8576_v42 = vpop.f32.mrb[3].mxu0 }
 0x290   : > { %9098 = vmatprep.subr.bf16.mxu1 %v10871_v41 }
 0x291   : > { %v2272_v43 = vpop.f32.mrb[4].mxu0  ;;  %9100 = vmatpush3.bf16.msra.mxu1 %v10871_v41 }
 0x292   : > { %v8579_v44 = vpop.f32.mrb[5].mxu0 }
 0x295   : > { %v2277_v53 = vpop.f32.mrb[6].mxu0 }
 0x296   : > { %v10875_v54 = vpack.c.bf16 %v2277_v53, %v2272_v43  ;;  %v8582_v55 = vpop.f32.mrb[7].mxu0 }
 0x298   : > { %9102 = vmatprep.subr.bf16.mxu1 %v10875_v54 }
 0x299   : > { %v2282_v56 = vpop.f32.mrb[8].mxu0  ;;  %9104 = vmatpush3.bf16.msra.mxu1 %v10875_v54 }
 0x29a   : > { %v8585_v57 = vpop.f32.mrb[9].mxu0 }
 0x29d   : > { %v2287_v58 = vpop.f32.mrb[10].mxu0 }
 0x29e   : > { %v10879_v59 = vpack.c.bf16 %v2287_v58, %v2282_v56  ;;  %v8588_v60 = vpop.f32.mrb[11].mxu0 }
 0x2a0   : > { %9106 = vmatprep.subr.bf16.mxu1 %v10879_v59 }
 0x2a1   : > { %v2292_v61 = vpop.f32.mrb[12].mxu0  ;;  %9108 = vmatpush3.bf16.msra.mxu1 %v10879_v59 }
 0x2a2   : > { %v8591_v62 = vpop.f32.mrb[13].mxu0 }
 0x2a5   : > { %v2297_v63 = vpop.f32.mrb[14].mxu0 }
 0x2a6   : > { %v10883_v0 = vpack.c.bf16 %v2297_v63, %v2292_v61  ;;  %v8594_v1 = vpop.f32.mrb[15].mxu0 }
 0x2a8   : > { %9110 = vmatprep.subr.bf16.mxu1 %v10883_v0 }
 0x2a9   : > { %v2302_v5 = vpop.f32.mrb[16].mxu0  ;;  %9112 = vmatpush3.bf16.msra.mxu1 %v10883_v0 }
 0x2aa   : > { %v8597_v7 = vpop.f32.mrb[17].mxu0 }
 0x2ad   : > { %v2307_v10 = vpop.f32.mrb[18].mxu0 }
 0x2ae   : > { %v9113_v12 = vpack.c.bf16 %v2307_v10, %v2302_v5  ;;  %v8600_v13 = vpop.f32.mrb[19].mxu0 }
 0x2b0   : > { %9114 = vmatprep.subr.bf16.mxu1 %v9113_v12 }
 0x2b1   : > { %v2312_v15 = vpop.f32.mrb[20].mxu0  ;;  %9116 = vmatpush3.bf16.msra.mxu1 %v9113_v12 }
 0x2b2   : > { %v8603_v16 = vpop.f32.mrb[21].mxu0  ;;  %8624 = vmatprep.subr.msk.mxu1 %vm2363_vm9, %v2312_v15 }
 0x2b5   : > { %8625 = vmatpush3.msk.msra.mxu1 %vm2363_vm9, %v2312_v15 }
 0x2b6   : > { %8627 = vmatmul.mubr.msk.f32.vlgmr.msra.gmra.mrb[0].mxu1 %vm2350_vm6, %v10894_v17  ;;  %9118 = vmatprep.subr.bf16.mxu1 %v10871_v41 }
 0x2b7   : > { %9120 = vmatpush3.bf16.msra.mxu1 %v10871_v41  ;;  %8629 = vmatprep.mubr.msk.f32.mxu1 %vm2350_vm6, %v7303_v18 }
 0x2b8   : > { %9122 = vmatprep.subr.bf16.mxu1 %v10875_v54 }
 0x2ba   : > { %8630 = vmatmul.mubr.msk.f32.gmra.mrb[2].mxu1 %vm2350_vm6, %v7304_v19 }
 0x2bb   : > { %9124 = vmatpush3.bf16.msra.mxu1 %v10875_v54  ;;  %8654 = vmatprep.mubr.msk.f32.mxu1 %vm2350_vm6, %v10909_v21 }
 0x2bc   : > { %9126 = vmatprep.subr.bf16.mxu1 %v10879_v59 }
 0x2bf   : > { %9128 = vmatpush3.bf16.msra.mxu1 %v10879_v59 }
 0x2c0   : > { %9130 = vmatprep.subr.bf16.mxu1 %v10883_v0 }
 0x2c3   : > { %9132 = vmatpush3.bf16.msra.mxu1 %v10883_v0 }
 0x2c4   : > { %9134 = vmatprep.subr.bf16.mxu1 %v9113_v12 }
 0x2c7   : > { %9136 = vmatpush3.bf16.msra.mxu1 %v9113_v12 }
 0x2c8   : > { %8652 = vmatprep.subr.msk.mxu1 %vm2363_vm9, %v2312_v15 }
 0x2cb   : > { %8653 = vmatpush3.msk.msra.mxu1 %vm2363_vm9, %v2312_v15 }
 0x2cc   : > { %8655 = vmatmul.mubr.msk.f32.vlgmr.msra.gmra.mrb[4].mxu1 %vm2350_vm6, %v10923_v33  ;;  %9138 = vmatprep.subr.bf16.mxu1 %v10871_v41 }
 0x2cd   : > { %9140 = vmatpush3.bf16.msra.mxu1 %v10871_v41  ;;  %8657 = vmatprep.mubr.msk.f32.mxu1 %vm2350_vm6, %v7312_v34 }
 0x2ce   : > { %9142 = vmatprep.subr.bf16.mxu1 %v10875_v54 }
 0x2d0   : > { %8658 = vmatmul.mubr.msk.f32.gmra.mrb[6].mxu1 %vm2350_vm6, %v7313_v36  ;;  %v7334_v36 = vld [vmem:[%s12702_s2 + $0x2] ss:$0 sm:$0xff] }
 0x2d1   : > { %9144 = vmatpush3.bf16.msra.mxu1 %v10875_v54  ;;  %8682 = vmatprep.mubr.msk.f32.mxu1 %vm2350_vm6, %v10939_v45 }
 0x2d2   : > { %9146 = vmatprep.subr.bf16.mxu1 %v10879_v59 }
 0x2d5   : > { %9148 = vmatpush3.bf16.msra.mxu1 %v10879_v59  ;;  %v7328_v59 = vld [vmem:[%s12702_s2] ss:$0 sm:$0xff]  ;;  %s7094_s2 = sshll.u32 %s486_s1, 4  ;;  %s12633_s2 = int_to_ptr.vmem [resolvable:$true] %s7094_s2 }
 0x2d6   : > { %9150 = vmatprep.subr.bf16.mxu1 %v10883_v0 }
 0x2d9   : > { %9152 = vmatpush3.bf16.msra.mxu1 %v10883_v0 }
 0x2da   : > { %9154 = vmatprep.subr.bf16.mxu1 %v9113_v12 }
 0x2dd   : > { %9156 = vmatpush3.bf16.msra.mxu1 %v9113_v12 }
 0x2de   : > { %8680 = vmatprep.subr.msk.mxu1 %vm2363_vm9, %v2312_v15 }
 0x2e1   : > { %8681 = vmatpush3.msk.msra.mxu1 %vm2363_vm9, %v2312_v15 }
 0x2e2   : > { %8683 = vmatmul.mubr.msk.f32.vlgmr.msra.gmra.mrb[8].mxu1 %vm2350_vm6, %v10953_v49  ;;  %9158 = vmatprep.subr.bf16.mxu1 %v9157_v37 }
 0x2e3   : > { %8685 = vmatprep.mubr.msk.f32.mxu1 %vm2350_vm6, %v7321_v50  ;;  %9160 = vmatpush3.bf16.msra.mxu1 %v9157_v37 }
 0x2e6   : > { %8686 = vmatmul.mubr.msk.f32.gmra.mrb[10].mxu1 %vm2350_vm6, %v7322_v51  ;;  %vm10979_vm6 = vmpackc.low %vm2363_vm9, %vm10149_vm5 }
 0x2e7   : > { %9163 = vmatprep.subr.msk.bf16.mxu1 %vm10979_vm6, %v9161_v25 }
 0x2e8   : > { %9166 = vmatpush3.bf16.msk.msra.mxu1 %vm10979_vm6, %v9161_v25 }
 0x2e9   : > { %9168 = vmatprep.subr.bf16.mxu1 %v10999_v29 }
 0x389   : > { %v8628_v38 = vpop.f32.mrb[0].mxu1 }
 0x38a   : > { %v2433_v39 = vpop.f32.mrb[1].mxu1 }
 0x38d   : > { %v8631_v40 = vpop.f32.mrb[2].mxu1 }
 0x38e   : > { %v2443_v41 = vpop.f32.mrb[3].mxu1 }
 0x39f   : > { %v8656_v42 = vpop.f32.mrb[4].mxu1 }
 0x3a0   : > { %v2566_v43 = vmax.f32 %v8628_v38, %v8656_v42  ;;  %v2546_v44 = vpop.f32.mrb[5].mxu1 }
 0x3a1   : > { %v2565_v53 = vmax.f32 %v2433_v39, %v2546_v44 }
 0x3a3   : > { %v8659_v54 = vpop.f32.mrb[6].mxu1 }
 0x3a4   : > { %v2568_v55 = vmax.f32 %v8631_v40, %v8659_v54  ;;  %v2556_v56 = vpop.f32.mrb[7].mxu1  ;;  %v2755_v40 = vld [vmem:[%s12699_s3 + $0x10] sm:$0xff]  ;;  %v7350_v54 = vld [vmem:[%s12699_s3 + $0x48] sm:$0xff] }
 0x3a5   : > { %v2567_v57 = vmax.f32 %v2443_v41, %v2556_v56  ;;  %v2756_v41 = vld [vmem:[%s12699_s3 + $0x18] sm:$0x1] }
 0x3a6   : > { %v9171_v44 = vpack.c.bf16 %v2756_v41, %v2755_v40  ;;  %v7394_v41 = vld [vmem:[%s12699_s3 + $0xe0] sm:$0xff] }
 0x3b5   : > { %v8684_v58 = vpop.f32.mrb[8].mxu1 }
 0x3b6   : > { %v2683_v60 = vmax.f32 %v2566_v43, %v8684_v58  ;;  %v2663_v61 = vpop.f32.mrb[9].mxu1  ;;  %v7351_v58 = vld [vmem:[%s12699_s3 + $0x50] sm:$0xff] }
 0x3b7   : > { %v2682_v62 = vmax.f32 %v2565_v53, %v2663_v61  ;;  %v7349_v53 = vld [vmem:[%s12699_s3 + $0x40] sm:$0xff] }
 0x3b8   : > { %v2692_v63 = vadd.f32 %v7328_v59, %v2683_v60 }
 0x3b9   : > { %v2691_v0 = vadd.f32 %v7328_v59, %v2682_v62  ;;  %v8687_v1 = vpop.f32.mrb[10].mxu1  ;;  %v7358_v62 = vld [vmem:[%s12699_s3 + $0x60] sm:$0xff] }
 0x3ba   : > { %v2700_v3 = vmin.f32 %v2692_v63, 0.0  ;;  %v2685_v5 = vmax.f32 %v2568_v55, %v8687_v1  ;;  %v2673_v6 = vpop.f32.mrb[11].mxu1  ;;  %vm2696_vm8 = vcmp.gt.f32.partialorder %v2692_v63, 0.0 }
 0x3bb   : > { %v2699_v7 = vmin.f32 %v2691_v0, 0.0  ;;  %v2684_v8 = vmax.f32 %v2567_v57, %v2673_v6  ;;  %vm2695_vm9 = vcmp.gt.f32.partialorder %v2691_v0, 0.0  ;;  %v9177_v57 = vpack.c.bf16 %v7350_v54, %v7349_v53  ;;  %v7361_v6 = vld [vmem:[%s12699_s3 + $0x78] sm:$0x1] }
 0x3bc   : > { %v2705_v9 = vmul.f32 1.442695, %v2700_v3  ;;  %v2694_v10 = vadd.f32 %v7328_v59, %v2685_v5  ;;  %v7360_v5 = vld [vmem:[%s12699_s3 + $0x70] sm:$0xff] }
 0x3bd   : > { %v2703_v11 = vmul.f32 1.442695, %v2699_v7  ;;  %v2693_v12 = vadd.f32 %v7328_v59, %v2684_v8  ;;  %v7352_v59 = vld [vmem:[%s12699_s3 + $0x58] sm:$0x1]  ;;  %v9191_v8 = vpack.c.bf16 %v7361_v6, %v7360_v5  ;;  %v7405_v5 = vld [vmem:[%s12699_s3 + $0x110] sm:$0xff] }
 0x3be   : > { %10058 = vpow2.f32 %v2705_v9  ;;  %v2702_v13 = vmin.f32 %v2694_v10, 0.0  ;;  %vm2698_vm10 = vcmp.gt.f32.partialorder %v2694_v10, 0.0  ;;  %v9181_v60 = vpack.c.bf16 %v7352_v59, %v7351_v58  ;;  %v7406_v6 = vld [vmem:[%s12699_s3 + $0x118] sm:$0x1] }
 0x3bf   : > { %10060 = vpow2.f32 %v2703_v11  ;;  %v2701_v14 = vmin.f32 %v2693_v12, 0.0  ;;  %vm2697_vm11 = vcmp.gt.f32.partialorder %v2693_v12, 0.0  ;;  %v7368_v11 = vld [vmem:[%s12699_s3 + $0x88] sm:$0xff] }
 0x3c0   : > { %v2709_v15 = vmul.f32 1.442695, %v2702_v13 }
 0x3c1   : > { %v2707_v16 = vmul.f32 1.442695, %v2701_v14 }
 0x3c2   : > { %10062 = vpow2.f32 %v2709_v15  ;;  %v7369_v15 = vld [vmem:[%s12699_s3 + $0x90] sm:$0xff] }
 0x3c3   : > { %10064 = vpow2.f32 %v2707_v16  ;;  %v7370_v16 = vld [vmem:[%s12699_s3 + $0x98] sm:$0x1] }
 0x3c8   : > { %v10059_v18 = vpop.eup %10058 }
 0x3c9   : > { %v10061_v19 = vpop.eup %10060  ;;  %v7330_v30 = vadd.f32 -1.0, %v10059_v18 }
 0x3ca   : > { %v7329_v32 = vadd.f32 -1.0, %v10061_v19  ;;  %v9201_v19 = vpack.c.bf16 %v7370_v16, %v7369_v15  ;;  %v7414_v15 = vld [vmem:[%s12699_s3 + $0x130] sm:$0xff]  ;;  %v7415_v16 = vld [vmem:[%s12699_s3 + $0x138] sm:$0x1] }
 0x3cb   : > { %v2716_v34 = vsel %vm2696_vm8, %v2692_v63, %v7330_v30  ;;  %v7359_v63 = vld [vmem:[%s12699_s3 + $0x68] sm:$0xff]  ;;  %vm4155_vm8 = vcmask 401408  }
 0x3cc   : > { %v10063_v46 = vpop.eup %10062  ;;  %v2725_v47 = vmul.f32 %v7333_v31, %v2716_v34  ;;  %v2715_v48 = vsel %vm2695_vm9, %v2691_v0, %v7329_v32  ;;  %v9187_v1 = vpack.c.bf16 %v7359_v63, %v7358_v62  ;;  %v7377_v32 = vld [vmem:[%s12699_s3 + $0xa8] sm:$0xff]  ;;  %vm5113_vm9 = vcmask 72704  }
 0x3cd   : > { %v10065_v50 = vpop.eup %10064  ;;  %v2724_v51 = vmul.f32 %v7333_v31, %v2715_v48  ;;  %v7332_v52 = vadd.f32 -1.0, %v10063_v46  ;;  %v7379_v48 = vld [vmem:[%s12699_s3 + $0xb8] sm:$0x1]  ;;  %v7404_v62 = vld [vmem:[%s12699_s3 + $0x108] sm:$0xff] }
 0x3ce   : > { %v2734_v35 = vadd.f32 %v7334_v36, %v2725_v47  ;;  %v7331_v37 = vadd.f32 -1.0, %v10065_v50  ;;  %v7378_v47 = vld [vmem:[%s12699_s3 + $0xb0] sm:$0xff] }
 0x3cf   : > { %v2733_v22 = vadd.f32 %v7334_v36, %v2724_v51  ;;  %v2718_v23 = vsel %vm2698_vm10, %v2694_v10, %v7332_v52  ;;  %v7367_v10 = vld [vmem:[%s12699_s3 + $0x80] sm:$0xff]  ;;  %v9211_v51 = vpack.c.bf16 %v7379_v48, %v7378_v47  ;;  %v7438_v47 = vld [vmem:[%s12678_s5 + $0x50] sm:$0xff]  ;;  %vm5423_vm10 = vcmask 1043456  }
 0x3d0   : > { %2745 = vst.msk [vmem:[#allocation3 + $0xc] sm:$0xff] %vm2737_vm4, %v2734_v35  ;;  %v2727_v25 = vmul.f32 %v7333_v31, %v2718_v23  ;;  %v2717_v26 = vsel %vm2697_vm11, %v2693_v12, %v7331_v37  ;;  %v9197_v13 = vpack.c.bf16 %v7368_v11, %v7367_v10  ;;  %v7385_v35 = vld [vmem:[%s12699_s3 + $0xc0] sm:$0xff]  ;;  %v7386_v37 = vld [vmem:[%s12699_s3 + $0xc8] sm:$0xff]  ;;  %vm5361_vm11 = vcmask 814080  }
 0x3d1   : > { %2744 = vst.msk [vmem:[#allocation3 + $0x4] sm:$0xff] %vm2737_vm4, %v2733_v22  ;;  %v2726_v28 = vmul.f32 %v7333_v31, %v2717_v26  ;;  %v7376_v31 = vld [vmem:[%s12699_s3 + $0xa0] sm:$0xff]  ;;  %v9217_v23 = vpack.c.bf16 %v7386_v37, %v7385_v35  ;;  %v7387_v26 = vld [vmem:[%s12699_s3 + $0xd0] sm:$0xff]  ;;  %v7413_v11 = vld [vmem:[%s12699_s3 + $0x128] sm:$0xff] }
 0x3d2   : > { %v2736_v38 = vadd.f32 %v7334_v36, %v2727_v25  ;;  %v7412_v10 = vld [vmem:[%s12699_s3 + $0x120] sm:$0xff]  ;;  %v7441_v35 = vld [vmem:[%s12678_s5 + $0x68] sm:$0x3]  ;;  %5362 = vst.msk [vmem:[#allocation5 + $0x8] sm:$0xf] %vm5361_vm11, %v10148_v4 }
 0x3d3   : > { %v2735_v39 = vadd.f32 %v7334_v36, %v2726_v28  ;;  %v9207_v36 = vpack.c.bf16 %v7377_v32, %v7376_v31  ;;  %v7388_v28 = vld [vmem:[%s12699_s3 + $0xd8] sm:$0x1]  ;;  %v4159_v37 = vld [vmem:[%s12678_s5] sm:$0xff] }
 0x3d4   : > { %2748 = vst.msk [vmem:[#allocation3 + $0x1c] sm:$0x7] %vm2747_vm12, %v2736_v38 }
 0x3d5   : > { %2746 = vst.msk [vmem:[#allocation3 + $0x14] sm:$0xff] %vm2737_vm4, %v2735_v39  ;;  %v9221_v39 = vpack.c.bf16 %v7388_v28, %v7387_v26 }
 0x3d7   : > { %v3193_v52 = vld [vmem:[#allocation3 + $0xc] sm:$0xff] }
 0x3d8   : > { %v2757_v42 = vld [vmem:[#allocation3 + $0x1] sm:$0xff]  ;;  %v11021_v43 = vld [vmem:[#allocation3 + $0x9] sm:$0xff] }
 0x3d9   : > { %8696 = vmatprep.mubr.msk.f32.mxu1 %vm2737_vm4, %v2757_v42  ;;  %v11049_v61 = vld [vmem:[#allocation3 + $0x8] sm:$0xff] }
 0x3da   : > { %8697 = vmatmul.mubr.msk.f32.vlgmr.msra.gmra.mrb[12].mxu1 %vm2737_vm4, %v11021_v43  ;;  %v2966_v7 = vld [vmem:[#allocation3 + $0x2] sm:$0xff]  ;;  %v2967_v9 = vld [vmem:[#allocation3 + $0xa] sm:$0xff] }
 0x3db   : > { %9170 = vmatpush3.bf16.msra.mxu1 %v10999_v29  ;;  %v2749_v29 = vld [vmem:[#allocation3] sm:$0xff]  ;;  %v3080_v30 = vld [vmem:[#allocation3 + $0xb] sm:$0xff]  ;;  %v3195_v25 = vld [vmem:[#allocation3 + $0x1c] sm:$0x7] }
 0x3dc   : > { %v11033_v55 = vld [vmem:[#allocation3 + $0x11] sm:$0xff]  ;;  %v2760_v56 = vld [vmem:[#allocation3 + $0x19] sm:$0x7]  ;;  %9173 = vmatprep.subr.msk.bf16.mxu1 %vm10979_vm6, %v9171_v44  ;;  %v3079_v18 = vld [vmem:[#allocation3 + $0x3] sm:$0xff] }
 0x3dd   : > { %8699 = vmatprep.mubr.msk.f32.mxu1 %vm2737_vm4, %v11033_v55  ;;  %v11059_v0 = vld [vmem:[#allocation3 + $0x10] sm:$0xff]  ;;  %v2752_v3 = vld [vmem:[#allocation3 + $0x18] sm:$0x7]  ;;  %v3082_v46 = vld [vmem:[#allocation3 + $0x1b] sm:$0x7] }
 0x3de   : > { %8700 = vmatmul.mubr.msk.f32.gmra.mrb[14].mxu1 %vm2737_vm4, %v2760_v56  ;;  %v2968_v12 = vld [vmem:[#allocation3 + $0x12] sm:$0xff]  ;;  %v2969_v14 = vld [vmem:[#allocation3 + $0x1a] sm:$0x7]  ;;  %v3192_v50 = vld [vmem:[#allocation3 + $0x4] sm:$0xff] }
 0x3df   : > { %9176 = vmatpush3.bf16.msk.msra.mxu1 %vm10979_vm6, %v9171_v44  ;;  %8710 = vmatprep.mubr.msk.f32.mxu1 %vm2737_vm4, %v2749_v29  ;;  %v3081_v34 = vld [vmem:[#allocation3 + $0x13] sm:$0xff]  ;;  %v3305_v38 = vld [vmem:[#allocation3 + $0x5] sm:$0xff]  ;;  %v3308_v54 = vld [vmem:[#allocation3 + $0x1d] sm:$0x7] }
 0x3e0   : > { %9178 = vmatprep.subr.bf16.mxu1 %v9177_v57  ;;  %v3194_v22 = vld [vmem:[#allocation3 + $0x14] sm:$0xff]  ;;  %v7395_v42 = vld [vmem:[%s12699_s3 + $0xe8] sm:$0xff] }
 0x3e1   : > { %v3306_v40 = vld [vmem:[#allocation3 + $0xd] sm:$0xff]  ;;  %v3307_v44 = vld [vmem:[#allocation3 + $0x15] sm:$0xff]  ;;  %v9227_v53 = vpack.c.bf16 %v7395_v42, %v7394_v41  ;;  %v7430_v42 = vld [vmem:[%s12703_s4] ss:$0 sm:$0xff] }
 0x3e2   : > { %8711 = vmatmul.mubr.msk.f32.vlgmr.msra.gmra.mrb[12].mxu1 %vm2737_vm4, %v11049_v61  ;;  %v7396_v56 = vld [vmem:[%s12699_s3 + $0xf0] sm:$0xff]  ;;  %v3418_v58 = vld [vmem:[#allocation3 + $0x6] sm:$0xff] }
 0x3e3   : > { %8713 = vmatprep.mubr.msk.f32.mxu1 %vm2737_vm4, %v11059_v0  ;;  %9180 = vmatpush3.bf16.msra.mxu1 %v9177_v57  ;;  %v7397_v57 = vld [vmem:[%s12699_s3 + $0xf8] sm:$0x1]  ;;  %v3419_v29 = vld [vmem:[#allocation3 + $0xe] sm:$0xff] }
 0x3e4   : > { %9183 = vmatprep.subr.msk.bf16.mxu1 %vm10979_vm6, %v9181_v60  ;;  %v9231_v59 = vpack.c.bf16 %v7397_v57, %v7396_v56  ;;  %v3420_v63 = vld [vmem:[#allocation3 + $0x16] sm:$0xff] }
 0x3e6   : > { %8714 = vmatmul.mubr.msk.f32.gmra.mrb[14].mxu1 %vm2737_vm4, %v2752_v3  ;;  %v3421_v3 = vld [vmem:[#allocation3 + $0x1e] sm:$0x7] }
 0x3e7   : > { %9186 = vmatpush3.bf16.msk.msra.mxu1 %vm10979_vm6, %v9181_v60  ;;  %8724 = vmatprep.mubr.msk.f32.mxu1 %vm2737_vm4, %v2966_v7  ;;  %v7403_v60 = vld [vmem:[%s12699_s3 + $0x100] sm:$0xff]  ;;  %s10082_s3 = scalar_lea.vmem %s12633_s2, 16 }
 0x3e8   : > { %9188 = vmatprep.subr.bf16.mxu1 %v9187_v1  ;;  %v3531_v7 = vld [vmem:[#allocation3 + $0x7] sm:$0xff]  ;;  %p10083_p11 = scmp.ne.s32.totalorder %s12633_s2, %s10082_s3 }
 0x3ea   : > { %8725 = vmatmul.mubr.msk.f32.vlgmr.msra.gmra.mrb[12].mxu1 %vm2737_vm4, %v2967_v9  ;;  %v3532_v9 = vld [vmem:[#allocation3 + $0xf] sm:$0xff]  ;;  %p10084_p12 = pnand %p10083_p11, %p10269_p5 }
 0x3eb   : > { %8727 = vmatprep.mubr.msk.f32.mxu1 %vm2737_vm4, %v2968_v12  ;;  %9190 = vmatpush3.bf16.msra.mxu1 %v9187_v1  ;;  %v9237_v1 = vpack.c.bf16 %v7404_v62, %v7403_v60  ;;  %v3533_v12 = vld [vmem:[#allocation3 + $0x17] sm:$0xff] }
 0x3ec   : > { %9193 = vmatprep.subr.msk.bf16.mxu1 %vm10979_vm6, %v9191_v8  ;;  %p10085_p13 = pneg %p10084_p12 }
 0x3ee   : > { %8728 = vmatmul.mubr.msk.f32.gmra.mrb[14].mxu1 %vm2737_vm4, %v2969_v14  ;;  %v9247_v14 = vpack.c.bf16 %v7413_v11, %v7412_v10 }
 0x3ef   : > { %9196 = vmatpush3.bf16.msk.msra.mxu1 %vm10979_vm6, %v9191_v8  ;;  %8738 = vmatprep.mubr.msk.f32.mxu1 %vm2737_vm4, %v3079_v18  ;;  %v9241_v8 = vpack.c.bf16 %v7406_v6, %v7405_v5  ;;  %v9251_v18 = vpack.c.bf16 %v7415_v16, %v7414_v15 }
 0x3f0   : > { %9198 = vmatprep.subr.bf16.mxu1 %v9197_v13 }
 0x3f2   : > { %8739 = vmatmul.mubr.msk.f32.vlgmr.msra.gmra.mrb[12].mxu1 %vm2737_vm4, %v3080_v30  ;;  %v3647_v30 = vld [vmem:[#allocation3 + $0x20] sm:$0x7] }
 0x3f3   : > { %8741 = vmatprep.mubr.msk.f32.mxu1 %vm2737_vm4, %v3081_v34  ;;  %9200 = vmatpush3.bf16.msra.mxu1 %v9197_v13  ;;  %v3534_v13 = vld [vmem:[#allocation3 + $0x1f] sm:$0x7] }
 0x3f4   : > { %9203 = vmatprep.subr.msk.bf16.mxu1 %vm10979_vm6, %v9201_v19 }
 0x3f6   : > { %8742 = vmatmul.mubr.msk.f32.gmra.mrb[14].mxu1 %vm2737_vm4, %v3082_v46  ;;  %v7437_v46 = vld [vmem:[%s12678_s5 + $0x48] sm:$0xff] }
 0x3f7   : > { %9206 = vmatpush3.bf16.msk.msra.mxu1 %vm10979_vm6, %v9201_v19  ;;  %8752 = vmatprep.mubr.msk.f32.mxu1 %vm2737_vm4, %v3192_v50  ;;  %v3646_v19 = vld [vmem:[#allocation3 + $0x18] sm:$0xff]  ;;  %v9291_v48 = vpack.c.bf16 %v7438_v47, %v7437_v46  ;;  %v7452_v46 = vld [vmem:[%s12678_s5 + $0x90] sm:$0xff] }
 0x3f8   : > { %9208 = vmatprep.subr.bf16.mxu1 %v9207_v36  ;;  %v7439_v50 = vld [vmem:[%s12678_s5 + $0x58] sm:$0xff] }
 0x3fa   : > { %8753 = vmatmul.mubr.msk.f32.vlgmr.msra.gmra.mrb[12].mxu1 %vm2737_vm4, %v3193_v52 }
 0x3fb   : > { %8755 = vmatprep.mubr.msk.f32.mxu1 %vm2737_vm4, %v3194_v22  ;;  %9210 = vmatpush3.bf16.msra.mxu1 %v9207_v36  ;;  %v4160_v22 = vld [vmem:[%s12678_s5 + $0x8] sm:$0xff] }
 0x3fc   : > { %9213 = vmatprep.subr.msk.bf16.mxu1 %vm10979_vm6, %v9211_v51 }
 0x3fe   : > { %8756 = vmatmul.mubr.msk.f32.gmra.mrb[14].mxu1 %vm2737_vm4, %v3195_v25 }
 0x3ff   : > { %9216 = vmatpush3.bf16.msk.msra.mxu1 %vm10979_vm6, %v9211_v51  ;;  %8766 = vmatprep.mubr.msk.f32.mxu1 %vm2737_vm4, %v3305_v38  ;;  %v7440_v51 = vld [vmem:[%s12678_s5 + $0x60] sm:$0xff] }
 0x400   : > { %9218 = vmatprep.subr.bf16.mxu1 %v9217_v23  ;;  %v9295_v52 = vpack.c.bf16 %v7440_v51, %v7439_v50  ;;  %v7454_v50 = vld [vmem:[%s12678_s5 + $0xa0] sm:$0x3]  ;;  %v7458_v51 = vld [vmem:[%s12678_s5 + $0xa8] sm:$0xff] }
 0x402   : > { %8767 = vmatmul.mubr.msk.f32.vlgmr.msra.gmra.mrb[12].mxu1 %vm2737_vm4, %v3306_v40 }
 0x403   : > { %8769 = vmatprep.mubr.msk.f32.mxu1 %vm2737_vm4, %v3307_v44  ;;  %9220 = vmatpush3.bf16.msra.mxu1 %v9217_v23  ;;  %v9299_v23 = vpack.c.bf16 %v4160_v22, %v4159_v37  ;;  %v7461_v37 = vld [vmem:[%s12678_s5 + $0xc0] sm:$0xff] }
 0x404   : > { %9223 = vmatprep.subr.msk.bf16.mxu1 %vm10979_vm6, %v9221_v39 }
 0x406   : > { %8770 = vmatmul.mubr.msk.f32.gmra.mrb[14].mxu1 %vm2737_vm4, %v3308_v54 }
 0x407   : > { %9226 = vmatpush3.bf16.msk.msra.mxu1 %vm10979_vm6, %v9221_v39  ;;  %8780 = vmatprep.mubr.msk.f32.mxu1 %vm2737_vm4, %v3418_v58 }
 0x408   : > { %9228 = vmatprep.subr.bf16.mxu1 %v9227_v53 }
 0x40a   : > { %8781 = vmatmul.mubr.msk.f32.vlgmr.msra.gmra.mrb[12].mxu1 %vm2737_vm4, %v3419_v29 }
 0x40b   : > { %8783 = vmatprep.mubr.msk.f32.mxu1 %vm2737_vm4, %v3420_v63  ;;  %9230 = vmatpush3.bf16.msra.mxu1 %v9227_v53 }
 0x40c   : > { %9233 = vmatprep.subr.msk.bf16.mxu1 %vm10979_vm6, %v9231_v59 }
 0x40e   : > { %8784 = vmatmul.mubr.msk.f32.gmra.mrb[14].mxu1 %vm2737_vm4, %v3421_v3  ;;  %v7433_v3 = vld [vmem:[%s12703_s4 + $0x1] ss:$0 sm:$0xff] }
 0x40f   : > { %9236 = vmatpush3.bf16.msk.msra.mxu1 %vm10979_vm6, %v9231_v59  ;;  %8794 = vmatprep.mubr.msk.f32.mxu1 %vm2737_vm4, %v3531_v7  ;;  %v7434_v7 = vld [vmem:[%s12703_s4 + $0x2] ss:$0 sm:$0xff]  ;;  %s10086_s4 = sshll.u32 %s10150_s22, 4  ;;  %s10087_s4 = int_to_ptr.vmem [resolvable:$false] %s10086_s4 }
 0x410   : > { %9238 = vmatprep.subr.bf16.mxu1 %v9237_v1  ;;  %s10088_s23 = scalar_lea.vmem %s10087_s4, 32  ;;  %p10089_p0 = scmp.lt.s32.totalorder %s12633_s2, %s10087_s4 }
 0x411   : > { %p10090_p1 = scmp.lt.s32.totalorder %s10088_s23, %s10082_s3 }
 0x412   : > { %8795 = vmatmul.mubr.msk.f32.vlgmr.msra.gmra.mrb[12].mxu1 %vm2737_vm4, %v3532_v9 }
 0x413   : > { %8797 = vmatprep.mubr.msk.f32.mxu1 %vm2737_vm4, %v3533_v12  ;;  %9240 = vmatpush3.bf16.msra.mxu1 %v9237_v1  ;;  %p10091_p2 = por %p10090_p1, %p10089_p0 }
 0x414   : > { %9243 = vmatprep.subr.msk.bf16.mxu1 %vm10979_vm6, %v9241_v8 }
 0x415   : > { %p10092_p3 = pnand %p10091_p2, %p10085_p13 }
 0x416   : > { %8798 = vmatmul.mubr.msk.f32.gmra.mrb[14].mxu1 %vm2737_vm4, %v3534_v13  ;;  %v4161_v13 = vld [vmem:[%s12678_s5 + $0x10] sm:$0xff] }
 0x417   : > { %9246 = vmatpush3.bf16.msk.msra.mxu1 %vm10979_vm6, %v9241_v8  ;;  %8808 = vmatprep.mubr.msk.f32.mxu1 %vm2737_vm4, %v11049_v61  ;;  %v3759_v61 = vld [vmem:[#allocation3 + $0x19] sm:$0xff] }
 0x418   : > { %9248 = vmatprep.subr.bf16.mxu1 %v9247_v14 }
 0x41a   : > { %8809 = vmatmul.mubr.msk.f32.vlgmr.msra.gmra.mrb[12].mxu1 %vm2737_vm4, %v11059_v0  ;;  %v3760_v0 = vld [vmem:[#allocation3 + $0x21] sm:$0x7] }
 0x41b   : > { %8811 = vmatprep.mubr.msk.f32.mxu1 %vm2737_vm4, %v3646_v19  ;;  %9250 = vmatpush3.bf16.msra.mxu1 %v9247_v14  ;;  %v4162_v14 = vld [vmem:[%s12678_s5 + $0x18] sm:$0xff]  ;;  %v4163_v19 = vld [vmem:[%s12678_s5 + $0x20] sm:$0xff] }
 0x41c   : > { %9253 = vmatprep.subr.msk.bf16.mxu1 %vm10979_vm6, %v9251_v18 }
 0x41e   : > { %8812 = vmatmul.mubr.msk.f32.gmra.mrb[14].mxu1 %vm2737_vm4, %v3647_v30  ;;  %v4164_v30 = vld [vmem:[%s12678_s5 + $0x28] sm:$0xff] }
 0x41f   : > { %9256 = vmatpush3.bf16.msk.msra.mxu1 %vm10979_vm6, %v9251_v18  ;;  %8822 = vmatprep.mubr.msk.f32.mxu1 %vm2737_vm4, %v11021_v43  ;;  %v9303_v18 = vpack.c.bf16 %v4162_v14, %v4161_v13  ;;  %v7484_v13 = vld [vmem:[%s12678_s5 + $0x148] sm:$0x3]  ;;  %v7488_v14 = vld [vmem:[%s12678_s5 + $0x150] sm:$0xff] }
 0x422   : > { %8823 = vmatmul.mubr.msk.f32.vlgmr.msra.gmra.mrb[12].mxu1 %vm2737_vm4, %v11033_v55 }
 0x423   : > { %8825 = vmatprep.mubr.msk.f32.mxu1 %vm2737_vm4, %v3759_v61 }
 0x426   : > { %8826 = vmatmul.mubr.msk.f32.gmra.mrb[14].mxu1 %vm2737_vm4, %v3760_v0  ;;  %v9307_v0 = vpack.c.bf16 %v4164_v30, %v4163_v19  ;;  %v4634_v30 = vld [vmem:[#allocation4 + $0xd] sm:$0x1] }
 0x427   : > { %8836 = vmatprep.mubr.msk.f32.mxu1 %vm3870_vm13, %v10862_v27 }
 0x4f5   : > { %v8824_v31 = vpop.f32.mrb[12].mxu1 }
 0x4f6   : > { %v3847_v32 = vpop.f32.mrb[13].mxu1 }
 0x4f7   : > { %v9257_v34 = vpack.c.bf16 %v8824_v31, %v3847_v32  ;;  %v4165_v31 = vld [vmem:[%s12678_s5 + $0x30] sm:$0x3] }
 0x4f8   : > { %v7448_v32 = vld [vmem:[%s12678_s5 + $0x70] sm:$0xff] }
 0x4f9   : > { %v8827_v36 = vpop.f32.mrb[14].mxu1  ;;  %9258 = vmatprep.subr.bf16.mxu1 %v9257_v34 }
 0x4fa   : > { %v3857_v43 = vpop.f32.mrb[15].mxu1  ;;  %9260 = vmatpush3.bf16.msra.mxu1 %v9257_v34 }
 0x4fb   : > { %v9261_v55 = vpack.c.bf16 %v8827_v36, %v3857_v43  ;;  %v7450_v36 = vld [vmem:[%s12678_s5 + $0x80] sm:$0xff]  ;;  %v7451_v43 = vld [vmem:[%s12678_s5 + $0x88] sm:$0xff] }
 0x4fd   : > { %9263 = vmatprep.subr.msk.bf16.mxu1 %vm9262_vm15, %v9261_v55 }
 0x4fe   : > { %9266 = vmatpush3.bf16.msk.msra.mxu1 %vm9262_vm15, %v9261_v55 }
 0x4ff   : > { %9268 = vmatprep.subr.bf16.mxu1 %v9257_v34 }
 0x501   : > { %8837 = vmatmul.mubr.msk.f32.vlgmr.msra.gmra.mrb[16].mxu1 %vm3870_vm13, %v10894_v17  ;;  %v7435_v17 = vld [vmem:[%s12678_s5 + $0x38] sm:$0xff] }
 0x502   : > { %9270 = vmatpush3.bf16.msra.mxu1 %v9257_v34  ;;  %8847 = vmatprep.mubr.msk.f32.mxu1 %vm3870_vm13, %v10909_v21 }
 0x503   : > { %9273 = vmatprep.subr.msk.bf16.mxu1 %vm9262_vm15, %v9261_v55 }
 0x506   : > { %9276 = vmatpush3.bf16.msk.msra.mxu1 %vm9262_vm15, %v9261_v55 }
 0x507   : > { %9278 = vmatprep.subr.bf16.mxu1 %v9257_v34 }
 0x509   : > { %8848 = vmatmul.mubr.msk.f32.vlgmr.msra.gmra.mrb[18].mxu1 %vm3870_vm13, %v10923_v33  ;;  %v7436_v33 = vld [vmem:[%s12678_s5 + $0x40] sm:$0xff] }
 0x50a   : > { %9280 = vmatpush3.bf16.msra.mxu1 %v9257_v34  ;;  %8858 = vmatprep.mubr.msk.f32.mxu1 %vm3870_vm13, %v10939_v45  ;;  %v7449_v34 = vld [vmem:[%s12678_s5 + $0x78] sm:$0xff] }
 0x50b   : > { %9283 = vmatprep.subr.msk.bf16.mxu1 %vm9262_vm15, %v9261_v55 }
 0x50e   : > { %9286 = vmatpush3.bf16.msk.msra.mxu1 %vm9262_vm15, %v9261_v55  ;;  %v9311_v55 = vpack.c.bf16 %v7449_v34, %v7448_v32  ;;  %vm6461_vm15 = vcmask 23552  }
 0x511   : > { %8859 = vmatmul.mubr.msk.f32.vlgmr.msra.gmra.mrb[20].mxu1 %vm3870_vm13, %v10953_v49  ;;  %v9287_v49 = vpack.c.bf16 %v7436_v33, %v7435_v17  ;;  %v9315_v17 = vpack.c.bf16 %v7451_v43, %v7450_v36  ;;  %v7494_v36 = vld [vmem:[%s12678_s5 + $0x180] sm:$0x3]  ;;  %v7498_v43 = vld [vmem:[%s12678_s5 + $0x188] sm:$0xff]  ;;  %vm5363_vm13 = vcmask 813056  }
 0x513   : > { %9288 = vmatprep.subr.bf16.mxu1 %v9287_v49 }
 0x514   : > { %9290 = vmatpush3.bf16.msra.mxu1 %v9287_v49  ;;  %v7453_v49 = vld [vmem:[%s12678_s5 + $0x98] sm:$0xff] }
 0x515   : > { %9292 = vmatprep.subr.bf16.mxu1 %v9291_v48 }
 0x518   : > { %9294 = vmatpush3.bf16.msra.mxu1 %v9291_v48  ;;  %v9319_v48 = vpack.c.bf16 %v7453_v49, %v7452_v46  ;;  %v4730_v49 = vld [vmem:[#allocation4 + $0xe] sm:$0x1] }
 0x519   : > { %9296 = vmatprep.subr.bf16.mxu1 %v9295_v52 }
 0x51c   : > { %9298 = vmatpush3.bf16.msra.mxu1 %v9295_v52  ;;  %v7459_v52 = vld [vmem:[%s12678_s5 + $0xb0] sm:$0xff] }
 0x51d   : > { %8873 = vmatprep.subr.msk.mxu1 %vm4182_vm3, %v7441_v35  ;;  %v9323_v22 = vpack.c.bf16 %v7459_v52, %v7458_v51 }
 0x520   : > { %8874 = vmatpush3.msk.msra.mxu1 %vm4182_vm3, %v7441_v35  ;;  %v7460_v35 = vld [vmem:[%s12678_s5 + $0xb8] sm:$0xff] }
 0x521   : > { %9300 = vmatprep.subr.bf16.mxu1 %v9299_v23 }
 0x5d4   : > { %v8838_v25 = vpop.f32.mrb[16].mxu1 }
 0x5d5   : > { %v3945_v26 = vpop.f32.mrb[17].mxu1 }
 0x5dc   : > { %v8849_v28 = vpop.f32.mrb[18].mxu1 }
 0x5dd   : > { %v4034_v38 = vmax.f32 %v8838_v25, %v8849_v28  ;;  %v4024_v39 = vpop.f32.mrb[19].mxu1  ;;  %v7463_v28 = vld [vmem:[%s12678_s5 + $0xd0] sm:$0xff] }
 0x5de   : > { %v4033_v40 = vmax.f32 %v3945_v26, %v4024_v39  ;;  %v7462_v26 = vld [vmem:[%s12678_s5 + $0xc8] sm:$0xff] }
 0x5df   : > { %v9331_v39 = vpack.c.bf16 %v7463_v28, %v7462_v26  ;;  %v4826_v28 = vld [vmem:[#allocation4 + $0xf] sm:$0x1] }
 0x5e4   : > { %v8860_v41 = vpop.f32.mrb[20].mxu1 }
 0x5e5   : > { %v4115_v44 = vmax.f32 %v4034_v38, %v8860_v41  ;;  %v4105_v53 = vpop.f32.mrb[21].mxu1  ;;  %v7468_v41 = vld [vmem:[%s12678_s5 + $0xe0] sm:$0xff] }
 0x5e6   : > { %v4114_v54 = vmax.f32 %v4033_v40, %v4105_v53  ;;  %v7464_v40 = vld [vmem:[%s12678_s5 + $0xd8] sm:$0x3] }
 0x5e7   : > { %v4122_v56 = vadd.f32 %v7430_v42, %v4115_v44  ;;  %v7470_v44 = vld [vmem:[%s12678_s5 + $0xf0] sm:$0xff]  ;;  %v7471_v53 = vld [vmem:[%s12678_s5 + $0xf8] sm:$0xff] }
 0x5e8   : > { %v4121_v57 = vadd.f32 %v7430_v42, %v4114_v54  ;;  %v7469_v42 = vld [vmem:[%s12678_s5 + $0xe8] sm:$0xff] }
 0x5e9   : > { %v4126_v58 = vmin.f32 %v4122_v56, 0.0  ;;  %vm4124_vm4 = vcmp.gt.f32.partialorder %v4122_v56, 0.0  ;;  %v9335_v54 = vpack.c.bf16 %v7469_v42, %v7468_v41 }
 0x5ea   : > { %v4125_v59 = vmin.f32 %v4121_v57, 0.0  ;;  %vm4123_vm7 = vcmp.gt.f32.partialorder %v4121_v57, 0.0 }
 0x5eb   : > { %v4129_v29 = vmul.f32 1.442695, %v4126_v58  ;;  %v7472_v58 = vld [vmem:[%s12678_s5 + $0x100] sm:$0xff] }
 0x5ec   : > { %v4127_v60 = vmul.f32 1.442695, %v4125_v59  ;;  %v7473_v59 = vld [vmem:[%s12678_s5 + $0x108] sm:$0xff] }
 0x5ed   : > { %10066 = vpow2.f32 %v4129_v29 }
 0x5ee   : > { %10068 = vpow2.f32 %v4127_v60  ;;  %v9343_v60 = vpack.c.bf16 %v7473_v59, %v7472_v58  ;;  %v4922_v59 = vld [vmem:[#allocation4 + $0x10] sm:$0x1] }
 0x5f7   : > { %v10067_v62 = vpop.eup %10066 }
 0x5f8   : > { %v10069_v63 = vpop.eup %10068  ;;  %v7432_v1 = vadd.f32 -1.0, %v10067_v62  ;;  %v7474_v62 = vld [vmem:[%s12678_s5 + $0x110] sm:$0x3] }
 0x5f9   : > { %v7431_v5 = vadd.f32 -1.0, %v10069_v63  ;;  %v7478_v63 = vld [vmem:[%s12678_s5 + $0x118] sm:$0xff] }
 0x5fa   : > { %v4134_v6 = vsel %vm4124_vm4, %v4122_v56, %v7432_v1  ;;  %v9339_v56 = vpack.c.bf16 %v7471_v53, %v7470_v44  ;;  %v7479_v1 = vld [vmem:[%s12678_s5 + $0x120] sm:$0xff]  ;;  %v7514_v44 = vld [vmem:[%s12678_s5 + $0x1f0] sm:$0x3]  ;;  %v7518_v53 = vld [vmem:[%s12678_s5 + $0x1f8] sm:$0xff] }
 0x5fb   : > { %v4141_v8 = vmul.f32 %v7433_v3, %v4134_v6  ;;  %v4133_v9 = vsel %vm4123_vm7, %v4121_v57, %v7431_v5  ;;  %v7481_v5 = vld [vmem:[%s12678_s5 + $0x130] sm:$0xff]  ;;  %v9347_v6 = vpack.c.bf16 %v7479_v1, %v7478_v63 }
 0x5fc   : > { %v4140_v10 = vmul.f32 %v7433_v3, %v4133_v9  ;;  %v7480_v3 = vld [vmem:[%s12678_s5 + $0x128] sm:$0xff]  ;;  %v7482_v9 = vld [vmem:[%s12678_s5 + $0x138] sm:$0xff] }
 0x5fd   : > { %v4148_v11 = vadd.f32 %v7434_v7, %v4141_v8 }
 0x5fe   : > { %v4147_v12 = vadd.f32 %v7434_v7, %v4140_v10  ;;  %v9351_v7 = vpack.c.bf16 %v7481_v5, %v7480_v3  ;;  %v7483_v10 = vld [vmem:[%s12678_s5 + $0x140] sm:$0xff]  ;;  %v7524_v3 = vld [vmem:[%s12678_s5 + $0x228] sm:$0x3]  ;;  %v5018_v5 = vld [vmem:[#allocation4 + $0x11] sm:$0x1] }
 0x5ff   : > { %4156 = vst.msk [vmem:[#allocation4 + $0xc] sm:$0x1] %vm4155_vm8, %v4148_v11  ;;  %vm7002_vm8 = vcmask 359424  }
 0x600   : > { %4154 = vst.msk [vmem:[#allocation4 + $0x4] sm:$0xff] %vm4149_vm0, %v4147_v12  ;;  %v9355_v12 = vpack.c.bf16 %v7483_v10, %v7482_v9  ;;  %v5367_v9 = vld [vmem:[%s12680_s7 + $0x8] sm:$0xff]  ;;  %v5369_v10 = vld [vmem:[%s12680_s7 + $0x18] sm:$0xff] }
 0x606   : > { %v4538_v8 = vld [vmem:[#allocation4 + $0xc] sm:$0x1] }
 0x607   : > { %v4166_v15 = vld [vmem:[#allocation4 + $0x1] sm:$0xff]  ;;  %v4167_v16 = vld [vmem:[#allocation4 + $0x9] sm:$0x1]  ;;  %v4346_v25 = vld [vmem:[#allocation4 + $0xa] sm:$0x1] }
 0x608   : > { %8875 = vmatprep.mubr.msk.f32.mxu1 %vm4149_vm0, %v4166_v15  ;;  %v4157_v61 = vld [vmem:[#allocation4] sm:$0xff]  ;;  %v4158_v33 = vld [vmem:[#allocation4 + $0x8] sm:$0x1]  ;;  %v4442_v57 = vld [vmem:[#allocation4 + $0xb] sm:$0x1] }
 0x609   : > { %8876 = vmatmul.mubr.msk.f32.vlgmr.msra.gmra.mrb[22].mxu1 %vm4149_vm0, %v4167_v16  ;;  %v4345_v47 = vld [vmem:[#allocation4 + $0x2] sm:$0xff]  ;;  %v7489_v15 = vld [vmem:[%s12678_s5 + $0x158] sm:$0xff]  ;;  %v7490_v16 = vld [vmem:[%s12678_s5 + $0x160] sm:$0xff] }
 0x60a   : > { %9302 = vmatpush3.bf16.msra.mxu1 %v9299_v23  ;;  %8892 = vmatprep.mubr.msk.f32.mxu1 %vm4149_vm0, %v4157_v61  ;;  %v9327_v23 = vpack.c.bf16 %v7461_v37, %v7460_v35  ;;  %v4441_v38 = vld [vmem:[#allocation4 + $0x3] sm:$0xff]  ;;  %v9359_v19 = vpack.c.bf16 %v7489_v15, %v7488_v14  ;;  %v7504_v35 = vld [vmem:[%s12678_s5 + $0x1b8] sm:$0x3]  ;;  %v7508_v37 = vld [vmem:[%s12678_s5 + $0x1c0] sm:$0xff] }
 0x60b   : > { %9304 = vmatprep.subr.bf16.mxu1 %v9303_v18  ;;  %v4537_v29 = vld [vmem:[#allocation4 + $0x4] sm:$0xff]  ;;  %v5373_v15 = vld [vmem:[%s12680_s7 + $0x38] sm:$0xff] }
 0x60c   : > { %v4633_v11 = vld [vmem:[#allocation4 + $0x5] sm:$0xff] }
 0x60d   : > { %v4729_v32 = vld [vmem:[#allocation4 + $0x6] sm:$0xff] }
 0x60e   : > { %9306 = vmatpush3.bf16.msra.mxu1 %v9303_v18  ;;  %v7491_v18 = vld [vmem:[%s12678_s5 + $0x168] sm:$0xff]  ;;  %v4921_v41 = vld [vmem:[#allocation4 + $0x8] sm:$0xff] }
 0x60f   : > { %9308 = vmatprep.subr.bf16.mxu1 %v9307_v0  ;;  %v9363_v61 = vpack.c.bf16 %v7491_v18, %v7490_v16  ;;  %v4825_v51 = vld [vmem:[#allocation4 + $0x7] sm:$0xff] }
 0x610   : > { %v5017_v63 = vld [vmem:[#allocation4 + $0x9] sm:$0xff]  ;;  %v5371_v14 = vld [vmem:[%s12680_s7 + $0x28] sm:$0xff] }
 0x611   : > { %v9447_v18 = vpack.c.bf16 %v5373_v15, %v5371_v14  ;;  %v7587_v14 = vld [vmem:[%s12680_s7 + $0x228] sm:$0xff]  ;;  %v7589_v15 = vld [vmem:[%s12680_s7 + $0x238] sm:$0xff] }
 0x612   : > { %9310 = vmatpush3.bf16.msra.mxu1 %v9307_v0  ;;  %v7492_v0 = vld [vmem:[%s12678_s5 + $0x170] sm:$0xff] }
 0x613   : > { %8890 = vmatprep.subr.msk.mxu1 %vm4182_vm3, %v4165_v31 }
 0x616   : > { %8891 = vmatpush3.msk.msra.mxu1 %vm4182_vm3, %v4165_v31  ;;  %v7493_v31 = vld [vmem:[%s12678_s5 + $0x178] sm:$0xff] }
 0x617   : > { %8893 = vmatmul.mubr.msk.f32.vlgmr.msra.gmra.mrb[22].mxu1 %vm4149_vm0, %v4158_v33  ;;  %9312 = vmatprep.subr.bf16.mxu1 %v9311_v55  ;;  %v9367_v34 = vpack.c.bf16 %v7493_v31, %v7492_v0  ;;  %v7501_v33 = vld [vmem:[%s12678_s5 + $0x1a0] sm:$0xff] }
 0x618   : > { %9314 = vmatpush3.bf16.msra.mxu1 %v9311_v55  ;;  %8909 = vmatprep.mubr.msk.f32.mxu1 %vm4149_vm0, %v4345_v47  ;;  %v7499_v55 = vld [vmem:[%s12678_s5 + $0x190] sm:$0xff] }
 0x619   : > { %9316 = vmatprep.subr.bf16.mxu1 %v9315_v17  ;;  %v9371_v46 = vpack.c.bf16 %v7499_v55, %v7498_v43  ;;  %v5379_v43 = vld [vmem:[%s12680_s7 + $0x68] sm:$0xff]  ;;  %v5381_v55 = vld [vmem:[%s12680_s7 + $0x78] sm:$0xff] }
 0x61c   : > { %9318 = vmatpush3.bf16.msra.mxu1 %v9315_v17  ;;  %v7500_v17 = vld [vmem:[%s12678_s5 + $0x198] sm:$0xff] }
 0x61d   : > { %9320 = vmatprep.subr.bf16.mxu1 %v9319_v48  ;;  %v9375_v47 = vpack.c.bf16 %v7501_v33, %v7500_v17  ;;  %v5378_v17 = vld [vmem:[%s12680_s7 + $0x60] sm:$0xff]  ;;  %v9455_v33 = vpack.c.bf16 %v5381_v55, %v5379_v43  ;;  %v7600_v43 = vld [vmem:[%s12680_s7 + $0x278] sm:$0xff]  ;;  %v7602_v55 = vld [vmem:[%s12680_s7 + $0x288] sm:$0xff] }
 0x620   : > { %9322 = vmatpush3.bf16.msra.mxu1 %v9319_v48  ;;  %v7502_v48 = vld [vmem:[%s12678_s5 + $0x1a8] sm:$0xff] }
 0x621   : > { %8907 = vmatprep.subr.msk.mxu1 %vm4182_vm3, %v7454_v50 }
 0x624   : > { %8908 = vmatpush3.msk.msra.mxu1 %vm4182_vm3, %v7454_v50  ;;  %v7503_v50 = vld [vmem:[%s12678_s5 + $0x1b0] sm:$0xff] }
 0x625   : > { %8910 = vmatmul.mubr.msk.f32.vlgmr.msra.gmra.mrb[22].mxu1 %vm4149_vm0, %v4346_v25  ;;  %9324 = vmatprep.subr.bf16.mxu1 %v9323_v22  ;;  %v9379_v52 = vpack.c.bf16 %v7503_v50, %v7502_v48  ;;  %v7511_v25 = vld [vmem:[%s12678_s5 + $0x1d8] sm:$0xff]  ;;  %v5382_v50 = vld [vmem:[%s12680_s7 + $0x80] sm:$0xff] }
 0x626   : > { %9326 = vmatpush3.bf16.msra.mxu1 %v9323_v22  ;;  %8926 = vmatprep.mubr.msk.f32.mxu1 %vm4149_vm0, %v4441_v38  ;;  %v7509_v22 = vld [vmem:[%s12678_s5 + $0x1c8] sm:$0xff]  ;;  %v5385_v48 = vld [vmem:[%s12680_s7 + $0x98] sm:$0xff] }
 0x627   : > { %9328 = vmatprep.subr.bf16.mxu1 %v9327_v23  ;;  %v9383_v26 = vpack.c.bf16 %v7509_v22, %v7508_v37  ;;  %v5387_v37 = vld [vmem:[%s12680_s7 + $0xa8] sm:$0xff]  ;;  %v5389_v22 = vld [vmem:[%s12680_s7 + $0xb8] sm:$0xff] }
 0x62a   : > { %9330 = vmatpush3.bf16.msra.mxu1 %v9327_v23  ;;  %v7510_v23 = vld [vmem:[%s12678_s5 + $0x1d0] sm:$0xff] }
 0x62b   : > { %9332 = vmatprep.subr.bf16.mxu1 %v9331_v39  ;;  %v9387_v38 = vpack.c.bf16 %v7511_v25, %v7510_v23  ;;  %v9463_v23 = vpack.c.bf16 %v5389_v22, %v5387_v37  ;;  %v5386_v25 = vld [vmem:[%s12680_s7 + $0xa0] sm:$0xff] }
 0x62e   : > { %9334 = vmatpush3.bf16.msra.mxu1 %v9331_v39  ;;  %v7512_v39 = vld [vmem:[%s12678_s5 + $0x1e0] sm:$0xff] }
 0x62f   : > { %8924 = vmatprep.subr.msk.mxu1 %vm4182_vm3, %v7464_v40 }
 0x632   : > { %8925 = vmatpush3.msk.msra.mxu1 %vm4182_vm3, %v7464_v40  ;;  %v7513_v40 = vld [vmem:[%s12678_s5 + $0x1e8] sm:$0xff] }
 0x633   : > { %8927 = vmatmul.mubr.msk.f32.vlgmr.msra.gmra.mrb[22].mxu1 %vm4149_vm0, %v4442_v57  ;;  %9336 = vmatprep.subr.bf16.mxu1 %v9335_v54  ;;  %v9391_v42 = vpack.c.bf16 %v7513_v40, %v7512_v39  ;;  %v7521_v57 = vld [vmem:[%s12678_s5 + $0x210] sm:$0xff]  ;;  %v7571_v39 = vld [vmem:[%s12680_s7 + $0x1a8] sm:$0xff]  ;;  %v7573_v40 = vld [vmem:[%s12680_s7 + $0x1b8] sm:$0xff] }
 0x634   : > { %9338 = vmatpush3.bf16.msra.mxu1 %v9335_v54  ;;  %8943 = vmatprep.mubr.msk.f32.mxu1 %vm4149_vm0, %v4537_v29  ;;  %v7519_v54 = vld [vmem:[%s12678_s5 + $0x200] sm:$0xff] }
 0x635   : > { %9340 = vmatprep.subr.bf16.mxu1 %v9339_v56  ;;  %v9395_v58 = vpack.c.bf16 %v7519_v54, %v7518_v53  ;;  %v7572_v53 = vld [vmem:[%s12680_s7 + $0x1b0] sm:$0xff] }
 0x638   : > { %9342 = vmatpush3.bf16.msra.mxu1 %v9339_v56  ;;  %v7520_v56 = vld [vmem:[%s12678_s5 + $0x208] sm:$0xff] }
 0x639   : > { %9344 = vmatprep.subr.bf16.mxu1 %v9343_v60  ;;  %v9399_v29 = vpack.c.bf16 %v7521_v57, %v7520_v56  ;;  %v7575_v57 = vld [vmem:[%s12680_s7 + $0x1c8] sm:$0xff] }
 0x63c   : > { %9346 = vmatpush3.bf16.msra.mxu1 %v9343_v60  ;;  %v7522_v60 = vld [vmem:[%s12678_s5 + $0x218] sm:$0xff] }
 0x63d   : > { %8941 = vmatprep.subr.msk.mxu1 %vm4182_vm3, %v7474_v62 }
 0x640   : > { %8942 = vmatpush3.msk.msra.mxu1 %vm4182_vm3, %v7474_v62  ;;  %v7523_v62 = vld [vmem:[%s12678_s5 + $0x220] sm:$0xff] }
 0x641   : > { %8944 = vmatmul.mubr.msk.f32.vlgmr.msra.gmra.mrb[22].mxu1 %vm4149_vm0, %v4538_v8  ;;  %9348 = vmatprep.subr.bf16.mxu1 %v9347_v6  ;;  %v9403_v1 = vpack.c.bf16 %v7523_v62, %v7522_v60  ;;  %v7576_v60 = vld [vmem:[%s12680_s7 + $0x1d0] sm:$0xff] }
 0x642   : > { %9350 = vmatpush3.bf16.msra.mxu1 %v9347_v6  ;;  %8960 = vmatprep.mubr.msk.f32.mxu1 %vm4149_vm0, %v4633_v11  ;;  %v9443_v11 = vpack.c.bf16 %v5369_v10, %v5367_v9  ;;  %v7585_v9 = vld [vmem:[%s12680_s7 + $0x218] sm:$0xff] }
 0x643   : > { %9352 = vmatprep.subr.bf16.mxu1 %v9351_v7 }
 0x646   : > { %9354 = vmatpush3.bf16.msra.mxu1 %v9351_v7 }
 0x647   : > { %9356 = vmatprep.subr.bf16.mxu1 %v9355_v12 }
 0x64a   : > { %9358 = vmatpush3.bf16.msra.mxu1 %v9355_v12  ;;  %v5366_v12 = vld [vmem:[%s12680_s7] sm:$0xff] }
 0x64b   : > { %8958 = vmatprep.subr.msk.mxu1 %vm4182_vm3, %v7484_v13 }
 0x64e   : > { %8959 = vmatpush3.msk.msra.mxu1 %vm4182_vm3, %v7484_v13  ;;  %v5368_v13 = vld [vmem:[%s12680_s7 + $0x10] sm:$0xff] }
 0x64f   : > { %8961 = vmatmul.mubr.msk.f32.vlgmr.msra.gmra.mrb[22].mxu1 %vm4149_vm0, %v4634_v30  ;;  %9360 = vmatprep.subr.bf16.mxu1 %v9359_v19  ;;  %v9445_v16 = vpack.c.bf16 %v5368_v13, %v5366_v12  ;;  %v5372_v30 = vld [vmem:[%s12680_s7 + $0x30] sm:$0xff] }
 0x650   : > { %9362 = vmatpush3.bf16.msra.mxu1 %v9359_v19  ;;  %8977 = vmatprep.mubr.msk.f32.mxu1 %vm4149_vm0, %v4729_v32  ;;  %v5370_v19 = vld [vmem:[%s12680_s7 + $0x20] sm:$0xff]  ;;  %v7584_v12 = vld [vmem:[%s12680_s7 + $0x210] sm:$0xff] }
 0x651   : > { %9364 = vmatprep.subr.bf16.mxu1 %v9363_v61  ;;  %v9449_v0 = vpack.c.bf16 %v5372_v30, %v5370_v19  ;;  %v5374_v32 = vld [vmem:[%s12680_s7 + $0x40] sm:$0xff]  ;;  %v7588_v19 = vld [vmem:[%s12680_s7 + $0x230] sm:$0xff]  ;;  %v7591_v30 = vld [vmem:[%s12680_s7 + $0x248] sm:$0xff] }
 0x654   : > { %9366 = vmatpush3.bf16.msra.mxu1 %v9363_v61  ;;  %v5375_v61 = vld [vmem:[%s12680_s7 + $0x48] sm:$0xff] }
 0x655   : > { %9368 = vmatprep.subr.bf16.mxu1 %v9367_v34  ;;  %v9451_v31 = vpack.c.bf16 %v5377_v20, %v5375_v61  ;;  %v7593_v61 = vld [vmem:[%s12680_s7 + $0x258] sm:$0xff] }
 0x658   : > { %9370 = vmatpush3.bf16.msra.mxu1 %v9367_v34  ;;  %v5376_v34 = vld [vmem:[%s12680_s7 + $0x50] sm:$0xff] }
 0x659   : > { %8975 = vmatprep.subr.msk.mxu1 %vm4182_vm3, %v7494_v36 }
 0x65c   : > { %8976 = vmatpush3.msk.msra.mxu1 %vm4182_vm3, %v7494_v36  ;;  %v9453_v36 = vpack.c.bf16 %v5376_v34, %v5374_v32  ;;  %v7592_v32 = vld [vmem:[%s12680_s7 + $0x250] sm:$0xff] }
 0x65d   : > { %8978 = vmatmul.mubr.msk.f32.vlgmr.msra.gmra.mrb[22].mxu1 %vm4149_vm0, %v4730_v49  ;;  %9372 = vmatprep.subr.bf16.mxu1 %v9371_v46 }
 0x65e   : > { %9374 = vmatpush3.bf16.msra.mxu1 %v9371_v46  ;;  %8994 = vmatprep.mubr.msk.f32.mxu1 %vm4149_vm0, %v4825_v51  ;;  %v5380_v46 = vld [vmem:[%s12680_s7 + $0x70] sm:$0xff] }
 0x65f   : > { %9376 = vmatprep.subr.bf16.mxu1 %v9375_v47  ;;  %v9457_v49 = vpack.c.bf16 %v5380_v46, %v5378_v17  ;;  %v7594_v17 = vld [vmem:[%s12680_s7 + $0x260] sm:$0xf] }
 0x662   : > { %9378 = vmatpush3.bf16.msra.mxu1 %v9375_v47  ;;  %v5383_v47 = vld [vmem:[%s12680_s7 + $0x88] sm:$0xff] }
 0x663   : > { %9380 = vmatprep.subr.bf16.mxu1 %v9379_v52  ;;  %v9459_v51 = vpack.c.bf16 %v5385_v48, %v5383_v47 }
 0x666   : > { %9382 = vmatpush3.bf16.msra.mxu1 %v9379_v52  ;;  %v5384_v52 = vld [vmem:[%s12680_s7 + $0x90] sm:$0xff] }
 0x667   : > { %8992 = vmatprep.subr.msk.mxu1 %vm4182_vm3, %v7504_v35 }
 0x66a   : > { %8993 = vmatpush3.msk.msra.mxu1 %vm4182_vm3, %v7504_v35  ;;  %v9461_v35 = vpack.c.bf16 %v5384_v52, %v5382_v50  ;;  %v7534_v52 = vld [vmem:[%s12679_s6] ss:$0 sm:$0xff] }
 0x66b   : > { %8995 = vmatmul.mubr.msk.f32.vlgmr.msra.gmra.mrb[22].mxu1 %vm4149_vm0, %v4826_v28  ;;  %9384 = vmatprep.subr.bf16.mxu1 %v9383_v26 }
 0x66c   : > { %9386 = vmatpush3.bf16.msra.mxu1 %v9383_v26  ;;  %9011 = vmatprep.mubr.msk.f32.mxu1 %vm4149_vm0, %v4921_v41  ;;  %v5388_v26 = vld [vmem:[%s12680_s7 + $0xb0] sm:$0xff]  ;;  %v5390_v41 = vld [vmem:[%s12680_s7 + $0xc0] sm:$0xf] }
 0x66d   : > { %9388 = vmatprep.subr.bf16.mxu1 %v9387_v38  ;;  %v9465_v28 = vpack.c.bf16 %v5388_v26, %v5386_v25 }
 0x670   : > { %9390 = vmatpush3.bf16.msra.mxu1 %v9387_v38  ;;  %v5391_v38 = vld [vmem:[%s12680_s7 + $0xc8] sm:$0xf] }
 0x671   : > { %9392 = vmatprep.subr.bf16.mxu1 %v9391_v42 }
 0x674   : > { %9394 = vmatpush3.bf16.msra.mxu1 %v9391_v42  ;;  %v9467_v42 = vpack.c.bf16 %v7573_v40, %v7571_v39  ;;  %v7537_v40 = vld [vmem:[%s12679_s6 + $0x2] ss:$0 sm:$0xff] }
 0x675   : > { %9009 = vmatprep.subr.msk.mxu1 %vm4182_vm3, %v7514_v44 }
 0x678   : > { %9010 = vmatpush3.msk.msra.mxu1 %vm4182_vm3, %v7514_v44  ;;  %v7570_v44 = vld [vmem:[%s12680_s7 + $0x1a0] sm:$0xff] }
 0x679   : > { %9012 = vmatmul.mubr.msk.f32.vlgmr.msra.gmra.mrb[22].mxu1 %vm4149_vm0, %v4922_v59  ;;  %9396 = vmatprep.subr.bf16.mxu1 %v9395_v58  ;;  %v9469_v54 = vpack.c.bf16 %v7572_v53, %v7570_v44  ;;  %v7599_v44 = vld [vmem:[%s12680_s7 + $0x270] sm:$0xff]  ;;  %v7601_v53 = vld [vmem:[%s12680_s7 + $0x280] sm:$0xff] }
 0x67a   : > { %9398 = vmatpush3.bf16.msra.mxu1 %v9395_v58  ;;  %9028 = vmatprep.mubr.msk.f32.mxu1 %vm4149_vm0, %v5017_v63  ;;  %v7577_v58 = vld [vmem:[%s12680_s7 + $0x1d8] sm:$0xff]  ;;  %v7579_v63 = vld [vmem:[%s12680_s7 + $0x1e8] sm:$0xff] }
 0x67b   : > { %9400 = vmatprep.subr.bf16.mxu1 %v9399_v29  ;;  %v9471_v59 = vpack.c.bf16 %v7577_v58, %v7575_v57  ;;  %v9493_v57 = vpack.c.bf16 %v7601_v53, %v7599_v44  ;;  %v7546_v44 = vld [vmem:[%s12680_s7 + $0x110] sm:$0xff] }
 0x67e   : > { %9402 = vmatpush3.bf16.msra.mxu1 %v9399_v29  ;;  %v7574_v29 = vld [vmem:[%s12680_s7 + $0x1c0] sm:$0xff] }
 0x67f   : > { %9404 = vmatprep.subr.bf16.mxu1 %v9403_v1  ;;  %v9473_v62 = vpack.c.bf16 %v7576_v60, %v7574_v29  ;;  %v7605_v29 = vld [vmem:[%s12680_s7 + $0x2a0] sm:$0xff] }
 0x682   : > { %9406 = vmatpush3.bf16.msra.mxu1 %v9403_v1  ;;  %v7581_v1 = vld [vmem:[%s12680_s7 + $0x1f8] sm:$0xff] }
 0x683   : > { %9026 = vmatprep.subr.msk.mxu1 %vm4182_vm3, %v7524_v3 }
 0x686   : > { %9027 = vmatpush3.msk.msra.mxu1 %vm4182_vm3, %v7524_v3  ;;  %v9475_v3 = vpack.c.bf16 %v7581_v1, %v7579_v63  ;;  %v7610_v63 = vld [vmem:[%s12680_s7 + $0x2c8] sm:$0xff]  ;;  %vm6915_vm3 = vcmask 130048  }
 0x687   : > { %9029 = vmatmul.mubr.msk.f32.vlgmr.msra.gmra.mrb[22].mxu1 %vm4149_vm0, %v5018_v5  ;;  %9407 = vmatprep.subr.bf16.mxu1 %v10146_v2  ;;  %v7578_v5 = vld [vmem:[%s12680_s7 + $0x1e0] sm:$0xff] }
 0x688   : > { %9035 = vmatprep.mubr.msk.f32.mxu1 %vm10147_vm1, %v10148_v4 }
 0x75a   : > { %v9030_v6 = vpop.f32.mrb[22].mxu1 }
 0x75b   : > { %v5102_v7 = vpop.f32.mrb[23].mxu1 }
 0x75c   : > { %v9408_v8 = vpack.c.bf16 %v9030_v6, %v5102_v7  ;;  %v7580_v6 = vld [vmem:[%s12680_s7 + $0x1f0] sm:$0xff] }
 0x75d   : > { %v9477_v7 = vpack.c.bf16 %v7580_v6, %v7578_v5  ;;  %v7607_v5 = vld [vmem:[%s12680_s7 + $0x2b0] sm:$0xff]  ;;  %v7609_v6 = vld [vmem:[%s12680_s7 + $0x2c0] sm:$0xff] }
 0x75e   : > { %9410 = vmatpush3.bf16.msk.msra.mxu1 %vm10979_vm6, %v9408_v8 }
 0x75f   : > { %9411 = vmatprep.subr.bf16.mxu1 %v10146_v2 }
 0x761   : > { %9036 = vmatmul.mubr.msk.f32.vlgmr.msra.gmra.mrb[24].mxu1 %vm5113_vm9, %v10862_v27 }
 0x762   : > { %9414 = vmatpush3.bf16.msk.msra.mxu1 %vm10979_vm6, %v9408_v8  ;;  %9042 = vmatprep.mubr.msk.f32.mxu1 %vm10147_vm1, %v10148_v4 }
 0x763   : > { %9415 = vmatprep.subr.bf16.mxu1 %v10146_v2 }
 0x765   : > { %9043 = vmatmul.mubr.msk.f32.vlgmr.msra.gmra.mrb[26].mxu1 %vm5113_vm9, %v10909_v21 }
 0x766   : > { %9418 = vmatpush3.bf16.msk.msra.mxu1 %vm10979_vm6, %v9408_v8  ;;  %9049 = vmatprep.mubr.msk.f32.mxu1 %vm10147_vm1, %v10148_v4  ;;  %vm5359_vm6 = vcmask 818176   ;;  %v7583_v8 = vld [vmem:[%s12680_s7 + $0x208] sm:$0xff] }
 0x767   : > { %9444 = vmatprep.subr.bf16.mxu1 %v9443_v11  ;;  %5360 = vst.msk [vmem:[#allocation5] sm:$0xff] %vm5359_vm6, %v10148_v4  ;;  %v9479_v10 = vpack.c.bf16 %v7585_v9, %v7583_v8  ;;  %v7582_v11 = vld [vmem:[%s12680_s7 + $0x200] sm:$0xff]  ;;  %v7614_v8 = vld [vmem:[%s12680_s7 + $0x2e8] sm:$0xff]  ;;  %v9501_v9 = vpack.c.bf16 %v7609_v6, %v7607_v5  ;;  %v7638_v5 = vld [vmem:[%s12680_s7 + $0x390] sm:$0xff] }
 0x768   : > { %v9481_v13 = vpack.c.bf16 %v7584_v12, %v7582_v11  ;;  %v7611_v11 = vld [vmem:[%s12680_s7 + $0x2d0] sm:$0xff]  ;;  %v7613_v12 = vld [vmem:[%s12680_s7 + $0x2e0] sm:$0xff]  ;;  %v7641_v6 = vld [vmem:[%s12680_s7 + $0x3a8] sm:$0xff] }
 0x769   : > { %9050 = vmatmul.mubr.msk.f32.vlgmr.msra.gmra.mrb[28].mxu1 %vm5113_vm9, %v10939_v45 }
 0x76a   : > { %9446 = vmatpush1.bf16.msra.mxu1 %v9445_v16  ;;  %5574 = vmatprep.mubr.f32.mxu1 %v10148_v4  ;;  %v7586_v16 = vld [vmem:[%s12680_s7 + $0x220] sm:$0xff] }
 0x76b   : > { %9448 = vmatprep.subr.bf16.mxu1 %v9447_v18  ;;  %v9483_v18 = vpack.c.bf16 %v7589_v15, %v7587_v14  ;;  %v9485_v20 = vpack.c.bf16 %v7588_v19, %v7586_v16  ;;  %v7618_v14 = vld [vmem:[%s12680_s7 + $0x308] sm:$0xff]  ;;  %v9505_v15 = vpack.c.bf16 %v7613_v12, %v7611_v11  ;;  %v7615_v16 = vld [vmem:[%s12680_s7 + $0x2f0] sm:$0xff]  ;;  %v7617_v19 = vld [vmem:[%s12680_s7 + $0x300] sm:$0xff] }
 0x76c   : > { %v7552_v12 = vld [vmem:[%s12680_s7 + $0x140] sm:$0xff] }
 0x76e   : > { %9450 = vmatpush1.bf16.msra.mxu1 %v9449_v0  ;;  %v5365_v56 = vld [vmem:[#allocation5] sm:$0x7]  ;;  %v9487_v0 = vpack.c.bf16 %v7593_v61, %v7591_v30  ;;  %v7620_v30 = vld [vmem:[%s12680_s7 + $0x318] sm:$0xff]  ;;  %v7622_v61 = vld [vmem:[%s12680_s7 + $0x328] sm:$0xff] }
 0x76f   : > { %9452 = vmatprep.subr.bf16.mxu1 %v9451_v31  ;;  %v7590_v31 = vld [vmem:[%s12680_s7 + $0x240] sm:$0xff] }
 0x770   : > { %v9489_v34 = vpack.c.bf16 %v7592_v32, %v7590_v31  ;;  %v7538_v31 = vld [vmem:[%s12680_s7 + $0xd0] sm:$0xff] }
 0x772   : > { %9454 = vmatpush1.bf16.msra.mxu1 %v9453_v36  ;;  %v7595_v36 = vld [vmem:[%s12680_s7 + $0x268] sm:$0xf] }
 0x773   : > { %9456 = vmatprep.subr.bf16.mxu1 %v9455_v33  ;;  %v9491_v33 = vpack.c.bf16 %v7602_v55, %v7600_v43  ;;  %v9511_v55 = vpack.c.bf16 %v7622_v61, %v7620_v30  ;;  %v7647_v30 = vld [vmem:[%s12680_s7 + $0x3d8] sm:$0xff] }
 0x776   : > { %9458 = vmatpush1.bf16.msra.mxu1 %v9457_v49 }
 0x777   : > { %9460 = vmatprep.subr.bf16.mxu1 %v9459_v51 }
 0x77a   : > { %9462 = vmatpush1.bf16.msra.mxu1 %v9461_v35 }
 0x77b   : > { %9464 = vmatprep.subr.bf16.mxu1 %v9463_v23 }
 0x77e   : > { %9466 = vmatpush1.bf16.msra.mxu1 %v9465_v28 }
 0x77f   : > { %7567 = vmatprep.subr.msk.mxu1 %vm5423_vm10, %v5391_v38  ;;  %v7536_v38 = vld [vmem:[%s12679_s6 + $0x1] ss:$0 sm:$0xff] }
 0x782   : > { %7568 = vmatpush1.msk.msra.mxu1 %vm5423_vm10, %v5390_v41 }
 0x783   : > { %9468 = vmatprep.subr.bf16.mxu1 %v9467_v42  ;;  %7569 = vmatmul.mubr.msk.f32.vlgmr.msra.gmra.mrb[30].mxu1 %vm5359_vm6, %v5365_v56  ;;  %v7606_v56 = vld [vmem:[%s12680_s7 + $0x2a8] sm:$0xff] }
 0x784   : > { %9470 = vmatpush1.bf16.msra.mxu1 %v9469_v54  ;;  %5682 = vmatprep.mubr.f32.mxu1 %v10148_v4  ;;  %v7604_v54 = vld [vmem:[%s12680_s7 + $0x298] sm:$0xff] }
 0x785   : > { %9472 = vmatprep.subr.bf16.mxu1 %v9471_v59  ;;  %v9495_v58 = vpack.c.bf16 %v7606_v56, %v7604_v54  ;;  %v7603_v59 = vld [vmem:[%s12680_s7 + $0x290] sm:$0xff]  ;;  %v7632_v54 = vld [vmem:[%s12680_s7 + $0x360] sm:$0xff] }
 0x786   : > { %v9497_v1 = vpack.c.bf16 %v7605_v29, %v7603_v59  ;;  %v7634_v56 = vld [vmem:[%s12680_s7 + $0x370] sm:$0xff]  ;;  %v7637_v29 = vld [vmem:[%s12680_s7 + $0x388] sm:$0xff] }
 0x788   : > { %9474 = vmatpush1.bf16.msra.mxu1 %v9473_v62  ;;  %v7608_v62 = vld [vmem:[%s12680_s7 + $0x2b8] sm:$0xff] }
 0x789   : > { %9476 = vmatprep.subr.bf16.mxu1 %v9475_v3  ;;  %v9499_v3 = vpack.c.bf16 %v7610_v63, %v7608_v62  ;;  %v9521_v63 = vpack.c.bf16 %v7634_v56, %v7632_v54  ;;  %v7563_v56 = vld [vmem:[%s12680_s7 + $0x198] sm:$0xf] }
 0x78c   : > { %9478 = vmatpush1.bf16.msra.mxu1 %v9477_v7  ;;  %v7612_v7 = vld [vmem:[%s12680_s7 + $0x2d8] sm:$0xff] }
 0x78d   : > { %9480 = vmatprep.subr.bf16.mxu1 %v9479_v10  ;;  %v9503_v10 = vpack.c.bf16 %v7614_v8, %v7612_v7  ;;  %v7643_v7 = vld [vmem:[%s12680_s7 + $0x3b8] sm:$0xff] }
 0x78e   : > { %v7551_v8 = vld [vmem:[%s12680_s7 + $0x138] sm:$0xff] }
 0x790   : > { %9482 = vmatpush1.bf16.msra.mxu1 %v9481_v13  ;;  %v7616_v13 = vld [vmem:[%s12680_s7 + $0x2f8] sm:$0xff] }
 0x791   : > { %9484 = vmatprep.subr.bf16.mxu1 %v9483_v18  ;;  %v9507_v18 = vpack.c.bf16 %v7618_v14, %v7616_v13 }
 0x794   : > { %9486 = vmatpush1.bf16.msra.mxu1 %v9485_v20  ;;  %v7539_v20 = vld [vmem:[%s12680_s7 + $0xd8] sm:$0xff] }
 0x795   : > { %9488 = vmatprep.subr.bf16.mxu1 %v9487_v0  ;;  %v7541_v0 = vld [vmem:[%s12680_s7 + $0xe8] sm:$0xff] }
 0x796   : > { %v9419_v32 = vpack.c.bf16 %v7541_v0, %v7539_v20  ;;  %v7644_v20 = vld [vmem:[%s12680_s7 + $0x3c0] sm:$0xff] }
 0x798   : > { %9490 = vmatpush1.bf16.msra.mxu1 %v9489_v34  ;;  %v7540_v34 = vld [vmem:[%s12680_s7 + $0xe0] sm:$0xff]  ;;  %9420 = vmatprep.subr.bf16.mxu0 %v9419_v32  ;;  %v7649_v32 = vld [vmem:[%s12680_s7 + $0x3e8] sm:$0xff] }
 0x799   : > { %7596 = vmatprep.subr.msk.mxu1 %vm5423_vm10, %v7595_v36  ;;  %v9509_v36 = vpack.c.bf16 %v7617_v19, %v7615_v16  ;;  %v9421_v43 = vpack.c.bf16 %v7540_v34, %v7538_v31  ;;  %v7640_v16 = vld [vmem:[%s12680_s7 + $0x3a0] sm:$0xff]  ;;  %v7645_v19 = vld [vmem:[%s12680_s7 + $0x3c8] sm:$0xff]  ;;  %v7646_v31 = vld [vmem:[%s12680_s7 + $0x3d0] sm:$0xff] }
 0x79a   : > { %v9531_v0 = vpack.c.bf16 %v7647_v30, %v7645_v19  ;;  %v7651_v34 = vld [vmem:[%s12680_s7 + $0x3f8] sm:$0xff]  ;;  %v7673_v19 = vld [vmem:[%s12680_s7 + $0x490] sm:$0xff]  ;;  %v7675_v30 = vld [vmem:[%s12680_s7 + $0x4a0] sm:$0xff] }
 0x79b   : > { %9422 = vmatpush1.bf16.msra.mxu0 %v9421_v43  ;;  %v7557_v43 = vld [vmem:[%s12680_s7 + $0x168] sm:$0xff] }
 0x79c   : > { %7597 = vmatpush1.msk.msra.mxu1 %vm5423_vm10, %v7594_v17  ;;  %v7619_v17 = vld [vmem:[%s12680_s7 + $0x310] sm:$0xff] }
 0x79d   : > { %9492 = vmatprep.subr.bf16.mxu1 %v9491_v33  ;;  %v7621_v33 = vld [vmem:[%s12680_s7 + $0x320] sm:$0xff] }
 0x834   : > { %v5185_v46 = vpop.f32.mrb[24].mxu1 }
 0x835   : > { %v9037_v49 = vpop.f32.mrb[25].mxu1 }
 0x836   : > { %v7545_v49 = vld [vmem:[%s12680_s7 + $0x108] sm:$0xff] }
 0x838   : > { %v5257_v47 = vpop.f32.mrb[26].mxu1 }
 0x839   : > { %v5261_v48 = vmax.f32 %v5185_v46, %v5257_v47  ;;  %v9044_v50 = vpop.f32.mrb[27].mxu1  ;;  %v7543_v46 = vld [vmem:[%s12680_s7 + $0xf8] sm:$0xff]  ;;  %v9513_v47 = vpack.c.bf16 %v7621_v33, %v7619_v17  ;;  %v7556_v33 = vld [vmem:[%s12680_s7 + $0x160] sm:$0xff] }
 0x83a   : > { %v7624_v50 = vld [vmem:[%s12680_s7 + $0x338] sm:$0xf] }
 0x83c   : > { %v5330_v51 = vpop.f32.mrb[28].mxu1 }
 0x83d   : > { %v5334_v35 = vmax.f32 %v5261_v48, %v5330_v51  ;;  %v9051_v37 = vpop.f32.mrb[29].mxu1  ;;  %v9423_v48 = vpack.c.bf16 %v7545_v49, %v7543_v46  ;;  %v7629_v51 = vld [vmem:[%s12680_s7 + $0x348] sm:$0xff]  ;;  %v9533_v46 = vpack.c.bf16 %v7646_v31, %v7644_v20 }
 0x83e   : > { %v7544_v37 = vld [vmem:[%s12680_s7 + $0x100] sm:$0xff]  ;;  %v7680_v20 = vld [vmem:[%s12680_s7 + $0x4c8] sm:$0xff] }
 0x83f   : > { %v5340_v22 = vadd.f32 %v7534_v52, %v5334_v35  ;;  %v7631_v52 = vld [vmem:[%s12680_s7 + $0x358] sm:$0xff]  ;;  %9424 = vmatprep.subr.bf16.mxu0 %v9423_v48  ;;  %v7542_v35 = vld [vmem:[%s12680_s7 + $0xf0] sm:$0xff]  ;;  %v7648_v48 = vld [vmem:[%s12680_s7 + $0x3e0] sm:$0xff] }
 0x841   : > { %v5342_v23 = vmin.f32 %v5340_v22, 0.0  ;;  %vm5341_vm12 = vcmp.gt.f32.partialorder %v5340_v22, 0.0 }
 0x843   : > { %v5343_v25 = vmul.f32 1.442695, %v5342_v23  ;;  %v7630_v23 = vld [vmem:[%s12680_s7 + $0x350] sm:$0xff] }
 0x845   : > { %10070 = vpow2.f32 %v5343_v25  ;;  %v9425_v25 = vpack.c.bf16 %v7544_v37, %v7542_v35  ;;  %v7558_v37 = vld [vmem:[%s12680_s7 + $0x170] sm:$0xff] }
 0x847   : > { %9426 = vmatpush1.bf16.msra.mxu0 %v9425_v25 }
 0x84f   : > { %v10071_v26 = vpop.eup %10070 }
 0x850   : > { %v7535_v28 = vadd.f32 -1.0, %v10071_v26  ;;  %v7633_v26 = vld [vmem:[%s12680_s7 + $0x368] sm:$0xff] }
 0x852   : > { %v5346_v39 = vsel %vm5341_vm12, %v5340_v22, %v7535_v28  ;;  %v7628_v22 = vld [vmem:[%s12680_s7 + $0x340] sm:$0xff]  ;;  %v7635_v28 = vld [vmem:[%s12680_s7 + $0x378] sm:$0xff] }
 0x853   : > { %v5352_v41 = vmul.f32 %v7536_v38, %v5346_v39  ;;  %v7623_v38 = vld [vmem:[%s12680_s7 + $0x330] sm:$0xf]  ;;  %v9515_v39 = vpack.c.bf16 %v7631_v52, %v7629_v51  ;;  %v9519_v53 = vpack.c.bf16 %v7635_v28, %v7633_v26  ;;  %v7559_v51 = vld [vmem:[%s12680_s7 + $0x178] sm:$0xff]  ;;  %v7561_v52 = vld [vmem:[%s12680_s7 + $0x188] sm:$0xff] }
 0x854   : > { %v9439_v35 = vpack.c.bf16 %v7561_v52, %v7559_v51  ;;  %v7653_v26 = vld [vmem:[%s12680_s7 + $0x408] sm:$0xf]  ;;  %v7658_v28 = vld [vmem:[%s12680_s7 + $0x418] sm:$0xff] }
 0x855   : > { %v5358_v42 = vadd.f32 %v7537_v40, %v5352_v41  ;;  %v9517_v40 = vpack.c.bf16 %v7630_v23, %v7628_v22  ;;  %v7547_v41 = vld [vmem:[%s12680_s7 + $0x118] sm:$0xff]  ;;  %v7560_v22 = vld [vmem:[%s12680_s7 + $0x180] sm:$0xff] }
 0x856   : > { %v9441_v25 = vpack.c.bf16 %v7560_v22, %v7558_v37  ;;  %v7692_v37 = vld [vmem:[%s12680_s7 + $0x510] sm:$0xff] }
 0x857   : > { %5364 = vst.msk [vmem:[#allocation5 + $0x4] sm:$0x7] %vm5363_vm13, %v5358_v42  ;;  %v7549_v42 = vld [vmem:[%s12680_s7 + $0x128] sm:$0xff] }
 0x85e   : > { %v5581_v60 = vld [vmem:[#allocation5 + $0x2] sm:$0x7]  ;;  %v5911_v22 = vld [vmem:[#allocation5 + $0x5] sm:$0x7] }
 0x85f   : > { %7598 = vmatmul.mubr.msk.f32.vlgmr.msra.gmra.mrb[30].mxu1 %vm5359_vm6, %v5581_v60  ;;  %v5691_v59 = vld [vmem:[#allocation5 + $0x3] sm:$0x7]  ;;  %v7639_v60 = vld [vmem:[%s12680_s7 + $0x398] sm:$0xff] }
 0x860   : > { %9494 = vmatpush1.bf16.msra.mxu1 %v9493_v57  ;;  %5792 = vmatprep.mubr.f32.mxu1 %v10148_v4  ;;  %v9427_v57 = vpack.c.bf16 %v7549_v42, %v7547_v41  ;;  %v7662_v41 = vld [vmem:[%s12680_s7 + $0x438] sm:$0xff]  ;;  %v7664_v42 = vld [vmem:[%s12680_s7 + $0x448] sm:$0xff] }
 0x861   : > { %9496 = vmatprep.subr.bf16.mxu1 %v9495_v58  ;;  %v7548_v58 = vld [vmem:[%s12680_s7 + $0x120] sm:$0xff] }
 0x862   : > { %v9429_v62 = vpack.c.bf16 %v7548_v58, %v7546_v44  ;;  %9428 = vmatprep.subr.bf16.mxu0 %v9427_v57  ;;  %v7652_v44 = vld [vmem:[%s12680_s7 + $0x400] sm:$0xf]  ;;  %v7562_v57 = vld [vmem:[%s12680_s7 + $0x190] sm:$0xf]  ;;  %v9543_v58 = vpack.c.bf16 %v7664_v42, %v7662_v41  ;;  %v7701_v41 = vld [vmem:[%s12680_s7 + $0x558] sm:$0xff] }
 0x864   : > { %9498 = vmatpush1.bf16.msra.mxu1 %v9497_v1  ;;  %v7636_v1 = vld [vmem:[%s12680_s7 + $0x380] sm:$0xff]  ;;  %9430 = vmatpush1.bf16.msra.mxu0 %v9429_v62 }
 0x865   : > { %9500 = vmatprep.subr.bf16.mxu1 %v9499_v3  ;;  %v9523_v3 = vpack.c.bf16 %v7639_v60, %v7637_v29  ;;  %v9525_v13 = vpack.c.bf16 %v7638_v5, %v7636_v1  ;;  %v7663_v29 = vld [vmem:[%s12680_s7 + $0x440] sm:$0xff]  ;;  %v7666_v60 = vld [vmem:[%s12680_s7 + $0x458] sm:$0xff] }
 0x866   : > { %v5801_v62 = vld [vmem:[#allocation5 + $0x4] sm:$0x7]  ;;  %v5392_v1 = vld [vmem:[#allocation5 + $0x1] sm:$0x7] }
 0x868   : > { %9502 = vmatpush1.bf16.msra.mxu1 %v9501_v9  ;;  %v7553_v9 = vld [vmem:[%s12680_s7 + $0x148] sm:$0xff] }
 0x869   : > { %9504 = vmatprep.subr.bf16.mxu1 %v9503_v10  ;;  %v7550_v10 = vld [vmem:[%s12680_s7 + $0x130] sm:$0xff]  ;;  %v9431_v11 = vpack.c.bf16 %v7553_v9, %v7551_v8  ;;  %v7670_v8 = vld [vmem:[%s12680_s7 + $0x478] sm:$0xff]  ;;  %v7672_v9 = vld [vmem:[%s12680_s7 + $0x488] sm:$0xff] }
 0x86a   : > { %v9433_v14 = vpack.c.bf16 %v7552_v12, %v7550_v10  ;;  %v7669_v12 = vld [vmem:[%s12680_s7 + $0x470] sm:$0xff] }
 0x86b   : > { %9432 = vmatprep.subr.bf16.mxu0 %v9431_v11  ;;  %v9551_v11 = vpack.c.bf16 %v7672_v9, %v7670_v8  ;;  %v7711_v8 = vld [vmem:[%s12680_s7 + $0x5a8] sm:$0xf]  ;;  %v7716_v9 = vld [vmem:[%s12680_s7 + $0x5b8] sm:$0xff] }
 0x86c   : > { %9506 = vmatpush1.bf16.msra.mxu1 %v9505_v15  ;;  %v9527_v15 = vpack.c.bf16 %v7643_v7, %v7641_v6  ;;  %9434 = vmatpush1.bf16.msra.mxu0 %v9433_v14  ;;  %v7665_v6 = vld [vmem:[%s12680_s7 + $0x450] sm:$0xff]  ;;  %v7667_v7 = vld [vmem:[%s12680_s7 + $0x460] sm:$0xff]  ;;  %v7674_v14 = vld [vmem:[%s12680_s7 + $0x498] sm:$0xff] }
 0x86d   : > { %9508 = vmatprep.subr.bf16.mxu1 %v9507_v18  ;;  %v7642_v18 = vld [vmem:[%s12680_s7 + $0x3b0] sm:$0xff]  ;;  %v9549_v10 = vpack.c.bf16 %v7667_v7, %v7665_v6 }
 0x86e   : > { %v9529_v61 = vpack.c.bf16 %v7642_v18, %v7640_v16  ;;  %v7708_v6 = vld [vmem:[%s12680_s7 + $0x590] sm:$0xff] }
 0x870   : > { %9510 = vmatpush1.bf16.msra.mxu1 %v9509_v36  ;;  %v7555_v36 = vld [vmem:[%s12680_s7 + $0x158] sm:$0xff] }
 0x871   : > { %9512 = vmatprep.subr.bf16.mxu1 %v9511_v55  ;;  %v7554_v55 = vld [vmem:[%s12680_s7 + $0x150] sm:$0xff]  ;;  %v9435_v17 = vpack.c.bf16 %v7557_v43, %v7555_v36  ;;  %v7682_v43 = vld [vmem:[%s12680_s7 + $0x4d8] sm:$0xf] }
 0x872   : > { %v9437_v49 = vpack.c.bf16 %v7556_v33, %v7554_v55  ;;  %v7687_v55 = vld [vmem:[%s12680_s7 + $0x4e8] sm:$0xff]  ;;  %v7686_v33 = vld [vmem:[%s12680_s7 + $0x4e0] sm:$0xff] }
 0x873   : > { %9436 = vmatprep.subr.bf16.mxu0 %v9435_v17  ;;  %v7689_v17 = vld [vmem:[%s12680_s7 + $0x4f8] sm:$0xff] }
 0x874   : > { %9514 = vmatpush1.bf16.msra.mxu1 %v9513_v47  ;;  %v9535_v47 = vpack.c.bf16 %v7651_v34, %v7649_v32  ;;  %9438 = vmatpush1.bf16.msra.mxu0 %v9437_v49  ;;  %v7677_v32 = vld [vmem:[%s12680_s7 + $0x4b0] sm:$0xff]  ;;  %v7679_v34 = vld [vmem:[%s12680_s7 + $0x4c0] sm:$0xff]  ;;  %v7691_v49 = vld [vmem:[%s12680_s7 + $0x508] sm:$0xff] }
 0x875   : > { %7625 = vmatprep.subr.msk.mxu1 %vm5423_vm10, %v7624_v50  ;;  %v7650_v50 = vld [vmem:[%s12680_s7 + $0x3f0] sm:$0xff]  ;;  %9440 = vmatprep.subr.bf16.mxu0 %v9439_v35  ;;  %v9561_v36 = vpack.c.bf16 %v7679_v34, %v7677_v32  ;;  %v7690_v35 = vld [vmem:[%s12680_s7 + $0x500] sm:$0xff] }
 0x876   : > { %v9537_v23 = vpack.c.bf16 %v7650_v50, %v7648_v48  ;;  %v7681_v48 = vld [vmem:[%s12680_s7 + $0x4d0] sm:$0xf]  ;;  %v9563_v50 = vpack.c.bf16 %v7689_v17, %v7687_v55  ;;  %v7728_v55 = vld [vmem:[%s12680_s7 + $0x618] sm:$0xff]  ;;  %v7730_v17 = vld [vmem:[%s12680_s7 + $0x628] sm:$0xff] }
 0x878   : > { %7626 = vmatpush1.msk.msra.mxu1 %vm5423_vm10, %v7623_v38  ;;  %v7660_v38 = vld [vmem:[%s12680_s7 + $0x428] sm:$0xff]  ;;  %9442 = vmatpush1.bf16.msra.mxu0 %v9441_v25  ;;  %v7697_v25 = vld [vmem:[%s12680_s7 + $0x538] sm:$0xff] }
 0x879   : > { %7627 = vmatmul.mubr.msk.f32.vlgmr.msra.gmra.mrb[30].mxu1 %vm5359_vm6, %v5691_v59  ;;  %9516 = vmatprep.subr.bf16.mxu1 %v9515_v39  ;;  %v7657_v39 = vld [vmem:[%s12680_s7 + $0x410] sm:$0xff] }
 0x87a   : > { %9518 = vmatpush1.bf16.msra.mxu1 %v9517_v40  ;;  %5902 = vmatprep.mubr.f32.mxu1 %v10148_v4  ;;  %v7659_v40 = vld [vmem:[%s12680_s7 + $0x420] sm:$0xff]  ;;  %v7661_v59 = vld [vmem:[%s12680_s7 + $0x430] sm:$0xff] }
 0x87b   : > { %9520 = vmatprep.subr.bf16.mxu1 %v9519_v53  ;;  %v9539_v53 = vpack.c.bf16 %v7660_v38, %v7658_v28  ;;  %v9541_v54 = vpack.c.bf16 %v7659_v40, %v7657_v39  ;;  %7564 = vmatprep.subr.msk.mxu0 %vm5423_vm10, %v7563_v56  ;;  %v7694_v38 = vld [vmem:[%s12680_s7 + $0x520] sm:$0xff]  ;;  %v7696_v39 = vld [vmem:[%s12680_s7 + $0x530] sm:$0xff]  ;;  %v7699_v40 = vld [vmem:[%s12680_s7 + $0x548] sm:$0xff] }
 0x87c   : > { %7565 = vmatpush1.msk.msra.mxu0 %vm5423_vm10, %v7562_v57  ;;  %v9573_v42 = vpack.c.bf16 %v7696_v39, %v7694_v38  ;;  %v7703_v56 = vld [vmem:[%s12680_s7 + $0x568] sm:$0xff]  ;;  %v7705_v57 = vld [vmem:[%s12680_s7 + $0x578] sm:$0xff]  ;;  %v7737_v38 = vld [vmem:[%s12680_s7 + $0x660] sm:$0xff] }
 0x87d   : > { %7566 = vmatmul.mubr.msk.f32.vlgmr.msra.gmra.mrb[22].mxu0 %vm5359_vm6, %v5392_v1 }
 0x87e   : > { %9522 = vmatpush1.bf16.msra.mxu1 %v9521_v63  ;;  %v7668_v63 = vld [vmem:[%s12680_s7 + $0x468] sm:$0xff]  ;;  %6534 = vmatprep.mubr.f32.mxu0 %v10148_v4 }
 0x87f   : > { %9524 = vmatprep.subr.bf16.mxu1 %v9523_v3  ;;  %v9545_v3 = vpack.c.bf16 %v7663_v29, %v7661_v59  ;;  %v9547_v5 = vpack.c.bf16 %v7668_v63, %v7666_v60  ;;  %v9579_v59 = vpack.c.bf16 %v7705_v57, %v7703_v56  ;;  %v7702_v29 = vld [vmem:[%s12680_s7 + $0x560] sm:$0xff]  ;;  %v7704_v60 = vld [vmem:[%s12680_s7 + $0x570] sm:$0xff]  ;;  %v7709_v63 = vld [vmem:[%s12680_s7 + $0x598] sm:$0xff] }
 0x880   : > { %v9581_v1 = vpack.c.bf16 %v7704_v60, %v7702_v29  ;;  %v7751_v56 = vld [vmem:[%s12680_s7 + $0x6b8] sm:$0xff]  ;;  %v7739_v57 = vld [vmem:[%s12680_s7 + $0x670] sm:$0xf] }
 0x882   : > { %9526 = vmatpush1.bf16.msra.mxu1 %v9525_v13  ;;  %v7671_v13 = vld [vmem:[%s12680_s7 + $0x480] sm:$0xff] }
 0x883   : > { %9528 = vmatprep.subr.bf16.mxu1 %v9527_v15  ;;  %v7676_v15 = vld [vmem:[%s12680_s7 + $0x4a8] sm:$0xff]  ;;  %v9553_v16 = vpack.c.bf16 %v7671_v13, %v7669_v12  ;;  %v7717_v12 = vld [vmem:[%s12680_s7 + $0x5c0] sm:$0xff]  ;;  %v7720_v13 = vld [vmem:[%s12680_s7 + $0x5d8] sm:$0xff] }
 0x884   : > { %v9555_v18 = vpack.c.bf16 %v7676_v15, %v7674_v14  ;;  %v7722_v14 = vld [vmem:[%s12680_s7 + $0x5e8] sm:$0xff]  ;;  %v7710_v15 = vld [vmem:[%s12680_s7 + $0x5a0] sm:$0xf] }
 0x886   : > { %9530 = vmatpush1.bf16.msra.mxu1 %v9529_v61  ;;  %v7678_v61 = vld [vmem:[%s12680_s7 + $0x4b8] sm:$0xff] }
 0x887   : > { %9532 = vmatprep.subr.bf16.mxu1 %v9531_v0  ;;  %v9557_v0 = vpack.c.bf16 %v7675_v30, %v7673_v19  ;;  %v9559_v31 = vpack.c.bf16 %v7680_v20, %v7678_v61  ;;  %v9591_v19 = vpack.c.bf16 %v7722_v14, %v7720_v13  ;;  %v7719_v30 = vld [vmem:[%s12680_s7 + $0x5d0] sm:$0xff]  ;;  %v7721_v61 = vld [vmem:[%s12680_s7 + $0x5e0] sm:$0xff] }
 0x888   : > { %v6021_v20 = vld [vmem:[#allocation5 + $0x6] sm:$0x7]  ;;  %v9593_v32 = vpack.c.bf16 %v7721_v61, %v7719_v30  ;;  %v7758_v14 = vld [vmem:[%s12680_s7 + $0x6f0] sm:$0xff] }
 0x889   : > { %v7756_v13 = vld [vmem:[%s12680_s7 + $0x6e0] sm:$0xff]  ;;  %v7762_v61 = vld [vmem:[%s12680_s7 + $0x710] sm:$0xff] }
 0x88a   : > { %9534 = vmatpush1.bf16.msra.mxu1 %v9533_v46  ;;  %v7688_v46 = vld [vmem:[%s12680_s7 + $0x4f0] sm:$0xff]  ;;  %v7760_v30 = vld [vmem:[%s12680_s7 + $0x700] sm:$0xff] }
 0x88b   : > { %9536 = vmatprep.subr.bf16.mxu1 %v9535_v47  ;;  %v7693_v47 = vld [vmem:[%s12680_s7 + $0x518] sm:$0xff]  ;;  %v9565_v51 = vpack.c.bf16 %v7688_v46, %v7686_v33  ;;  %v9599_v46 = vpack.c.bf16 %v7730_v17, %v7728_v55  ;;  %v7769_v55 = vld [vmem:[%s12680_s7 + $0x748] sm:$0xf] }
 0x88c   : > { %v9567_v52 = vpack.c.bf16 %v7693_v47, %v7691_v49  ;;  %v7727_v49 = vld [vmem:[%s12680_s7 + $0x610] sm:$0xff]  ;;  %v7729_v47 = vld [vmem:[%s12680_s7 + $0x620] sm:$0xff]  ;;  %v7774_v17 = vld [vmem:[%s12680_s7 + $0x758] sm:$0xff] }
 0x88e   : > { %9538 = vmatpush1.bf16.msra.mxu1 %v9537_v23  ;;  %v7695_v23 = vld [vmem:[%s12680_s7 + $0x528] sm:$0xff] }
 0x88f   : > { %7654 = vmatprep.subr.msk.mxu1 %vm5423_vm10, %v7653_v26  ;;  %v9569_v26 = vpack.c.bf16 %v7692_v37, %v7690_v35  ;;  %v9571_v28 = vpack.c.bf16 %v7697_v25, %v7695_v23  ;;  %v7731_v35 = vld [vmem:[%s12680_s7 + $0x630] sm:$0xff]  ;;  %v7733_v37 = vld [vmem:[%s12680_s7 + $0x640] sm:$0xff]  ;;  %v7738_v23 = vld [vmem:[%s12680_s7 + $0x668] sm:$0xff] }
 0x890   : > { %v9605_v25 = vpack.c.bf16 %v7733_v37, %v7731_v35 }
 0x892   : > { %7655 = vmatpush1.msk.msra.mxu1 %vm5423_vm10, %v7652_v44  ;;  %v9575_v44 = vpack.c.bf16 %v7701_v41, %v7699_v40  ;;  %v7740_v40 = vld [vmem:[%s12680_s7 + $0x678] sm:$0xf]  ;;  %v7745_v41 = vld [vmem:[%s12680_s7 + $0x688] sm:$0xff] }
 0x893   : > { %7656 = vmatmul.mubr.msk.f32.vlgmr.msra.gmra.mrb[30].mxu1 %vm5359_vm6, %v5801_v62  ;;  %9540 = vmatprep.subr.bf16.mxu1 %v9539_v53  ;;  %v7698_v53 = vld [vmem:[%s12680_s7 + $0x540] sm:$0xff]  ;;  %v7707_v62 = vld [vmem:[%s12680_s7 + $0x588] sm:$0xff] }
 0x894   : > { %9542 = vmatpush1.bf16.msra.mxu1 %v9541_v54  ;;  %6012 = vmatprep.mubr.f32.mxu1 %v10148_v4  ;;  %v7700_v54 = vld [vmem:[%s12680_s7 + $0x550] sm:$0xff] }
 0x895   : > { %9544 = vmatprep.subr.bf16.mxu1 %v9543_v58  ;;  %v9577_v58 = vpack.c.bf16 %v7700_v54, %v7698_v53  ;;  %v7746_v53 = vld [vmem:[%s12680_s7 + $0x690] sm:$0xff]  ;;  %v7749_v54 = vld [vmem:[%s12680_s7 + $0x6a8] sm:$0xff] }
 0x896   : > { %v9615_v60 = vpack.c.bf16 %v7751_v56, %v7749_v54  ;;  %v7785_v54 = vld [vmem:[%s12680_s7 + $0x7b0] sm:$0xff]  ;;  %v7787_v56 = vld [vmem:[%s12680_s7 + $0x7c0] sm:$0xff] }
 0x898   : > { %9546 = vmatpush1.bf16.msra.mxu1 %v9545_v3  ;;  %v9583_v3 = vpack.c.bf16 %v7709_v63, %v7707_v62  ;;  %v7748_v62 = vld [vmem:[%s12680_s7 + $0x6a0] sm:$0xff]  ;;  %v7750_v63 = vld [vmem:[%s12680_s7 + $0x6b0] sm:$0xff] }
 0x899   : > { %9548 = vmatprep.subr.bf16.mxu1 %v9547_v5  ;;  %v7706_v5 = vld [vmem:[%s12680_s7 + $0x580] sm:$0xff] }
 0x89a   : > { %v9585_v7 = vpack.c.bf16 %v7708_v6, %v7706_v5  ;;  %v9617_v5 = vpack.c.bf16 %v7750_v63, %v7748_v62  ;;  %v7791_v62 = vld [vmem:[%s12680_s7 + $0x7e0] sm:$0xff]  ;;  %v7794_v63 = vld [vmem:[%s12680_s7 + $0x7f8] sm:$0xff] }
 0x89c   : > { %9550 = vmatpush1.bf16.msra.mxu1 %v9549_v10  ;;  %v7718_v10 = vld [vmem:[%s12680_s7 + $0x5c8] sm:$0xff] }
 0x89d   : > { %9552 = vmatprep.subr.bf16.mxu1 %v9551_v11  ;;  %v7715_v11 = vld [vmem:[%s12680_s7 + $0x5b0] sm:$0xff] }
 0x8a0   : > { %9554 = vmatpush1.bf16.msra.mxu1 %v9553_v16  ;;  %v9587_v16 = vpack.c.bf16 %v7718_v10, %v7716_v9  ;;  %v7757_v9 = vld [vmem:[%s12680_s7 + $0x6e8] sm:$0xff]  ;;  %v7759_v10 = vld [vmem:[%s12680_s7 + $0x6f8] sm:$0xff] }
 0x8a1   : > { %9556 = vmatprep.subr.bf16.mxu1 %v9555_v18  ;;  %v9589_v18 = vpack.c.bf16 %v7717_v12, %v7715_v11  ;;  %v9623_v12 = vpack.c.bf16 %v7759_v10, %v7757_v9  ;;  %v7798_v9 = vld [vmem:[%s12680_s7 + $0x818] sm:$0xf]  ;;  %v7797_v10 = vld [vmem:[%s12680_s7 + $0x810] sm:$0xf] }
 0x8a4   : > { %9558 = vmatpush1.bf16.msra.mxu1 %v9557_v0  ;;  %v7724_v0 = vld [vmem:[%s12680_s7 + $0x5f8] sm:$0xff] }
 0x8a5   : > { %9560 = vmatprep.subr.bf16.mxu1 %v9559_v31  ;;  %v7726_v31 = vld [vmem:[%s12680_s7 + $0x608] sm:$0xff] }
 0x8a6   : > { %v9595_v34 = vpack.c.bf16 %v7726_v31, %v7724_v0  ;;  %v7767_v0 = vld [vmem:[%s12680_s7 + $0x738] sm:$0xff]  ;;  %v9629_v31 = vpack.c.bf16 %v7762_v61, %v7760_v30 }
 0x8a7   : > { %v6750_v30 = vld [vmem:[%s12682_s9 + $0x18] sm:$0xff] }
 0x8a8   : > { %9562 = vmatpush1.bf16.msra.mxu1 %v9561_v36  ;;  %v7723_v36 = vld [vmem:[%s12680_s7 + $0x5f0] sm:$0xff] }
 0x8a9   : > { %7683 = vmatprep.subr.msk.mxu1 %vm5423_vm10, %v7682_v43  ;;  %v7725_v43 = vld [vmem:[%s12680_s7 + $0x600] sm:$0xff] }
 0x8aa   : > { %v9597_v33 = vpack.c.bf16 %v7725_v43, %v7723_v36  ;;  %v7766_v36 = vld [vmem:[%s12680_s7 + $0x730] sm:$0xff] }
 0x8ac   : > { %7684 = vmatpush1.msk.msra.mxu1 %vm5423_vm10, %v7681_v48  ;;  %v7732_v48 = vld [vmem:[%s12680_s7 + $0x638] sm:$0xff] }
 0x8ad   : > { %7685 = vmatmul.mubr.msk.f32.vlgmr.msra.gmra.mrb[30].mxu1 %vm5359_vm6, %v5911_v22  ;;  %9564 = vmatprep.subr.bf16.mxu1 %v9563_v50  ;;  %v7734_v50 = vld [vmem:[%s12680_s7 + $0x648] sm:$0xff]  ;;  %v7736_v22 = vld [vmem:[%s12680_s7 + $0x658] sm:$0xff] }
 0x8ae   : > { %9566 = vmatpush1.bf16.msra.mxu1 %v9565_v51  ;;  %6122 = vmatprep.mubr.f32.mxu1 %v10148_v4  ;;  %v9601_v51 = vpack.c.bf16 %v7729_v47, %v7727_v49  ;;  %v7775_v49 = vld [vmem:[%s12680_s7 + $0x760] sm:$0xff]  ;;  %v7778_v47 = vld [vmem:[%s12680_s7 + $0x778] sm:$0xff] }
 0x8af   : > { %9568 = vmatprep.subr.bf16.mxu1 %v9567_v52  ;;  %v9603_v52 = vpack.c.bf16 %v7734_v50, %v7732_v48  ;;  %v7780_v48 = vld [vmem:[%s12680_s7 + $0x788] sm:$0xff]  ;;  %v7768_v50 = vld [vmem:[%s12680_s7 + $0x740] sm:$0xf] }
 0x8b0   : > { %v9639_v37 = vpack.c.bf16 %v7780_v48, %v7778_v47  ;;  %v6760_v47 = vld [vmem:[%s12682_s9 + $0x68] sm:$0xff] }
 0x8b2   : > { %9570 = vmatpush1.bf16.msra.mxu1 %v9569_v26  ;;  %v9607_v26 = vpack.c.bf16 %v7738_v23, %v7736_v22  ;;  %v7777_v22 = vld [vmem:[%s12680_s7 + $0x770] sm:$0xff]  ;;  %v7779_v23 = vld [vmem:[%s12680_s7 + $0x780] sm:$0xff] }
 0x8b3   : > { %9572 = vmatprep.subr.bf16.mxu1 %v9571_v28  ;;  %v7735_v28 = vld [vmem:[%s12680_s7 + $0x650] sm:$0xff] }
 0x8b4   : > { %v9609_v39 = vpack.c.bf16 %v7737_v38, %v7735_v28  ;;  %v9641_v28 = vpack.c.bf16 %v7779_v23, %v7777_v22  ;;  %v6766_v22 = vld [vmem:[%s12682_s9 + $0x98] sm:$0xff] }
 0x8b6   : > { %9574 = vmatpush1.bf16.msra.mxu1 %v9573_v42  ;;  %v7747_v42 = vld [vmem:[%s12680_s7 + $0x698] sm:$0xff] }
 0x8b7   : > { %9576 = vmatprep.subr.bf16.mxu1 %v9575_v44  ;;  %v7744_v44 = vld [vmem:[%s12680_s7 + $0x680] sm:$0xff] }
 0x8b8   : > { %v9613_v29 = vpack.c.bf16 %v7746_v53, %v7744_v44 }
 0x8ba   : > { %9578 = vmatpush1.bf16.msra.mxu1 %v9577_v58  ;;  %v9611_v58 = vpack.c.bf16 %v7747_v42, %v7745_v41  ;;  %v7786_v41 = vld [vmem:[%s12680_s7 + $0x7b8] sm:$0xff]  ;;  %v7788_v42 = vld [vmem:[%s12680_s7 + $0x7c8] sm:$0xff] }
 0x8bb   : > { %9580 = vmatprep.subr.bf16.mxu1 %v9579_v59  ;;  %v6131_v59 = vld [vmem:[#allocation5 + $0x7] sm:$0x7]  ;;  %v9647_v53 = vpack.c.bf16 %v7788_v42, %v7786_v41  ;;  %v6769_v42 = vld [vmem:[%s12682_s9 + $0xb0] sm:$0xff] }
 0x8bc   : > { %v6767_v41 = vld [vmem:[%s12682_s9 + $0xa0] sm:$0xff] }
 0x8be   : > { %9582 = vmatpush1.bf16.msra.mxu1 %v9581_v1  ;;  %v7753_v1 = vld [vmem:[%s12680_s7 + $0x6c8] sm:$0xff] }
 0x8bf   : > { %9584 = vmatprep.subr.bf16.mxu1 %v9583_v3  ;;  %v7755_v3 = vld [vmem:[%s12680_s7 + $0x6d8] sm:$0xff] }
 0x8c0   : > { %v9619_v6 = vpack.c.bf16 %v7755_v3, %v7753_v1  ;;  %v7796_v1 = vld [vmem:[%s12680_s7 + $0x808] sm:$0xff] }
 0x8c2   : > { %9586 = vmatpush1.bf16.msra.mxu1 %v9585_v7  ;;  %v7752_v7 = vld [vmem:[%s12680_s7 + $0x6c0] sm:$0xff] }
 0x8c3   : > { %7712 = vmatprep.subr.msk.mxu1 %vm5423_vm10, %v7711_v8  ;;  %v7754_v8 = vld [vmem:[%s12680_s7 + $0x6d0] sm:$0xff] }
 0x8c4   : > { %v9621_v11 = vpack.c.bf16 %v7754_v8, %v7752_v7  ;;  %v7795_v7 = vld [vmem:[%s12680_s7 + $0x800] sm:$0xff] }
 0x8c6   : > { %7713 = vmatpush1.msk.msra.mxu1 %vm5423_vm10, %v7710_v15  ;;  %v7761_v15 = vld [vmem:[%s12680_s7 + $0x708] sm:$0xff] }
 0x8c7   : > { %7714 = vmatmul.mubr.msk.f32.vlgmr.msra.gmra.mrb[30].mxu1 %vm5359_vm6, %v6021_v20  ;;  %9588 = vmatprep.subr.bf16.mxu1 %v9587_v16  ;;  %v7763_v16 = vld [vmem:[%s12680_s7 + $0x718] sm:$0xff]  ;;  %v7765_v20 = vld [vmem:[%s12680_s7 + $0x728] sm:$0xff] }
 0x8c8   : > { %9590 = vmatpush1.bf16.msra.mxu1 %v9589_v18  ;;  %6232 = vmatprep.mubr.f32.mxu1 %v10148_v4  ;;  %v9625_v18 = vpack.c.bf16 %v7758_v14, %v7756_v13 }
 0x8c9   : > { %9592 = vmatprep.subr.bf16.mxu1 %v9591_v19  ;;  %v9627_v19 = vpack.c.bf16 %v7763_v16, %v7761_v15 }
 0x8cc   : > { %9594 = vmatpush1.bf16.msra.mxu1 %v9593_v32  ;;  %v9631_v32 = vpack.c.bf16 %v7767_v0, %v7765_v20  ;;  %v6747_v20 = vld [vmem:[%s12682_s9] sm:$0xff]  ;;  %v6749_v0 = vld [vmem:[%s12682_s9 + $0x10] sm:$0xff] }
 0x8cd   : > { %9596 = vmatprep.subr.bf16.mxu1 %v9595_v34  ;;  %v7764_v34 = vld [vmem:[%s12680_s7 + $0x720] sm:$0xff] }
 0x8ce   : > { %v9633_v43 = vpack.c.bf16 %v7766_v36, %v7764_v34  ;;  %v6751_v36 = vld [vmem:[%s12682_s9 + $0x20] sm:$0xff] }
 0x8d0   : > { %9598 = vmatpush1.bf16.msra.mxu1 %v9597_v33  ;;  %v7776_v33 = vld [vmem:[%s12680_s7 + $0x768] sm:$0xff] }
 0x8d1   : > { %9600 = vmatprep.subr.bf16.mxu1 %v9599_v46  ;;  %v7773_v46 = vld [vmem:[%s12680_s7 + $0x750] sm:$0xff] }
 0x8d2   : > { %v9637_v35 = vpack.c.bf16 %v7775_v49, %v7773_v46  ;;  %v6755_v46 = vld [vmem:[%s12682_s9 + $0x40] sm:$0xff]  ;;  %v6757_v49 = vld [vmem:[%s12682_s9 + $0x50] sm:$0xff] }
 0x8d3   : > { %v9669_v48 = vpack.c.bf16 %v6757_v49, %v6755_v46  ;;  %v12508_v46 = vsub.s32 0, %v10855_v24 }
 0x8d4   : > { %9602 = vmatpush1.bf16.msra.mxu1 %v9601_v51  ;;  %v9635_v51 = vpack.c.bf16 %v7776_v33, %v7774_v17 }
 0x8d5   : > { %9604 = vmatprep.subr.bf16.mxu1 %v9603_v52  ;;  %v6241_v52 = vld [vmem:[#allocation5 + $0x8] sm:$0x7] }
 0x8d8   : > { %9606 = vmatpush1.bf16.msra.mxu1 %v9605_v25  ;;  %v7782_v25 = vld [vmem:[%s12680_s7 + $0x798] sm:$0xff] }
 0x8d9   : > { %9608 = vmatprep.subr.bf16.mxu1 %v9607_v26  ;;  %v7784_v26 = vld [vmem:[%s12680_s7 + $0x7a8] sm:$0xff] }
 0x8da   : > { %v9643_v38 = vpack.c.bf16 %v7784_v26, %v7782_v25  ;;  %v6763_v25 = vld [vmem:[%s12682_s9 + $0x80] sm:$0xff]  ;;  %v6765_v26 = vld [vmem:[%s12682_s9 + $0x90] sm:$0xff] }
 0x8dc   : > { %9610 = vmatpush1.bf16.msra.mxu1 %v9609_v39  ;;  %v7781_v39 = vld [vmem:[%s12680_s7 + $0x790] sm:$0xff] }
 0x8dd   : > { %7741 = vmatprep.subr.msk.mxu1 %vm5423_vm10, %v7740_v40  ;;  %v7783_v40 = vld [vmem:[%s12680_s7 + $0x7a0] sm:$0xff] }
 0x8de   : > { %v9645_v44 = vpack.c.bf16 %v7783_v40, %v7781_v39  ;;  %v6770_v39 = vld [vmem:[%s12682_s9 + $0xb8] sm:$0xff] }
 0x8e0   : > { %7742 = vmatpush1.msk.msra.mxu1 %vm5423_vm10, %v7739_v57  ;;  %v7790_v57 = vld [vmem:[%s12680_s7 + $0x7d8] sm:$0xff] }
 0x8e1   : > { %9612 = vmatprep.subr.bf16.mxu1 %v9611_v58  ;;  %7743 = vmatmul.mubr.msk.f32.vlgmr.msra.gmra.mrb[30].mxu1 %vm5359_vm6, %v6131_v59  ;;  %v7792_v58 = vld [vmem:[%s12680_s7 + $0x7e8] sm:$0xff]  ;;  %v9649_v59 = vpack.c.bf16 %v7787_v56, %v7785_v54  ;;  %v6774_v54 = vld [vmem:[%s12682_s9 + $0xd8] sm:$0xff] }
 0x8e2   : > { %9614 = vmatpush1.bf16.msra.mxu1 %v9613_v29  ;;  %6342 = vmatprep.mubr.f32.mxu1 %v10148_v4  ;;  %v9651_v29 = vpack.c.bf16 %v7792_v58, %v7790_v57  ;;  %v6771_v57 = vld [vmem:[%s12682_s9 + $0xc0] sm:$0xff]  ;;  %v6773_v58 = vld [vmem:[%s12682_s9 + $0xd0] sm:$0xff] }
 0x8e3   : > { %9616 = vmatprep.subr.bf16.mxu1 %v9615_v60  ;;  %v7789_v60 = vld [vmem:[%s12680_s7 + $0x7d0] sm:$0xff] }
 0x8e4   : > { %v9653_v3 = vpack.c.bf16 %v7791_v62, %v7789_v60  ;;  %v6778_v60 = vld [vmem:[%s12682_s9 + $0xf8] sm:$0xff] }
 0x8e6   : > { %9618 = vmatpush1.bf16.msra.mxu1 %v9617_v5  ;;  %v9655_v5 = vpack.c.bf16 %v7796_v1, %v7794_v63  ;;  %v6775_v63 = vld [vmem:[%s12682_s9 + $0xe0] sm:$0xff]  ;;  %v6777_v1 = vld [vmem:[%s12682_s9 + $0xf0] sm:$0xff] }
 0x8e7   : > { %9620 = vmatprep.subr.bf16.mxu1 %v9619_v6  ;;  %v7793_v6 = vld [vmem:[%s12680_s7 + $0x7f0] sm:$0xff] }
 0x8e8   : > { %v9657_v8 = vpack.c.bf16 %v7795_v7, %v7793_v6  ;;  %v6782_v6 = vld [vmem:[%s12682_s9 + $0x118] sm:$0xff] }
 0x8ea   : > { %9622 = vmatpush1.bf16.msra.mxu1 %v9621_v11  ;;  %v6351_v11 = vld [vmem:[#allocation5 + $0x9] sm:$0x7] }
 0x8eb   : > { %9624 = vmatprep.subr.bf16.mxu1 %v9623_v12 }
 0x8ee   : > { %9626 = vmatpush1.bf16.msra.mxu1 %v9625_v18 }
 0x8ef   : > { %9628 = vmatprep.subr.bf16.mxu1 %v9627_v19  ;;  %v6748_v19 = vld [vmem:[%s12682_s9 + $0x8] sm:$0xff] }
 0x8f0   : > { %v9659_v61 = vpack.c.bf16 %v6750_v30, %v6748_v19  ;;  %v6790_v19 = vld [vmem:[%s12682_s9 + $0x158] sm:$0xff] }
 0x8f2   : > { %9630 = vmatpush1.bf16.msra.mxu1 %v9629_v31  ;;  %v6754_v31 = vld [vmem:[%s12682_s9 + $0x38] sm:$0xff] }
 0x8f3   : > { %9632 = vmatprep.subr.bf16.mxu1 %v9631_v32  ;;  %v9661_v32 = vpack.c.bf16 %v6749_v0, %v6747_v20  ;;  %v6789_v20 = vld [vmem:[%s12682_s9 + $0x150] sm:$0xff]  ;;  %v6792_v0 = vld [vmem:[%s12682_s9 + $0x168] sm:$0xff] }
 0x8f6   : > { %9634 = vmatpush1.bf16.msra.mxu1 %v9633_v43  ;;  %v6753_v43 = vld [vmem:[%s12682_s9 + $0x30] sm:$0xff] }
 0x8f7   : > { %7770 = vmatprep.subr.msk.mxu1 %vm5423_vm10, %v7769_v55  ;;  %v6756_v55 = vld [vmem:[%s12682_s9 + $0x48] sm:$0xff]  ;;  %v9665_v17 = vpack.c.bf16 %v6753_v43, %v6751_v36 }
 0x8fa   : > { %7771 = vmatpush1.msk.msra.mxu1 %vm5423_vm10, %v7768_v50 }
 0x8fb   : > { %9636 = vmatprep.subr.bf16.mxu1 %v9635_v51  ;;  %7772 = vmatmul.mubr.msk.f32.vlgmr.msra.gmra.mrb[30].mxu1 %vm5359_vm6, %v6241_v52  ;;  %v6759_v51 = vld [vmem:[%s12682_s9 + $0x60] sm:$0xff]  ;;  %v6761_v52 = vld [vmem:[%s12682_s9 + $0x70] sm:$0xff] }
 0x8fc   : > { %9638 = vmatpush1.bf16.msra.mxu1 %v9637_v35  ;;  %6452 = vmatprep.mubr.f32.mxu1 %v10148_v4  ;;  %v9673_v35 = vpack.c.bf16 %v6761_v52, %v6759_v51 }
 0x8fd   : > { %9640 = vmatprep.subr.bf16.mxu1 %v9639_v37  ;;  %v6764_v37 = vld [vmem:[%s12682_s9 + $0x88] sm:$0xff] }
 0x8fe   : > { %v9675_v23 = vpack.c.bf16 %v6766_v22, %v6764_v37 }
 0x900   : > { %9642 = vmatpush1.bf16.msra.mxu1 %v9641_v28  ;;  %v9677_v28 = vpack.c.bf16 %v6765_v26, %v6763_v25 }
 0x901   : > { %9644 = vmatprep.subr.bf16.mxu1 %v9643_v38  ;;  %v6768_v38 = vld [vmem:[%s12682_s9 + $0xa8] sm:$0xff] }
 0x902   : > { %v9679_v40 = vpack.c.bf16 %v6770_v39, %v6768_v38 }
 0x904   : > { %9646 = vmatpush1.bf16.msra.mxu1 %v9645_v44  ;;  %v9681_v44 = vpack.c.bf16 %v6769_v42, %v6767_v41 }
 0x905   : > { %9648 = vmatprep.subr.bf16.mxu1 %v9647_v53  ;;  %v6772_v53 = vld [vmem:[%s12682_s9 + $0xc8] sm:$0xff] }
 0x906   : > { %v9683_v56 = vpack.c.bf16 %v6774_v54, %v6772_v53  ;;  %v7814_v53 = vld [vmem:[%s12681_s8 + $0x2] ss:$4 sm:$0x3] }
 0x908   : > { %9650 = vmatpush1.bf16.msra.mxu1 %v9649_v59  ;;  %v9685_v59 = vpack.c.bf16 %v6773_v58, %v6771_v57 }
 0x909   : > { %9652 = vmatprep.subr.bf16.mxu1 %v9651_v29  ;;  %v6776_v29 = vld [vmem:[%s12682_s9 + $0xe8] sm:$0xff] }
 0x90a   : > { %v9687_v62 = vpack.c.bf16 %v6778_v60, %v6776_v29 }
 0x90c   : > { %9654 = vmatpush1.bf16.msra.mxu1 %v9653_v3  ;;  %v9689_v3 = vpack.c.bf16 %v6777_v1, %v6775_v63  ;;  %v6738_v63 = vrot.slane %v7814_v53, %v12508_v46  ;;  %v6896_v1 = vld [vmem:[%s12684_s11] sm:$0xff] }
 0x90d   : > { %9656 = vmatprep.subr.bf16.mxu1 %v9655_v5  ;;  %v6780_v5 = vld [vmem:[%s12682_s9 + $0x108] sm:$0xff] }
 0x90e   : > { %v9691_v7 = vpack.c.bf16 %v6782_v6, %v6780_v5 }
 0x910   : > { %9658 = vmatpush1.bf16.msra.mxu1 %v9657_v8  ;;  %v6779_v8 = vld [vmem:[%s12682_s9 + $0x100] sm:$0xff] }
 0x911   : > { %7799 = vmatprep.subr.msk.mxu1 %vm5423_vm10, %v7798_v9  ;;  %v6781_v9 = vld [vmem:[%s12682_s9 + $0x110] sm:$0xff] }
 0x914   : > { %7800 = vmatpush1.msk.msra.mxu1 %vm5423_vm10, %v7797_v10  ;;  %v9693_v10 = vpack.c.bf16 %v6781_v9, %v6779_v8  ;;  %v6898_v9 = vld [vmem:[%s12684_s11 + $0x10] sm:$0xff] }
 0x915   : > { %7801 = vmatmul.mubr.msk.f32.vlgmr.msra.gmra.mrb[30].mxu1 %vm5359_vm6, %v6351_v11  ;;  %v6784_v11 = vld [vmem:[%s12682_s9 + $0x128] sm:$0xff] }
 0x950   : > { %v5496_v12 = vpop.f32.mrb[22].mxu0 }
 0x951   : > { %v5498_v13 = vpop.f32.mrb[23].mxu0 }
 0x9e8   : > { %v6454_v14 = vpop.f32.mrb[30].mxu1 }
 0x9e9   : > { %v9744_v15 = vadd.f32 %v6454_v14, %v5496_v12  ;;  %v6456_v16 = vpop.f32.mrb[31].mxu1  ;;  %v6786_v12 = vld [vmem:[%s12682_s9 + $0x138] sm:$0xff]  ;;  %v6783_v14 = vld [vmem:[%s12682_s9 + $0x120] sm:$0xff] }
 0x9ea   : > { %v9745_v18 = vadd.f32 %v6456_v16, %v5498_v13  ;;  %v9695_v13 = vpack.c.bf16 %v6786_v12, %v6784_v11  ;;  %v6900_v12 = vld [vmem:[%s12684_s11 + $0x20] sm:$0xff] }
 0x9ec   : > { %7802 = vmatprep.subr.msk.mxu0 %vm3875_vm14, %v9745_v18 }
 0x9ed   : > { %7803 = vmatpush1.msk.msra.mxu0 %vm3875_vm14, %v9744_v15 }
 0x9ee   : > { %7804 = vmatmul.mubr.msk.f32.vlgmr.msra.gmra.mrb[24].mxu0 %vm6461_vm15, %v10862_v27  ;;  %7805 = vmatprep.subr.msk.mxu0 %vm3875_vm14, %v9745_v18  ;;  %v6752_v27 = vld [vmem:[%s12682_s9 + $0x28] sm:$0xff] }
 0x9ef   : > { %7806 = vmatpush1.msk.msra.mxu0 %vm3875_vm14, %v9744_v15  ;;  %6607 = vmatprep.mubr.f32.mxu0 %v10148_v4  ;;  %v9663_v34 = vpack.c.bf16 %v6754_v31, %v6752_v27  ;;  %v6794_v31 = vld [vmem:[%s12682_s9 + $0x178] sm:$0xff] }
 0x9f0   : > { %7808 = vmatprep.subr.msk.mxu0 %vm3875_vm14, %v9745_v18  ;;  %v6788_v18 = vld [vmem:[%s12682_s9 + $0x148] sm:$0xff]  ;;  %v9703_v36 = vpack.c.bf16 %v6794_v31, %v6792_v0  ;;  %v6907_v0 = vld [vmem:[%s12684_s11 + $0x58] sm:$0xff]  ;;  %v6908_v31 = vld [vmem:[%s12684_s11 + $0x60] sm:$0xff] }
 0x9f1   : > { %v9699_v30 = vpack.c.bf16 %v6790_v19, %v6788_v18  ;;  %v6904_v19 = vld [vmem:[%s12684_s11 + $0x40] sm:$0xff] }
 0x9f2   : > { %7807 = vmatmul.mubr.msk.f32.vlgmr.msra.gmra.mrb[26].mxu0 %vm6461_vm15, %v10909_v21  ;;  %v6758_v21 = vld [vmem:[%s12682_s9 + $0x58] sm:$0xff] }
 0x9f3   : > { %7809 = vmatpush1.msk.msra.mxu0 %vm3875_vm14, %v9744_v15  ;;  %6682 = vmatprep.mubr.f32.mxu0 %v10148_v4  ;;  %v9667_v33 = vpack.c.bf16 %v6758_v21, %v6756_v55  ;;  %v6785_v15 = vld [vmem:[%s12682_s9 + $0x130] sm:$0xff]  ;;  %v6796_v55 = vld [vmem:[%s12682_s9 + $0x188] sm:$0xff]  ;;  %v6795_v21 = vld [vmem:[%s12682_s9 + $0x180] sm:$0xff] }
 0x9f4   : > { %9660 = vmatprep.subr.bf16.mxu0 %v9659_v61  ;;  %v9697_v16 = vpack.c.bf16 %v6785_v15, %v6783_v14  ;;  %v6787_v61 = vld [vmem:[%s12682_s9 + $0x140] sm:$0xff]  ;;  %v6902_v15 = vld [vmem:[%s12684_s11 + $0x30] sm:$0xff] }
 0x9f5   : > { %v9701_v27 = vpack.c.bf16 %v6789_v20, %v6787_v61  ;;  %v6906_v61 = vld [vmem:[%s12684_s11 + $0x50] sm:$0xff] }
 0x9f6   : > { %7810 = vmatmul.mubr.msk.f32.vlgmr.msra.gmra.mrb[28].mxu0 %vm6461_vm15, %v10939_v45  ;;  %v6762_v45 = vld [vmem:[%s12682_s9 + $0x78] sm:$0xff] }
 0x9f7   : > { %9662 = vmatpush1.bf16.msra.mxu0 %v9661_v32  ;;  %v9671_v50 = vpack.c.bf16 %v6762_v45, %v6760_v47  ;;  %v6791_v32 = vld [vmem:[%s12682_s9 + $0x160] sm:$0xff]  ;;  %v12514_v45 = vsub.s32 1, %v10855_v24 }
 0x9f8   : > { %9664 = vmatprep.subr.bf16.mxu0 %v9663_v34  ;;  %v6793_v34 = vld [vmem:[%s12682_s9 + $0x170] sm:$0xff]  ;;  %v6691_v47 = vld [vmem:[%s12681_s8] ss:$4 sm:$0x3] }
 0x9f9   : > { %v9705_v43 = vpack.c.bf16 %v6793_v34, %v6791_v32  ;;  %v6696_v52 = vrot.slane %v6691_v47, %v12508_v46  ;;  %v6700_v37 = vrot.slane %v6691_v47, %v12514_v45  ;;  %v7813_v24 = vld [vmem:[%s12681_s8 + $0x1] ss:$4 sm:$0x3]  ;;  %v6742_v29 = vrot.slane %v7814_v53, %v12514_v45  ;;  %v6909_v32 = vld [vmem:[%s12684_s11 + $0x68] sm:$0xff] }
 0x9fa   : > { %v6727_v57 = vrot.slane %v7813_v24, %v12514_v45  ;;  %v9726_v34 = vpack.c.bf16 %v6909_v32, %v6908_v31  ;;  %v6999_v53 = vld [vmem:[%s12686_s13 + $0x20] sm:$0xff] }
 0x9fb   : > { %9666 = vmatpush1.bf16.msra.mxu0 %v9665_v17 }
 0x9fc   : > { %9668 = vmatprep.subr.bf16.mxu0 %v9667_v33 }
 0x9ff   : > { %9670 = vmatpush1.bf16.msra.mxu0 %v9669_v48 }
 0xa00   : > { %9672 = vmatprep.subr.bf16.mxu0 %v9671_v50 }
 0xa03   : > { %9674 = vmatpush1.bf16.msra.mxu0 %v9673_v35 }
 0xa04   : > { %9676 = vmatprep.subr.bf16.mxu0 %v9675_v23 }
 0xa07   : > { %9678 = vmatpush1.bf16.msra.mxu0 %v9677_v28 }
 0xa08   : > { %9680 = vmatprep.subr.bf16.mxu0 %v9679_v40 }
 0xa0b   : > { %9682 = vmatpush1.bf16.msra.mxu0 %v9681_v44  ;;  %v6723_v44 = vrot.slane %v7813_v24, %v12508_v46 }
 0xa0c   : > { %9684 = vmatprep.subr.bf16.mxu0 %v9683_v56 }
 0xa0f   : > { %9686 = vmatpush1.bf16.msra.mxu0 %v9685_v59 }
 0xa10   : > { %9688 = vmatprep.subr.bf16.mxu0 %v9687_v62 }
 0xa13   : > { %9690 = vmatpush1.bf16.msra.mxu0 %v9689_v3  ;;  %v6897_v3 = vld [vmem:[%s12684_s11 + $0x8] sm:$0xff] }
 0xa14   : > { %9692 = vmatprep.subr.bf16.mxu0 %v9691_v7  ;;  %v9708_v7 = vpack.c.bf16 %v6897_v3, %v6896_v1  ;;  %v7001_v3 = vld [vmem:[%s12687_s14] sm:$0x1] }
 0xa17   : > { %9694 = vmatpush1.bf16.msra.mxu0 %v9693_v10  ;;  %v6899_v10 = vld [vmem:[%s12684_s11 + $0x18] sm:$0xff] }
 0xa18   : > { %9696 = vmatprep.subr.bf16.mxu0 %v9695_v13  ;;  %v9711_v11 = vpack.c.bf16 %v6899_v10, %v6898_v9  ;;  %v6901_v13 = vld [vmem:[%s12684_s11 + $0x28] sm:$0xff] }
 0xa19   : > { %v9714_v14 = vpack.c.bf16 %v6901_v13, %v6900_v12 }
 0xa1b   : > { %9698 = vmatpush1.bf16.msra.mxu0 %v9697_v16  ;;  %v6903_v16 = vld [vmem:[%s12684_s11 + $0x38] sm:$0xff] }
 0xa1c   : > { %9700 = vmatprep.subr.bf16.mxu0 %v9699_v30  ;;  %v9717_v18 = vpack.c.bf16 %v6903_v16, %v6902_v15  ;;  %v6905_v30 = vld [vmem:[%s12684_s11 + $0x48] sm:$0xff] }
 0xa1d   : > { %v9720_v20 = vpack.c.bf16 %v6905_v30, %v6904_v19 }
 0xa1f   : > { %9702 = vmatpush1.bf16.msra.mxu0 %v9701_v27  ;;  %v9723_v27 = vpack.c.bf16 %v6907_v0, %v6906_v61 }
 0xa20   : > { %9704 = vmatprep.subr.bf16.mxu0 %v9703_v36  ;;  %v6910_v36 = vld [vmem:[%s12684_s11 + $0x70] sm:$0xff] }
 0xa23   : > { %9706 = vmatpush1.bf16.msra.mxu0 %v9705_v43  ;;  %v6911_v43 = vld [vmem:[%s12684_s11 + $0x78] sm:$0xff] }
 0xa24   : > { %6861 = vmatprep.subr.mxu0 %v6796_v55  ;;  %v9729_v55 = vpack.c.bf16 %v6911_v43, %v6910_v36 }
 0xa27   : > { %6862 = vmatpush1.msra.mxu0 %v6795_v21  ;;  %v6912_v21 = vld [vmem:[%s12684_s11 + $0x80] sm:$0xff] }
 0xa28   : > { %9707 = vmatprep.subr.bf16.mxu0 %v10146_v2 }
 0xac1   : > { %v6536_v17 = vpop.f32.mrb[24].mxu0 }
 0xac2   : > { %v6538_v33 = vpop.f32.mrb[25].mxu0 }
 0xac5   : > { %v6609_v49 = vpop.f32.mrb[26].mxu0 }
 0xac6   : > { %v6614_v48 = vmax.f32 %v6536_v17, %v6609_v49  ;;  %v6611_v50 = vpop.f32.mrb[27].mxu0  ;;  %v6913_v17 = vld [vmem:[%s12684_s11 + $0x88] sm:$0xff]  ;;  %v6797_v49 = vld [vmem:[%s12683_s10] sm:$0x3] }
 0xac7   : > { %v6615_v51 = vmax.f32 %v6538_v33, %v6611_v50  ;;  %v9732_v33 = vpack.c.bf16 %v6913_v17, %v6912_v21  ;;  %v6802_v47 = vrot.slane %v6797_v49, %v12508_v46 }
 0xac9   : > { %v6684_v35 = vpop.f32.mrb[28].mxu0 }
 0xaca   : > { %v6689_v22 = vmax.f32 %v6614_v48, %v6684_v35  ;;  %v6686_v23 = vpop.f32.mrb[29].mxu0  ;;  %v6806_v48 = vrot.slane %v6797_v49, %v12514_v45 }
 0xacb   : > { %v6690_v25 = vmax.f32 %v6615_v51, %v6686_v23 }
 0xacc   : > { %v6703_v26 = vadd.f32 %v6696_v52, %v6689_v22 }
 0xacd   : > { %v6704_v28 = vadd.f32 %v6700_v37, %v6690_v25 }
 0xace   : > { %v6707_v38 = vmin.f32 %v6703_v26, 0.0  ;;  %vm6705_vm14 = vcmp.gt.f32.partialorder %v6703_v26, 0.0 }
 0xacf   : > { %v6708_v39 = vmin.f32 %v6704_v28, 0.0  ;;  %vm6706_vm0 = vcmp.gt.f32.partialorder %v6704_v28, 0.0 }
 0xad0   : > { %v6709_v40 = vmul.f32 1.442695, %v6707_v38 }
 0xad1   : > { %v6711_v41 = vmul.f32 1.442695, %v6708_v39 }
 0xad2   : > { %10072 = vpow2.f32 %v6709_v40  ;;  %v6995_v40 = vld [vmem:[%s12686_s13] sm:$0xff] }
 0xad3   : > { %10074 = vpow2.f32 %v6711_v41  ;;  %v6996_v41 = vld [vmem:[%s12686_s13 + $0x8] sm:$0xff] }
 0xad4   : > { %v9735_v24 = vpack.c.bf16 %v6996_v41, %v6995_v40 }
 0xadc   : > { %v10073_v42 = vpop.eup %10072 }
 0xadd   : > { %v10075_v54 = vpop.eup %10074  ;;  %v7811_v56 = vadd.f32 -1.0, %v10073_v42  ;;  %v6997_v42 = vld [vmem:[%s12686_s13 + $0x10] sm:$0xff] }
 0xade   : > { %v7812_v58 = vadd.f32 -1.0, %v10075_v54  ;;  %v7000_v54 = vld [vmem:[%s12686_s13 + $0x28] sm:$0xf] }
 0xadf   : > { %v6715_v59 = vsel %vm6705_vm14, %v6703_v26, %v7811_v56  ;;  %v9741_v56 = vpack.c.bf16 %v7000_v54, %v6999_v53 }
 0xae0   : > { %v6730_v60 = vmul.f32 %v6723_v44, %v6715_v59  ;;  %v6716_v62 = vsel %vm6706_vm0, %v6704_v28, %v7812_v58 }
 0xae1   : > { %v6731_v5 = vmul.f32 %v6727_v57, %v6716_v62  ;;  %v6914_v57 = vld [vmem:[%s12685_s12] sm:$0x1] }
 0xae2   : > { %v6745_v8 = vadd.f32 %v6738_v63, %v6730_v60 }
 0xae3   : > { %v6746_v6 = vadd.f32 %v6742_v29, %v6731_v5 }
 0xae5   : > { %7815 = vmatprep.mubr.msk.f32.mxu0 %vm6809_vm2, %v6746_v6 }
 0xae6   : > { %6878 = vmatmul.mubr.f32.vlgmr.msra.gmra.mrb[30].mxu0 %v6745_v8 }
 0xae7   : > { %9709 = vmatpush1.bf16.msra.mxu0 %v9708_v7 }
 0xae8   : > { %9710 = vmatprep.subr.bf16.mxu0 %v10146_v2 }
 0xaeb   : > { %9712 = vmatpush1.bf16.msra.mxu0 %v9711_v11 }
 0xaec   : > { %9713 = vmatprep.subr.bf16.mxu0 %v10146_v2 }
 0xaef   : > { %9715 = vmatpush1.bf16.msra.mxu0 %v9714_v14 }
 0xaf0   : > { %9716 = vmatprep.subr.bf16.mxu0 %v10146_v2 }
 0xaf3   : > { %9718 = vmatpush1.bf16.msra.mxu0 %v9717_v18 }
 0xaf4   : > { %9719 = vmatprep.subr.bf16.mxu0 %v10146_v2 }
 0xaf7   : > { %9721 = vmatpush1.bf16.msra.mxu0 %v9720_v20 }
 0xaf8   : > { %9722 = vmatprep.subr.bf16.mxu0 %v10146_v2 }
 0xafb   : > { %9724 = vmatpush1.bf16.msra.mxu0 %v9723_v27 }
 0xafc   : > { %9725 = vmatprep.subr.bf16.mxu0 %v10146_v2 }
 0xaff   : > { %9727 = vmatpush1.bf16.msra.mxu0 %v9726_v34 }
 0xb00   : > { %9728 = vmatprep.subr.bf16.mxu0 %v10146_v2 }
 0xb03   : > { %9730 = vmatpush1.bf16.msra.mxu0 %v9729_v55 }
 0xb04   : > { %9731 = vmatprep.subr.bf16.mxu0 %v10146_v2 }
 0xb07   : > { %9733 = vmatpush1.bf16.msra.mxu0 %v9732_v33 }
 0xb08   : > { %9734 = vmatprep.subr.bf16.mxu0 %v10146_v2 }
 0xbb9   : > { %v6879_v50 = vpop.f32.mrb[30].mxu0 }
 0xbba   : > { %v6880_v51 = vadd.f32 %v6879_v50, %v6802_v47  ;;  %v6881_v52 = vpop.f32.mrb[31].mxu0 }
 0xbbb   : > { %v6882_v35 = vadd.f32 %v6881_v52, %v6806_v48 }
 0xbbc   : > { %v6886_v37 = vmin.f32 %v6880_v51, 0.0  ;;  %vm6884_vm7 = vcmp.gt.f32.partialorder %v6880_v51, 0.0 }
 0xbbd   : > { %v6887_v22 = vmin.f32 %v6882_v35, 0.0  ;;  %vm6885_vm4 = vcmp.gt.f32.partialorder %v6882_v35, 0.0 }
 0xbbe   : > { %v6888_v23 = vmul.f32 1.442695, %v6886_v37 }
 0xbbf   : > { %v6890_v25 = vmul.f32 1.442695, %v6887_v22 }
 0xbc0   : > { %10076 = vpow2.f32 %v6888_v23 }
 0xbc1   : > { %10078 = vpow2.f32 %v6890_v25 }
 0xbca   : > { %v10077_v26 = vpop.eup %10076 }
 0xbcb   : > { %v10079_v28 = vpop.eup %10078  ;;  %v7816_v38 = vadd.f32 -1.0, %v10077_v26 }
 0xbcc   : > { %v7817_v39 = vadd.f32 -1.0, %v10079_v28 }
 0xbcd   : > { %v6894_v45 = vsel %vm6884_vm7, %v6880_v51, %v7816_v38 }
 0xbce   : > { %v6895_v46 = vsel %vm6885_vm4, %v6882_v35, %v7817_v39 }
 0xbcf   : > { %7818 = vmatprep.mubr.msk.f32.mxu0 %vm6915_vm3, %v6895_v46 }
 0xbd0   : > { %6984 = vmatmul.mubr.f32.vlgmr.msra.gmra.mrb[32].mxu0 %v6894_v45 }
 0xbd1   : > { %9064 = vmatprep.mubr.msk.f32.mxu0 %vm10147_vm1, %v10148_v4  ;;  %9736 = vmatpush3.bf16.msra.mxu0 %v9735_v24  ;;  %v6998_v4 = vld [vmem:[%s12686_s13 + $0x18] sm:$0xff]  ;;  %vm9742_vm1 = vmpackc.low %vm5423_vm10, %vm10149_vm5  ;;  %vm7079_vm5 = vcmask 24576  }
 0xbd2   : > { %9737 = vmatprep.subr.bf16.mxu0 %v10146_v2  ;;  %v9738_v44 = vpack.c.bf16 %v6998_v4, %v6997_v42 }
 0xbd5   : > { %9739 = vmatpush3.bf16.msra.mxu0 %v9738_v44 }
 0xbd6   : > { %9740 = vmatprep.subr.bf16.mxu0 %v10146_v2 }
 0xbd9   : > { %9743 = vmatpush3.bf16.msk.msra.mxu0 %vm9742_vm1, %v9741_v56 }
 0xca3   : > { %v6985_v58 = vpop.f32.mrb[32].mxu0 }
 0xca4   : > { %v6986_v59 = vadd.f32 %v6985_v58, %v6914_v57  ;;  %v6987_v29 = vpop.f32.mrb[33].mxu0 }
 0xca6   : > { %v6990_v60 = vmin.f32 %v6986_v59, 0.0  ;;  %vm6989_vm9 = vcmp.gt.f32.partialorder %v6986_v59, 0.0 }
 0xca8   : > { %v6991_v62 = vmul.f32 1.442695, %v6990_v60 }
 0xcaa   : > { %10080 = vpow2.f32 %v6991_v62 }
 0xcb4   : > { %v10081_v63 = vpop.eup %10080 }
 0xcb5   : > { %v7819_v1 = vadd.f32 -1.0, %v10081_v63 }
 0xcb7   : > { %v6994_v2 = vsel %vm6989_vm9, %v6986_v59, %v7819_v1 }
 0xcb8   : > { %9065 = vmatmul.mubr.msk.f32.vlgmr.msra.gmra.mrb[34].mxu0 %vm7002_vm8, %v6994_v2 }
 0xd8b   : > { %v7075_v5 = vpop.f32.mrb[34].mxu0 }
 0xd8c   : > { %v7076_v6 = vadd.f32 %v7075_v5, %v7001_v3  ;;  %v9066_v7 = vpop.f32.mrb[35].mxu0 }
 0xd8e   : > { %7080 = vst.msk [vmem:[%s486_s1] sm:$0x1] %vm7079_vm5, %v7076_v6 }
 0xd8f   : > { %10095 = shalt.err (!%p10092_p3)
}
 0xd90   : > { %s10096_s17 = scalar_lea.hbm %s12631_s0, 16  ;;  %s10100_s1 = scalar_lea.hbm %s12688_s15, 32 }
 0xd91   : > { %p10097_p4 = scmp.ne.s32.totalorder %s12631_s0, %s10096_s17  ;;  %p10101_p9 = scmp.lt.u32.totalorder %s12631_s0, %s12688_s15 }
 0xd92   : > { %p10102_p10 = scmp.lt.u32.totalorder %s10100_s1, %s10096_s17  ;;  %p10104_p12 = scmp.lt.u32.totalorder %s10096_s17, %s12631_s0 }
 0xd93   : > { %p10098_p7 = pnand %p10097_p4, %p10269_p5 }
 0xd94   : > { %p10103_p11 = por %p10102_p10, %p10101_p9 }
 0xd95   : > { %p10099_p8 = pneg %p10098_p7 }
 0xd96   : > { %p10105_p13 = por %p10104_p12, %p10103_p11 }
 0xd98   : > { %p10106_p0 = pnand %p10105_p13, %p10099_p8 }
 0xd9a   : > { %10109 = shalt.err (!%p10106_p0)
}
 0xd9b   : > { %10015 = dma.vmem_to_hbm [thread:$0]  (%p10269_p5), %s12633_s2, 16, %s12631_s0, %s7082_s27  }
 0xd9c PF: > { %p10021_p1 = scmp.ge.s32.totalorder %s10144_s21, 2  ;;  %s7106_s3 = sand.u32 1, %s10132_s18  }
 0xd9d   : > { %s7107_s22 = scalar_lea.sflag [#allocation7], %s7106_s3 }
 0xd9e   : > { %p10018_p2 = pnand %p10021_p1, %p10273_p6 }
 0xda0   : > { %10127 = dma.done.wait (!%p10018_p2), %s7107_s22, 16  }
 0xda1   : > { %10129 = vsyncadd (!%p10018_p2), %s7107_s22, 4294967280  ;;  %s12704_s4 = sld [smem:[#allocation9_spill]]  ;;  %p25_p3 = scmp.ge.s32.totalorder %s10256_s24, 4  }
 0xda2   : > { %s12705_s18 = smov %s10136_s19  ;;  %s12706_s19 = smov %s10140_s20 }
 0xda3   : > { %s12708_s21 = smov %s10256_s24  ;;  %27 = sbr.rel (!%p25_p3) target bundleno = 9 (0x9), region = 153 }
 0xda7   : > { %s12707_s20 = smov %s12704_s4 }
 0xdaa   :  { %7111 = vsyncpa [#allocation7], 1 }
 0xdab   :  { %7113 = vsyncpa [#allocation7 + $0x1], 1 }

</bundles_post_ra>
